<compile_context>
chip_gen: v5e
topology: v5e:2x2
jax: 0.10.0
libtpu: 0.0.40
codegen_flags: <defaults>
</compile_context>

<pallas_src>
import math

import jax
import jax.numpy as jnp
from jax.experimental import pallas as pl
from jax.experimental.pallas import tpu as pltpu

# ---------------- config (tiny synthetic BERT) ----------------
VOCAB = 100            # token id range
VOCAB_PAD = 128        # embedding table rows padded to a lane-friendly size
HIDDEN = 32            # bert.config.hidden_size
N_HEADS = 2
HEAD_DIM = HIDDEN // N_HEADS
INTER = 64             # intermediate_size
NUM_LAYERS = 2         # num_hidden_layers  (== n_layers mixed by ScalarMix)
MAX_LEN = 64           # max_position_embeddings (>= packed length -> stride loop is empty)
N_OUT = 24             # requested embedding size (!= HIDDEN -> Linear projection, no bias)
PAD_INDEX = 0
STRIDE = 5
LN_EPS = 1e-12

B, S, F = 2, 8, 4      # batch, seq_len, fix_len


# ---------------- in-kernel helpers ----------------
def _ln(x, g, b):
    mu = jnp.mean(x, axis=-1, keepdims=True)
    var = jnp.mean((x - mu) * (x - mu), axis=-1, keepdims=True)
    return (x - mu) * jax.lax.rsqrt(var + LN_EPS) * g + b


def _gelu(y):
    # TODO(synk): HF BERT default is exact erf-gelu; tanh approximation used here (EUP-friendly).
    return 0.5 * y * (1.0 + jnp.tanh(0.7978845608028654 * (y + 0.044715 * y * y * y)))


# ---------------- the fused Pallas kernel ----------------
def _fused_bert_kernel(onehot_ref, wemb_ref, ptemb_ref, embg_ref, embb_ref, bias_ref,
                       qkvw_ref, qkvb_ref, aow_ref, aob_ref, ln1g_ref, ln1b_ref,
                       iw_ref, ib_ref, ow_ref, ob_ref, ln2g_ref, ln2b_ref,
                       poolm_ref, projw_ref, mixw_ref, gamma_ref,
                       o_ref, ctx_sc):
    """Whole BertEmbedding forward for the batch, folded into (B*Lw) rows, all in VMEM."""
    scale = 1.0 / math.sqrt(HEAD_DIM)
    bias = bias_ref[...]                                       # (B*Lw, B*Lw) block-diag key mask

    # --- embeddings: one-hot gather on the MXU (kept f32: exact table values) + pos/type + LN ---
    emb = jnp.dot(onehot_ref[...], wemb_ref[...], preferred_element_type=jnp.float32)
    x = _ln(emb + ptemb_ref[...], embg_ref[...], embb_ref[...])

    # --- BERT layers, statically unrolled; ScalarMix accumulated on the fly (n_layers == all) ---
    mixed = jnp.zeros_like(x)
    for l in range(NUM_LAYERS):
        xb = x.astype(jnp.bfloat16)
        qkv = jnp.dot(xb, qkvw_ref[l], preferred_element_type=jnp.float32) + qkvb_ref[l]
        for hd in range(N_HEADS):
            q = qkv[:, hd * HEAD_DIM:(hd + 1) * HEAD_DIM].astype(jnp.bfloat16)
            k = qkv[:, HIDDEN + hd * HEAD_DIM:HIDDEN + (hd + 1) * HEAD_DIM].astype(jnp.bfloat16)
            v = qkv[:, 2 * HIDDEN + hd * HEAD_DIM:2 * HIDDEN + (hd + 1) * HEAD_DIM].astype(jnp.bfloat16)
            s = jax.lax.dot_general(q, k, (((1,), (1,)), ((), ())),
                                    preferred_element_type=jnp.float32) * scale + bias
            s = s - jnp.max(s, axis=-1, keepdims=True)
            p = jnp.exp(s)
            p = p * pl.reciprocal(jnp.sum(p, axis=-1, keepdims=True), approx=True)
            # per-head context written at its head offset; merged by ONE output-proj matmul below
            ctx_sc[:, hd * HEAD_DIM:(hd + 1) * HEAD_DIM] = jnp.dot(
                p.astype(jnp.bfloat16), v, preferred_element_type=jnp.float32)
        attn = jnp.dot(ctx_sc[...].astype(jnp.bfloat16), aow_ref[l],
                       preferred_element_type=jnp.float32) + aob_ref[l]
        h1 = _ln(attn + x, ln1g_ref[l], ln1b_ref[l])
        inter = _gelu(jnp.dot(h1.astype(jnp.bfloat16), iw_ref[l],
                              preferred_element_type=jnp.float32) + ib_ref[l])
        ff = jnp.dot(inter.astype(jnp.bfloat16), ow_ref[l],
                     preferred_element_type=jnp.float32) + ob_ref[l]
        x = _ln(ff + h1, ln2g_ref[l], ln2b_ref[l])
        mixed = mixed + mixw_ref[l] * x                        # ScalarMix over last NUM_LAYERS

    mixed = gamma_ref[0] * mixed                               # (B*Lw, H)

    # --- tail: masked scatter-back + mean over fix_len folded into one precomputed operator ---
    embed = jnp.dot(poolm_ref[...], mixed, preferred_element_type=jnp.float32)   # (B*S, H)
    o_ref[...] = jnp.dot(embed.astype(jnp.bfloat16), projw_ref[...],
                         preferred_element_type=jnp.float32)                      # (B*S, N_OUT)


# ---------------- pallas_call wrapper (single launch) ----------------
def _fused_call(params, onehot, ptemb, bias, pool_m, mixw):
    blw = onehot.shape[0]
    bs = pool_m.shape[0]
    bf = jnp.bfloat16

    def vspec(shape):
        zeros = (0,) * len(shape)
        return pl.BlockSpec(shape, lambda i, _z=zeros: _z)

    return pl.pallas_call(
        _fused_bert_kernel,
        out_shape=jax.ShapeDtypeStruct((bs, N_OUT), jnp.float32),
        grid=(1,),
        in_specs=[
            vspec((blw, VOCAB_PAD)),                         # token one-hot (lane-dense)
            vspec((VOCAB_PAD, HIDDEN)),                      # word embedding table (f32)
            vspec((blw, HIDDEN)),                            # pos+type embeddings (pre-tiled)
            vspec((1, HIDDEN)), vspec((1, HIDDEN)),          # embedding LN gamma/beta
            vspec((blw, blw)),                               # block-diagonal attention bias
            vspec((NUM_LAYERS, HIDDEN, 3 * HIDDEN)), vspec((NUM_LAYERS, 1, 3 * HIDDEN)),
            vspec((NUM_LAYERS, HIDDEN, HIDDEN)), vspec((NUM_LAYERS, 1, HIDDEN)),
            vspec((NUM_LAYERS, 1, HIDDEN)), vspec((NUM_LAYERS, 1, HIDDEN)),
            vspec((NUM_LAYERS, HIDDEN, INTER)), vspec((NUM_LAYERS, 1, INTER)),
            vspec((NUM_LAYERS, INTER, HIDDEN)), vspec((NUM_LAYERS, 1, HIDDEN)),
            vspec((NUM_LAYERS, 1, HIDDEN)), vspec((NUM_LAYERS, 1, HIDDEN)),
            vspec((bs, blw)),                                # fused scatter+mean operator
            vspec((HIDDEN, N_OUT)),                          # projection weight
            pl.BlockSpec(memory_space=pltpu.MemorySpace.SMEM),   # ScalarMix softmax weights
            pl.BlockSpec(memory_space=pltpu.MemorySpace.SMEM),   # ScalarMix gamma
        ],
        out_specs=vspec((bs, N_OUT)),
        scratch_shapes=[pltpu.VMEM((blw, HIDDEN), jnp.float32)],   # per-layer head-merge buffer
        compiler_params=pltpu.CompilerParams(dimension_semantics=("arbitrary",)),
    )(onehot, params['word_emb'], ptemb, params['emb_ln_g'], params['emb_ln_b'], bias,
      params['qkv_w'].astype(bf), params['qkv_b'],
      params['ao_w'].astype(bf), params['ao_b'],
      params['ln1_g'], params['ln1_b'],
      params['i_w'].astype(bf), params['i_b'],
      params['o_w'].astype(bf), params['o_b'],
      params['ln2_g'], params['ln2_b'],
      pool_m, params['proj_w'].astype(bf),
      mixw, params['mix_gamma'])


# ---------------- BertEmbedding.forward (JAX glue + single fused kernel) ----------------
def bert_embedding_forward(params, subwords):
    Bb, Ss, Ff = subwords.shape
    L = Ss * Ff
    if L > MAX_LEN:
        # TODO(synk): striding over packed length > max_position_embeddings not implemented
        #             (unreachable for this configuration).
        raise NotImplementedError("stride windows over max_len not implemented")

    mask = subwords != PAD_INDEX                               # (B,S,F) bool
    flat_mask = mask.reshape(Bb, L)
    flat_sub = subwords.reshape(Bb, L)
    maski = flat_mask.astype(jnp.int32)
    pos = jnp.cumsum(maski, axis=1) - 1                        # packed slot of each valid subword
    lens = maski.sum(-1)                                       # (B,)
    slot = jnp.arange(L, dtype=jnp.int32)

    # cumsum-based packing (no argsort): packed[b,p] = token at packed slot p, PAD elsewhere
    scat = ((pos[:, :, None] == slot[None, None, :]) & flat_mask[:, :, None]).astype(jnp.float32)
    packed = jnp.einsum('bjp,bj->bp', scat, flat_sub.astype(jnp.float32)).astype(jnp.int32)
    packed = jnp.where(slot[None, :] < lens[:, None], packed, PAD_INDEX)

    # lane-dense one-hot of packed token ids (embedding gather becomes a pure MXU op in-kernel)
    onehot = (packed[..., None] == jnp.arange(VOCAB_PAD, dtype=jnp.int32)).astype(jnp.float32)
    onehot = onehot.reshape(Bb * L, VOCAB_PAD)

    # batch folded into rows -> block-diagonal additive attention bias over keys
    validk = (slot[None, :] < lens[:, None]).astype(jnp.float32)                  # (B, Lw)
    allow = jnp.einsum('bc,cl->bcl', jnp.eye(Bb, dtype=jnp.float32), validk)      # (Bq, Bk, Lw)
    allow = jnp.broadcast_to(allow[:, None, :, :], (Bb, L, Bb, L)).reshape(Bb * L, Bb * L)
    bias = (1.0 - allow) * -1e9

    # positional + token-type embeddings, pre-tiled over the folded batch rows
    ptemb = jnp.tile(params['pos_emb'][:L], (Bb, 1)) + params['type_emb'][:1]

    # masked scatter-back + fix_len mean folded into ONE (B*S, B*Lw) linear operator
    pos3 = pos.reshape(Bb, Ss, Ff)
    wlens = mask.sum(-1)                                                          # (B, S)
    inv = 1.0 / jnp.maximum(wlens, 1).astype(jnp.float32)
    sel = ((pos3[..., None] == slot[None, None, None, :]) & mask[..., None]).astype(jnp.float32)
    m_b = sel.sum(2) * inv[..., None]                                             # (B, S, Lw)
    pool_m = jnp.einsum('bc,bsl->bscl', jnp.eye(Bb, dtype=jnp.float32), m_b)
    pool_m = pool_m.reshape(Bb * Ss, Bb * L)

    mixw = jax.nn.softmax(params['mix_w'])                     # ScalarMix softmax (glue)

    out = _fused_call(params, onehot, ptemb, bias, pool_m, mixw)   # (B*S, N_OUT) slab
    return out.reshape(Bb, Ss, N_OUT)


# ---------------- deterministic synthetic parameters ----------------
def init_params(key):
    keys = iter(jax.random.split(key, 64))

    def nrm(shape, scale=0.02):
        return scale * jax.random.normal(next(keys), shape, jnp.float32)

    def stack(fn):
        return jnp.stack([fn() for _ in range(NUM_LAYERS)])

    params = {
        'word_emb': nrm((VOCAB_PAD, HIDDEN)),      # rows >= VOCAB are never selected
        'pos_emb': nrm((MAX_LEN, HIDDEN)),
        'type_emb': nrm((2, HIDDEN)),
        'emb_ln_g': jnp.ones((1, HIDDEN), jnp.float32),
        'emb_ln_b': jnp.zeros((1, HIDDEN), jnp.float32),
        # per-layer weights stacked along a leading NUM_LAYERS axis (single VMEM-resident blob)
        'qkv_w': stack(lambda: jnp.concatenate(
            [nrm((HIDDEN, HIDDEN)), nrm((HIDDEN, HIDDEN)), nrm((HIDDEN, HIDDEN))], axis=1)),
        'qkv_b': jnp.zeros((NUM_LAYERS, 1, 3 * HIDDEN), jnp.float32),
        'ao_w': stack(lambda: nrm((HIDDEN, HIDDEN))),
        'ao_b': jnp.zeros((NUM_LAYERS, 1, HIDDEN), jnp.float32),
        'ln1_g': jnp.ones((NUM_LAYERS, 1, HIDDEN), jnp.float32),
        'ln1_b': jnp.zeros((NUM_LAYERS, 1, HIDDEN), jnp.float32),
        'i_w': stack(lambda: nrm((HIDDEN, INTER))),
        'i_b': jnp.zeros((NUM_LAYERS, 1, INTER), jnp.float32),
        'o_w': stack(lambda: nrm((INTER, HIDDEN))),
        'o_b': jnp.zeros((NUM_LAYERS, 1, HIDDEN), jnp.float32),
        'ln2_g': jnp.ones((NUM_LAYERS, 1, HIDDEN), jnp.float32),
        'ln2_b': jnp.zeros((NUM_LAYERS, 1, HIDDEN), jnp.float32),
        # ScalarMix.__init__: weights = zeros(n_layers), gamma = [1.0]
        'mix_w': jnp.zeros((NUM_LAYERS,), jnp.float32),
        'mix_gamma': jnp.ones((1,), jnp.float32),
        'proj_w': nrm((HIDDEN, N_OUT)),            # Linear(hidden, n_out, bias=False)
    }
    return params


if __name__ == "__main__":
    key = jax.random.PRNGKey(0)
    pkey, tkey = jax.random.split(key)
    params = init_params(pkey)

    # subwords: [B, S, F] int32, pad_index = 0
    subwords = jax.random.randint(tkey, (B, S, F), 1, VOCAB, dtype=jnp.int32)
    subwords = subwords.at[0, 6:, :].set(PAD_INDEX)   # padded trailing words in batch 0
    subwords = subwords.at[1, :, 3:].set(PAD_INDEX)   # shorter fix_len in batch 1
    subwords = subwords.at[1, 7, :].set(PAD_INDEX)    # a fully-padded word (bert_lens==0 path)

    fwd = jax.jit(bert_embedding_forward)
    out = fwd(params, subwords)
    out = jax.block_until_ready(out)

    assert out.shape == (B, S, N_OUT), out.shape
    assert bool(jnp.all(jnp.isfinite(out)))
    print("KERNEL_OK")
</pallas_src>

<mosaic_0001>
module attributes {stable_mosaic.version = 11 : i64} {
  func.func @_fused_bert_kernel(%arg0: i32, %arg1: memref<64x128xf32, #tpu.memory_space<vmem>>, %arg2: memref<128x32xf32, #tpu.memory_space<vmem>>, %arg3: memref<64x32xf32, #tpu.memory_space<vmem>>, %arg4: memref<1x32xf32, #tpu.memory_space<vmem>>, %arg5: memref<1x32xf32, #tpu.memory_space<vmem>>, %arg6: memref<64x64xf32, #tpu.memory_space<vmem>>, %arg7: memref<2x32x96xbf16, #tpu.memory_space<vmem>>, %arg8: memref<2x1x96xf32, #tpu.memory_space<vmem>>, %arg9: memref<2x32x32xbf16, #tpu.memory_space<vmem>>, %arg10: memref<2x1x32xf32, #tpu.memory_space<vmem>>, %arg11: memref<2x1x32xf32, #tpu.memory_space<vmem>>, %arg12: memref<2x1x32xf32, #tpu.memory_space<vmem>>, %arg13: memref<2x32x64xbf16, #tpu.memory_space<vmem>>, %arg14: memref<2x1x64xf32, #tpu.memory_space<vmem>>, %arg15: memref<2x64x32xbf16, #tpu.memory_space<vmem>>, %arg16: memref<2x1x32xf32, #tpu.memory_space<vmem>>, %arg17: memref<2x1x32xf32, #tpu.memory_space<vmem>>, %arg18: memref<2x1x32xf32, #tpu.memory_space<vmem>>, %arg19: memref<16x64xf32, #tpu.memory_space<vmem>>, %arg20: memref<32x24xbf16, #tpu.memory_space<vmem>>, %arg21: memref<2xf32, #tpu.memory_space<smem>>, %arg22: memref<1xf32, #tpu.memory_space<smem>>, %arg23: memref<16x24xf32, #tpu.memory_space<vmem>>, %arg24: memref<64x32xf32, #tpu.memory_space<vmem>>) attributes {dimension_semantics = [#tpu.dimension_semantics<arbitrary>], iteration_bounds = array<i64: 1>, scalar_prefetch = 0 : i64, scratch_operands = 1 : i64, tpu.core_type = #tpu.core_type<tc>, window_params = [{pipeline_mode = #tpu.pipeline_mode<synchronous>, transform_indices = @transform_0, window_bounds = array<i64: 64, 128>}, {pipeline_mode = #tpu.pipeline_mode<synchronous>, transform_indices = @transform_1, window_bounds = array<i64: 128, 32>}, {pipeline_mode = #tpu.pipeline_mode<synchronous>, transform_indices = @transform_2, window_bounds = array<i64: 64, 32>}, {pipeline_mode = #tpu.pipeline_mode<synchronous>, transform_indices = @transform_3, window_bounds = array<i64: 1, 32>}, {pipeline_mode = #tpu.pipeline_mode<synchronous>, transform_indices = @transform_4, window_bounds = array<i64: 1, 32>}, {pipeline_mode = #tpu.pipeline_mode<synchronous>, transform_indices = @transform_5, window_bounds = array<i64: 64, 64>}, {pipeline_mode = #tpu.pipeline_mode<synchronous>, transform_indices = @transform_6, window_bounds = array<i64: 2, 32, 96>}, {pipeline_mode = #tpu.pipeline_mode<synchronous>, transform_indices = @transform_7, window_bounds = array<i64: 2, 1, 96>}, {pipeline_mode = #tpu.pipeline_mode<synchronous>, transform_indices = @transform_8, window_bounds = array<i64: 2, 32, 32>}, {pipeline_mode = #tpu.pipeline_mode<synchronous>, transform_indices = @transform_9, window_bounds = array<i64: 2, 1, 32>}, {pipeline_mode = #tpu.pipeline_mode<synchronous>, transform_indices = @transform_10, window_bounds = array<i64: 2, 1, 32>}, {pipeline_mode = #tpu.pipeline_mode<synchronous>, transform_indices = @transform_11, window_bounds = array<i64: 2, 1, 32>}, {pipeline_mode = #tpu.pipeline_mode<synchronous>, transform_indices = @transform_12, window_bounds = array<i64: 2, 32, 64>}, {pipeline_mode = #tpu.pipeline_mode<synchronous>, transform_indices = @transform_13, window_bounds = array<i64: 2, 1, 64>}, {pipeline_mode = #tpu.pipeline_mode<synchronous>, transform_indices = @transform_14, window_bounds = array<i64: 2, 64, 32>}, {pipeline_mode = #tpu.pipeline_mode<synchronous>, transform_indices = @transform_15, window_bounds = array<i64: 2, 1, 32>}, {pipeline_mode = #tpu.pipeline_mode<synchronous>, transform_indices = @transform_16, window_bounds = array<i64: 2, 1, 32>}, {pipeline_mode = #tpu.pipeline_mode<synchronous>, transform_indices = @transform_17, window_bounds = array<i64: 2, 1, 32>}, {pipeline_mode = #tpu.pipeline_mode<synchronous>, transform_indices = @transform_18, window_bounds = array<i64: 16, 64>}, {pipeline_mode = #tpu.pipeline_mode<synchronous>, transform_indices = @transform_19, window_bounds = array<i64: 32, 24>}, {transform_indices = @transform_20, window_bounds = array<i64: 2>}, {transform_indices = @transform_21, window_bounds = array<i64: 1>}, {pipeline_mode = #tpu.pipeline_mode<synchronous>, transform_indices = @transform_22, window_bounds = array<i64: 16, 24>}]} {
    %c0 = arith.constant 0 : index
    %c0_0 = arith.constant 0 : index
    %0 = vector.load %arg6[%c0, %c0_0] : memref<64x64xf32, #tpu.memory_space<vmem>>, vector<64x64xf32>
    %c0_1 = arith.constant 0 : index
    %c0_2 = arith.constant 0 : index
    %1 = vector.load %arg1[%c0_1, %c0_2] : memref<64x128xf32, #tpu.memory_space<vmem>>, vector<64x128xf32>
    %c0_3 = arith.constant 0 : index
    %c0_4 = arith.constant 0 : index
    %2 = vector.load %arg2[%c0_3, %c0_4] : memref<128x32xf32, #tpu.memory_space<vmem>>, vector<128x32xf32>
    %cst = arith.constant dense<0.000000e+00> : vector<64x32xf32>
    %3 = tpu.matmul %1, %2, %cst {dimension_numbers = #tpu.dot_dimension_numbers<[1], [0], [0], [1], [0, 0, 1, 1], [], []>} : vector<64x128xf32>, vector<128x32xf32>, vector<64x32xf32> -> vector<64x32xf32>
    %c0_5 = arith.constant 0 : index
    %c0_6 = arith.constant 0 : index
    %4 = vector.load %arg3[%c0_5, %c0_6] : memref<64x32xf32, #tpu.memory_space<vmem>>, vector<64x32xf32>
    %5 = arith.addf %3, %4 : vector<64x32xf32>
    %c0_7 = arith.constant 0 : index
    %c0_8 = arith.constant 0 : index
    %6 = vector.load %arg4[%c0_7, %c0_8] : memref<1x32xf32, #tpu.memory_space<vmem>>, vector<1x32xf32>
    %c0_9 = arith.constant 0 : index
    %c0_10 = arith.constant 0 : index
    %7 = vector.load %arg5[%c0_9, %c0_10] : memref<1x32xf32, #tpu.memory_space<vmem>>, vector<1x32xf32>
    %cst_11 = arith.constant dense<0.000000e+00> : vector<64xf32>
    %8 = vector.multi_reduction <add>, %5, %cst_11 [1] : vector<64x32xf32> to vector<64xf32>
    %9 = vector.shape_cast %8 : vector<64xf32> to vector<64x1xf32>
    %cst_12 = arith.constant 3.200000e+01 : f32
    %10 = vector.broadcast %cst_12 : f32 to vector<64x1xf32>
    %11 = arith.divf %9, %10 : vector<64x1xf32>
    %12 = vector.broadcast %11 : vector<64x1xf32> to vector<64x32xf32>
    %13 = arith.subf %5, %12 : vector<64x32xf32>
    %14 = vector.broadcast %11 : vector<64x1xf32> to vector<64x32xf32>
    %15 = arith.subf %5, %14 : vector<64x32xf32>
    %16 = arith.mulf %13, %15 : vector<64x32xf32>
    %cst_13 = arith.constant dense<0.000000e+00> : vector<64xf32>
    %17 = vector.multi_reduction <add>, %16, %cst_13 [1] : vector<64x32xf32> to vector<64xf32>
    %18 = vector.shape_cast %17 : vector<64xf32> to vector<64x1xf32>
    %cst_14 = arith.constant 3.200000e+01 : f32
    %19 = vector.broadcast %cst_14 : f32 to vector<64x1xf32>
    %20 = arith.divf %18, %19 : vector<64x1xf32>
    %21 = vector.broadcast %11 : vector<64x1xf32> to vector<64x32xf32>
    %22 = arith.subf %5, %21 : vector<64x32xf32>
    %cst_15 = arith.constant 9.99999996E-13 : f32
    %23 = vector.broadcast %cst_15 : f32 to vector<64x1xf32>
    %24 = arith.addf %20, %23 : vector<64x1xf32>
    %25 = math.rsqrt %24 : vector<64x1xf32>
    %26 = vector.broadcast %25 : vector<64x1xf32> to vector<64x32xf32>
    %27 = arith.mulf %22, %26 : vector<64x32xf32>
    %28 = vector.broadcast %6 : vector<1x32xf32> to vector<64x32xf32>
    %29 = arith.mulf %27, %28 : vector<64x32xf32>
    %30 = vector.broadcast %7 : vector<1x32xf32> to vector<64x32xf32>
    %31 = arith.addf %29, %30 : vector<64x32xf32>
    %cst_16 = arith.constant 0.000000e+00 : f32
    %32 = vector.broadcast %cst_16 : f32 to vector<64x32xf32>
    %33 = arith.truncf %31 : vector<64x32xf32> to vector<64x32xbf16>
    %c0_17 = arith.constant 0 : index
    %c0_18 = arith.constant 0 : index
    %c0_19 = arith.constant 0 : index
    %34 = vector.load %arg7[%c0_17, %c0_18, %c0_19] : memref<2x32x96xbf16, #tpu.memory_space<vmem>>, vector<1x32x96xbf16>
    %35 = vector.shape_cast %34 : vector<1x32x96xbf16> to vector<32x96xbf16>
    %cst_20 = arith.constant dense<0.000000e+00> : vector<64x96xf32>
    %36 = tpu.matmul %33, %35, %cst_20 {dimension_numbers = #tpu.dot_dimension_numbers<[1], [0], [0], [1], [0, 0, 1, 1], [], []>} : vector<64x32xbf16>, vector<32x96xbf16>, vector<64x96xf32> -> vector<64x96xf32>
    %c0_21 = arith.constant 0 : index
    %c0_22 = arith.constant 0 : index
    %c0_23 = arith.constant 0 : index
    %37 = vector.load %arg8[%c0_21, %c0_22, %c0_23] : memref<2x1x96xf32, #tpu.memory_space<vmem>>, vector<1x1x96xf32>
    %38 = vector.shape_cast %37 : vector<1x1x96xf32> to vector<1x96xf32>
    %39 = vector.broadcast %38 : vector<1x96xf32> to vector<64x96xf32>
    %40 = arith.addf %36, %39 : vector<64x96xf32>
    %41 = vector.extract_strided_slice %40 {offsets = [0, 0], sizes = [64, 16], strides = [1, 1]} : vector<64x96xf32> to vector<64x16xf32>
    %42 = arith.truncf %41 : vector<64x16xf32> to vector<64x16xbf16>
    %43 = vector.extract_strided_slice %40 {offsets = [0, 32], sizes = [64, 16], strides = [1, 1]} : vector<64x96xf32> to vector<64x16xf32>
    %44 = arith.truncf %43 : vector<64x16xf32> to vector<64x16xbf16>
    %45 = vector.extract_strided_slice %40 {offsets = [0, 64], sizes = [64, 16], strides = [1, 1]} : vector<64x96xf32> to vector<64x16xf32>
    %46 = arith.truncf %45 : vector<64x16xf32> to vector<64x16xbf16>
    %cst_24 = arith.constant dense<0.000000e+00> : vector<64x64xf32>
    %47 = tpu.matmul %42, %44, %cst_24 {dimension_numbers = #tpu.dot_dimension_numbers<[1], [1], [0], [0], [0, 0, 1, 0], [], []>} : vector<64x16xbf16>, vector<64x16xbf16>, vector<64x64xf32> -> vector<64x64xf32>
    %cst_25 = arith.constant 2.500000e-01 : f32
    %48 = vector.broadcast %cst_25 : f32 to vector<64x64xf32>
    %49 = arith.mulf %47, %48 : vector<64x64xf32>
    %50 = arith.addf %49, %0 : vector<64x64xf32>
    %cst_26 = arith.constant dense<0xFF800000> : vector<64xf32>
    %51 = vector.multi_reduction <maximumf>, %50, %cst_26 [1] : vector<64x64xf32> to vector<64xf32>
    %52 = vector.shape_cast %51 : vector<64xf32> to vector<64x1xf32>
    %53 = vector.broadcast %52 : vector<64x1xf32> to vector<64x64xf32>
    %54 = arith.subf %50, %53 : vector<64x64xf32>
    %55 = math.exp %54 : vector<64x64xf32>
    %cst_27 = arith.constant dense<0.000000e+00> : vector<64xf32>
    %56 = vector.multi_reduction <add>, %55, %cst_27 [1] : vector<64x64xf32> to vector<64xf32>
    %57 = vector.shape_cast %56 : vector<64xf32> to vector<64x1xf32>
    %58 = tpu.reciprocal %57 {approx = true} : vector<64x1xf32> -> vector<64x1xf32>
    %59 = vector.broadcast %58 : vector<64x1xf32> to vector<64x64xf32>
    %60 = arith.mulf %55, %59 : vector<64x64xf32>
    %61 = arith.truncf %60 : vector<64x64xf32> to vector<64x64xbf16>
    %cst_28 = arith.constant dense<0.000000e+00> : vector<64x16xf32>
    %62 = tpu.matmul %61, %46, %cst_28 {dimension_numbers = #tpu.dot_dimension_numbers<[1], [0], [0], [1], [0, 0, 1, 1], [], []>} : vector<64x64xbf16>, vector<64x16xbf16>, vector<64x16xf32> -> vector<64x16xf32>
    %c0_29 = arith.constant 0 : index
    %c0_30 = arith.constant 0 : index
    %63 = vector.load %arg24[%c0_29, %c0_30] : memref<64x32xf32, #tpu.memory_space<vmem>>, vector<64x16xf32>
    tpu.vector_store %arg24[%c0_29, %c0_30], %62 {strides = array<i32>} : memref<64x32xf32, #tpu.memory_space<vmem>>, vector<64x16xf32>,
    %64 = vector.extract_strided_slice %40 {offsets = [0, 16], sizes = [64, 16], strides = [1, 1]} : vector<64x96xf32> to vector<64x16xf32>
    %65 = arith.truncf %64 : vector<64x16xf32> to vector<64x16xbf16>
    %66 = vector.extract_strided_slice %40 {offsets = [0, 48], sizes = [64, 16], strides = [1, 1]} : vector<64x96xf32> to vector<64x16xf32>
    %67 = arith.truncf %66 : vector<64x16xf32> to vector<64x16xbf16>
    %68 = vector.extract_strided_slice %40 {offsets = [0, 80], sizes = [64, 16], strides = [1, 1]} : vector<64x96xf32> to vector<64x16xf32>
    %69 = arith.truncf %68 : vector<64x16xf32> to vector<64x16xbf16>
    %cst_31 = arith.constant dense<0.000000e+00> : vector<64x64xf32>
    %70 = tpu.matmul %65, %67, %cst_31 {dimension_numbers = #tpu.dot_dimension_numbers<[1], [1], [0], [0], [0, 0, 1, 0], [], []>} : vector<64x16xbf16>, vector<64x16xbf16>, vector<64x64xf32> -> vector<64x64xf32>
    %cst_32 = arith.constant 2.500000e-01 : f32
    %71 = vector.broadcast %cst_32 : f32 to vector<64x64xf32>
    %72 = arith.mulf %70, %71 : vector<64x64xf32>
    %73 = arith.addf %72, %0 : vector<64x64xf32>
    %cst_33 = arith.constant dense<0xFF800000> : vector<64xf32>
    %74 = vector.multi_reduction <maximumf>, %73, %cst_33 [1] : vector<64x64xf32> to vector<64xf32>
    %75 = vector.shape_cast %74 : vector<64xf32> to vector<64x1xf32>
    %76 = vector.broadcast %75 : vector<64x1xf32> to vector<64x64xf32>
    %77 = arith.subf %73, %76 : vector<64x64xf32>
    %78 = math.exp %77 : vector<64x64xf32>
    %cst_34 = arith.constant dense<0.000000e+00> : vector<64xf32>
    %79 = vector.multi_reduction <add>, %78, %cst_34 [1] : vector<64x64xf32> to vector<64xf32>
    %80 = vector.shape_cast %79 : vector<64xf32> to vector<64x1xf32>
    %81 = tpu.reciprocal %80 {approx = true} : vector<64x1xf32> -> vector<64x1xf32>
    %82 = vector.broadcast %81 : vector<64x1xf32> to vector<64x64xf32>
    %83 = arith.mulf %78, %82 : vector<64x64xf32>
    %84 = arith.truncf %83 : vector<64x64xf32> to vector<64x64xbf16>
    %cst_35 = arith.constant dense<0.000000e+00> : vector<64x16xf32>
    %85 = tpu.matmul %84, %69, %cst_35 {dimension_numbers = #tpu.dot_dimension_numbers<[1], [0], [0], [1], [0, 0, 1, 1], [], []>} : vector<64x64xbf16>, vector<64x16xbf16>, vector<64x16xf32> -> vector<64x16xf32>
    %c0_36 = arith.constant 0 : index
    %c16 = arith.constant 16 : index
    %86 = vector.load %arg24[%c0_36, %c16] : memref<64x32xf32, #tpu.memory_space<vmem>>, vector<64x16xf32>
    tpu.vector_store %arg24[%c0_36, %c16], %85 {strides = array<i32>} : memref<64x32xf32, #tpu.memory_space<vmem>>, vector<64x16xf32>,
    %c0_37 = arith.constant 0 : index
    %c0_38 = arith.constant 0 : index
    %87 = vector.load %arg24[%c0_37, %c0_38] : memref<64x32xf32, #tpu.memory_space<vmem>>, vector<64x32xf32>
    %88 = arith.truncf %87 : vector<64x32xf32> to vector<64x32xbf16>
    %c0_39 = arith.constant 0 : index
    %c0_40 = arith.constant 0 : index
    %c0_41 = arith.constant 0 : index
    %89 = vector.load %arg9[%c0_39, %c0_40, %c0_41] : memref<2x32x32xbf16, #tpu.memory_space<vmem>>, vector<1x32x32xbf16>
    %90 = vector.shape_cast %89 : vector<1x32x32xbf16> to vector<32x32xbf16>
    %cst_42 = arith.constant dense<0.000000e+00> : vector<64x32xf32>
    %91 = tpu.matmul %88, %90, %cst_42 {dimension_numbers = #tpu.dot_dimension_numbers<[1], [0], [0], [1], [0, 0, 1, 1], [], []>} : vector<64x32xbf16>, vector<32x32xbf16>, vector<64x32xf32> -> vector<64x32xf32>
    %c0_43 = arith.constant 0 : index
    %c0_44 = arith.constant 0 : index
    %c0_45 = arith.constant 0 : index
    %92 = vector.load %arg10[%c0_43, %c0_44, %c0_45] : memref<2x1x32xf32, #tpu.memory_space<vmem>>, vector<1x1x32xf32>
    %93 = vector.shape_cast %92 : vector<1x1x32xf32> to vector<1x32xf32>
    %94 = vector.broadcast %93 : vector<1x32xf32> to vector<64x32xf32>
    %95 = arith.addf %91, %94 : vector<64x32xf32>
    %96 = arith.addf %95, %31 : vector<64x32xf32>
    %c0_46 = arith.constant 0 : index
    %c0_47 = arith.constant 0 : index
    %c0_48 = arith.constant 0 : index
    %97 = vector.load %arg11[%c0_46, %c0_47, %c0_48] : memref<2x1x32xf32, #tpu.memory_space<vmem>>, vector<1x1x32xf32>
    %98 = vector.shape_cast %97 : vector<1x1x32xf32> to vector<1x32xf32>
    %c0_49 = arith.constant 0 : index
    %c0_50 = arith.constant 0 : index
    %c0_51 = arith.constant 0 : index
    %99 = vector.load %arg12[%c0_49, %c0_50, %c0_51] : memref<2x1x32xf32, #tpu.memory_space<vmem>>, vector<1x1x32xf32>
    %100 = vector.shape_cast %99 : vector<1x1x32xf32> to vector<1x32xf32>
    %cst_52 = arith.constant dense<0.000000e+00> : vector<64xf32>
    %101 = vector.multi_reduction <add>, %96, %cst_52 [1] : vector<64x32xf32> to vector<64xf32>
    %102 = vector.shape_cast %101 : vector<64xf32> to vector<64x1xf32>
    %cst_53 = arith.constant 3.200000e+01 : f32
    %103 = vector.broadcast %cst_53 : f32 to vector<64x1xf32>
    %104 = arith.divf %102, %103 : vector<64x1xf32>
    %105 = vector.broadcast %104 : vector<64x1xf32> to vector<64x32xf32>
    %106 = arith.subf %96, %105 : vector<64x32xf32>
    %107 = vector.broadcast %104 : vector<64x1xf32> to vector<64x32xf32>
    %108 = arith.subf %96, %107 : vector<64x32xf32>
    %109 = arith.mulf %106, %108 : vector<64x32xf32>
    %cst_54 = arith.constant dense<0.000000e+00> : vector<64xf32>
    %110 = vector.multi_reduction <add>, %109, %cst_54 [1] : vector<64x32xf32> to vector<64xf32>
    %111 = vector.shape_cast %110 : vector<64xf32> to vector<64x1xf32>
    %cst_55 = arith.constant 3.200000e+01 : f32
    %112 = vector.broadcast %cst_55 : f32 to vector<64x1xf32>
    %113 = arith.divf %111, %112 : vector<64x1xf32>
    %114 = vector.broadcast %104 : vector<64x1xf32> to vector<64x32xf32>
    %115 = arith.subf %96, %114 : vector<64x32xf32>
    %cst_56 = arith.constant 9.99999996E-13 : f32
    %116 = vector.broadcast %cst_56 : f32 to vector<64x1xf32>
    %117 = arith.addf %113, %116 : vector<64x1xf32>
    %118 = math.rsqrt %117 : vector<64x1xf32>
    %119 = vector.broadcast %118 : vector<64x1xf32> to vector<64x32xf32>
    %120 = arith.mulf %115, %119 : vector<64x32xf32>
    %121 = vector.broadcast %98 : vector<1x32xf32> to vector<64x32xf32>
    %122 = arith.mulf %120, %121 : vector<64x32xf32>
    %123 = vector.broadcast %100 : vector<1x32xf32> to vector<64x32xf32>
    %124 = arith.addf %122, %123 : vector<64x32xf32>
    %125 = arith.truncf %124 : vector<64x32xf32> to vector<64x32xbf16>
    %c0_57 = arith.constant 0 : index
    %c0_58 = arith.constant 0 : index
    %c0_59 = arith.constant 0 : index
    %126 = vector.load %arg13[%c0_57, %c0_58, %c0_59] : memref<2x32x64xbf16, #tpu.memory_space<vmem>>, vector<1x32x64xbf16>
    %127 = vector.shape_cast %126 : vector<1x32x64xbf16> to vector<32x64xbf16>
    %cst_60 = arith.constant dense<0.000000e+00> : vector<64x64xf32>
    %128 = tpu.matmul %125, %127, %cst_60 {dimension_numbers = #tpu.dot_dimension_numbers<[1], [0], [0], [1], [0, 0, 1, 1], [], []>} : vector<64x32xbf16>, vector<32x64xbf16>, vector<64x64xf32> -> vector<64x64xf32>
    %c0_61 = arith.constant 0 : index
    %c0_62 = arith.constant 0 : index
    %c0_63 = arith.constant 0 : index
    %129 = vector.load %arg14[%c0_61, %c0_62, %c0_63] : memref<2x1x64xf32, #tpu.memory_space<vmem>>, vector<1x1x64xf32>
    %130 = vector.shape_cast %129 : vector<1x1x64xf32> to vector<1x64xf32>
    %131 = vector.broadcast %130 : vector<1x64xf32> to vector<64x64xf32>
    %132 = arith.addf %128, %131 : vector<64x64xf32>
    %cst_64 = arith.constant 5.000000e-01 : f32
    %133 = vector.broadcast %cst_64 : f32 to vector<64x64xf32>
    %134 = arith.mulf %133, %132 : vector<64x64xf32>
    %cst_65 = arith.constant 4.471500e-02 : f32
    %135 = vector.broadcast %cst_65 : f32 to vector<64x64xf32>
    %136 = arith.mulf %135, %132 : vector<64x64xf32>
    %137 = arith.mulf %136, %132 : vector<64x64xf32>
    %138 = arith.mulf %137, %132 : vector<64x64xf32>
    %139 = arith.addf %132, %138 : vector<64x64xf32>
    %cst_66 = arith.constant 0.797884583 : f32
    %140 = vector.broadcast %cst_66 : f32 to vector<64x64xf32>
    %141 = arith.mulf %140, %139 : vector<64x64xf32>
    %142 = math.tanh %141 : vector<64x64xf32>
    %cst_67 = arith.constant 1.000000e+00 : f32
    %143 = vector.broadcast %cst_67 : f32 to vector<64x64xf32>
    %144 = arith.addf %143, %142 : vector<64x64xf32>
    %145 = arith.mulf %134, %144 : vector<64x64xf32>
    %146 = arith.truncf %145 : vector<64x64xf32> to vector<64x64xbf16>
    %c0_68 = arith.constant 0 : index
    %c0_69 = arith.constant 0 : index
    %c0_70 = arith.constant 0 : index
    %147 = vector.load %arg15[%c0_68, %c0_69, %c0_70] : memref<2x64x32xbf16, #tpu.memory_space<vmem>>, vector<1x64x32xbf16>
    %148 = vector.shape_cast %147 : vector<1x64x32xbf16> to vector<64x32xbf16>
    %cst_71 = arith.constant dense<0.000000e+00> : vector<64x32xf32>
    %149 = tpu.matmul %146, %148, %cst_71 {dimension_numbers = #tpu.dot_dimension_numbers<[1], [0], [0], [1], [0, 0, 1, 1], [], []>} : vector<64x64xbf16>, vector<64x32xbf16>, vector<64x32xf32> -> vector<64x32xf32>
    %c0_72 = arith.constant 0 : index
    %c0_73 = arith.constant 0 : index
    %c0_74 = arith.constant 0 : index
    %150 = vector.load %arg16[%c0_72, %c0_73, %c0_74] : memref<2x1x32xf32, #tpu.memory_space<vmem>>, vector<1x1x32xf32>
    %151 = vector.shape_cast %150 : vector<1x1x32xf32> to vector<1x32xf32>
    %152 = vector.broadcast %151 : vector<1x32xf32> to vector<64x32xf32>
    %153 = arith.addf %149, %152 : vector<64x32xf32>
    %154 = arith.addf %153, %124 : vector<64x32xf32>
    %c0_75 = arith.constant 0 : index
    %c0_76 = arith.constant 0 : index
    %c0_77 = arith.constant 0 : index
    %155 = vector.load %arg17[%c0_75, %c0_76, %c0_77] : memref<2x1x32xf32, #tpu.memory_space<vmem>>, vector<1x1x32xf32>
    %156 = vector.shape_cast %155 : vector<1x1x32xf32> to vector<1x32xf32>
    %c0_78 = arith.constant 0 : index
    %c0_79 = arith.constant 0 : index
    %c0_80 = arith.constant 0 : index
    %157 = vector.load %arg18[%c0_78, %c0_79, %c0_80] : memref<2x1x32xf32, #tpu.memory_space<vmem>>, vector<1x1x32xf32>
    %158 = vector.shape_cast %157 : vector<1x1x32xf32> to vector<1x32xf32>
    %cst_81 = arith.constant dense<0.000000e+00> : vector<64xf32>
    %159 = vector.multi_reduction <add>, %154, %cst_81 [1] : vector<64x32xf32> to vector<64xf32>
    %160 = vector.shape_cast %159 : vector<64xf32> to vector<64x1xf32>
    %cst_82 = arith.constant 3.200000e+01 : f32
    %161 = vector.broadcast %cst_82 : f32 to vector<64x1xf32>
    %162 = arith.divf %160, %161 : vector<64x1xf32>
    %163 = vector.broadcast %162 : vector<64x1xf32> to vector<64x32xf32>
    %164 = arith.subf %154, %163 : vector<64x32xf32>
    %165 = vector.broadcast %162 : vector<64x1xf32> to vector<64x32xf32>
    %166 = arith.subf %154, %165 : vector<64x32xf32>
    %167 = arith.mulf %164, %166 : vector<64x32xf32>
    %cst_83 = arith.constant dense<0.000000e+00> : vector<64xf32>
    %168 = vector.multi_reduction <add>, %167, %cst_83 [1] : vector<64x32xf32> to vector<64xf32>
    %169 = vector.shape_cast %168 : vector<64xf32> to vector<64x1xf32>
    %cst_84 = arith.constant 3.200000e+01 : f32
    %170 = vector.broadcast %cst_84 : f32 to vector<64x1xf32>
    %171 = arith.divf %169, %170 : vector<64x1xf32>
    %172 = vector.broadcast %162 : vector<64x1xf32> to vector<64x32xf32>
    %173 = arith.subf %154, %172 : vector<64x32xf32>
    %cst_85 = arith.constant 9.99999996E-13 : f32
    %174 = vector.broadcast %cst_85 : f32 to vector<64x1xf32>
    %175 = arith.addf %171, %174 : vector<64x1xf32>
    %176 = math.rsqrt %175 : vector<64x1xf32>
    %177 = vector.broadcast %176 : vector<64x1xf32> to vector<64x32xf32>
    %178 = arith.mulf %173, %177 : vector<64x32xf32>
    %179 = vector.broadcast %156 : vector<1x32xf32> to vector<64x32xf32>
    %180 = arith.mulf %178, %179 : vector<64x32xf32>
    %181 = vector.broadcast %158 : vector<1x32xf32> to vector<64x32xf32>
    %182 = arith.addf %180, %181 : vector<64x32xf32>
    %c0_86 = arith.constant 0 : index
    %183 = memref.load %arg21[%c0_86] : memref<2xf32, #tpu.memory_space<smem>>
    %184 = vector.broadcast %183 : f32 to vector<64x32xf32>
    %185 = arith.mulf %184, %182 : vector<64x32xf32>
    %186 = arith.addf %32, %185 : vector<64x32xf32>
    %187 = arith.truncf %182 : vector<64x32xf32> to vector<64x32xbf16>
    %c1 = arith.constant 1 : index
    %c0_87 = arith.constant 0 : index
    %c0_88 = arith.constant 0 : index
    %188 = vector.load %arg7[%c1, %c0_87, %c0_88] : memref<2x32x96xbf16, #tpu.memory_space<vmem>>, vector<1x32x96xbf16>
    %189 = vector.shape_cast %188 : vector<1x32x96xbf16> to vector<32x96xbf16>
    %cst_89 = arith.constant dense<0.000000e+00> : vector<64x96xf32>
    %190 = tpu.matmul %187, %189, %cst_89 {dimension_numbers = #tpu.dot_dimension_numbers<[1], [0], [0], [1], [0, 0, 1, 1], [], []>} : vector<64x32xbf16>, vector<32x96xbf16>, vector<64x96xf32> -> vector<64x96xf32>
    %c1_90 = arith.constant 1 : index
    %c0_91 = arith.constant 0 : index
    %c0_92 = arith.constant 0 : index
    %191 = vector.load %arg8[%c1_90, %c0_91, %c0_92] : memref<2x1x96xf32, #tpu.memory_space<vmem>>, vector<1x1x96xf32>
    %192 = vector.shape_cast %191 : vector<1x1x96xf32> to vector<1x96xf32>
    %193 = vector.broadcast %192 : vector<1x96xf32> to vector<64x96xf32>
    %194 = arith.addf %190, %193 : vector<64x96xf32>
    %195 = vector.extract_strided_slice %194 {offsets = [0, 0], sizes = [64, 16], strides = [1, 1]} : vector<64x96xf32> to vector<64x16xf32>
    %196 = arith.truncf %195 : vector<64x16xf32> to vector<64x16xbf16>
    %197 = vector.extract_strided_slice %194 {offsets = [0, 32], sizes = [64, 16], strides = [1, 1]} : vector<64x96xf32> to vector<64x16xf32>
    %198 = arith.truncf %197 : vector<64x16xf32> to vector<64x16xbf16>
    %199 = vector.extract_strided_slice %194 {offsets = [0, 64], sizes = [64, 16], strides = [1, 1]} : vector<64x96xf32> to vector<64x16xf32>
    %200 = arith.truncf %199 : vector<64x16xf32> to vector<64x16xbf16>
    %cst_93 = arith.constant dense<0.000000e+00> : vector<64x64xf32>
    %201 = tpu.matmul %196, %198, %cst_93 {dimension_numbers = #tpu.dot_dimension_numbers<[1], [1], [0], [0], [0, 0, 1, 0], [], []>} : vector<64x16xbf16>, vector<64x16xbf16>, vector<64x64xf32> -> vector<64x64xf32>
    %cst_94 = arith.constant 2.500000e-01 : f32
    %202 = vector.broadcast %cst_94 : f32 to vector<64x64xf32>
    %203 = arith.mulf %201, %202 : vector<64x64xf32>
    %204 = arith.addf %203, %0 : vector<64x64xf32>
    %cst_95 = arith.constant dense<0xFF800000> : vector<64xf32>
    %205 = vector.multi_reduction <maximumf>, %204, %cst_95 [1] : vector<64x64xf32> to vector<64xf32>
    %206 = vector.shape_cast %205 : vector<64xf32> to vector<64x1xf32>
    %207 = vector.broadcast %206 : vector<64x1xf32> to vector<64x64xf32>
    %208 = arith.subf %204, %207 : vector<64x64xf32>
    %209 = math.exp %208 : vector<64x64xf32>
    %cst_96 = arith.constant dense<0.000000e+00> : vector<64xf32>
    %210 = vector.multi_reduction <add>, %209, %cst_96 [1] : vector<64x64xf32> to vector<64xf32>
    %211 = vector.shape_cast %210 : vector<64xf32> to vector<64x1xf32>
    %212 = tpu.reciprocal %211 {approx = true} : vector<64x1xf32> -> vector<64x1xf32>
    %213 = vector.broadcast %212 : vector<64x1xf32> to vector<64x64xf32>
    %214 = arith.mulf %209, %213 : vector<64x64xf32>
    %215 = arith.truncf %214 : vector<64x64xf32> to vector<64x64xbf16>
    %cst_97 = arith.constant dense<0.000000e+00> : vector<64x16xf32>
    %216 = tpu.matmul %215, %200, %cst_97 {dimension_numbers = #tpu.dot_dimension_numbers<[1], [0], [0], [1], [0, 0, 1, 1], [], []>} : vector<64x64xbf16>, vector<64x16xbf16>, vector<64x16xf32> -> vector<64x16xf32>
    %c0_98 = arith.constant 0 : index
    %c0_99 = arith.constant 0 : index
    %217 = vector.load %arg24[%c0_98, %c0_99] : memref<64x32xf32, #tpu.memory_space<vmem>>, vector<64x16xf32>
    tpu.vector_store %arg24[%c0_98, %c0_99], %216 {strides = array<i32>} : memref<64x32xf32, #tpu.memory_space<vmem>>, vector<64x16xf32>,
    %218 = vector.extract_strided_slice %194 {offsets = [0, 16], sizes = [64, 16], strides = [1, 1]} : vector<64x96xf32> to vector<64x16xf32>
    %219 = arith.truncf %218 : vector<64x16xf32> to vector<64x16xbf16>
    %220 = vector.extract_strided_slice %194 {offsets = [0, 48], sizes = [64, 16], strides = [1, 1]} : vector<64x96xf32> to vector<64x16xf32>
    %221 = arith.truncf %220 : vector<64x16xf32> to vector<64x16xbf16>
    %222 = vector.extract_strided_slice %194 {offsets = [0, 80], sizes = [64, 16], strides = [1, 1]} : vector<64x96xf32> to vector<64x16xf32>
    %223 = arith.truncf %222 : vector<64x16xf32> to vector<64x16xbf16>
    %cst_100 = arith.constant dense<0.000000e+00> : vector<64x64xf32>
    %224 = tpu.matmul %219, %221, %cst_100 {dimension_numbers = #tpu.dot_dimension_numbers<[1], [1], [0], [0], [0, 0, 1, 0], [], []>} : vector<64x16xbf16>, vector<64x16xbf16>, vector<64x64xf32> -> vector<64x64xf32>
    %cst_101 = arith.constant 2.500000e-01 : f32
    %225 = vector.broadcast %cst_101 : f32 to vector<64x64xf32>
    %226 = arith.mulf %224, %225 : vector<64x64xf32>
    %227 = arith.addf %226, %0 : vector<64x64xf32>
    %cst_102 = arith.constant dense<0xFF800000> : vector<64xf32>
    %228 = vector.multi_reduction <maximumf>, %227, %cst_102 [1] : vector<64x64xf32> to vector<64xf32>
    %229 = vector.shape_cast %228 : vector<64xf32> to vector<64x1xf32>
    %230 = vector.broadcast %229 : vector<64x1xf32> to vector<64x64xf32>
    %231 = arith.subf %227, %230 : vector<64x64xf32>
    %232 = math.exp %231 : vector<64x64xf32>
    %cst_103 = arith.constant dense<0.000000e+00> : vector<64xf32>
    %233 = vector.multi_reduction <add>, %232, %cst_103 [1] : vector<64x64xf32> to vector<64xf32>
    %234 = vector.shape_cast %233 : vector<64xf32> to vector<64x1xf32>
    %235 = tpu.reciprocal %234 {approx = true} : vector<64x1xf32> -> vector<64x1xf32>
    %236 = vector.broadcast %235 : vector<64x1xf32> to vector<64x64xf32>
    %237 = arith.mulf %232, %236 : vector<64x64xf32>
    %238 = arith.truncf %237 : vector<64x64xf32> to vector<64x64xbf16>
    %cst_104 = arith.constant dense<0.000000e+00> : vector<64x16xf32>
    %239 = tpu.matmul %238, %223, %cst_104 {dimension_numbers = #tpu.dot_dimension_numbers<[1], [0], [0], [1], [0, 0, 1, 1], [], []>} : vector<64x64xbf16>, vector<64x16xbf16>, vector<64x16xf32> -> vector<64x16xf32>
    %c0_105 = arith.constant 0 : index
    %c16_106 = arith.constant 16 : index
    %240 = vector.load %arg24[%c0_105, %c16_106] : memref<64x32xf32, #tpu.memory_space<vmem>>, vector<64x16xf32>
    tpu.vector_store %arg24[%c0_105, %c16_106], %239 {strides = array<i32>} : memref<64x32xf32, #tpu.memory_space<vmem>>, vector<64x16xf32>,
    %c0_107 = arith.constant 0 : index
    %c0_108 = arith.constant 0 : index
    %241 = vector.load %arg24[%c0_107, %c0_108] : memref<64x32xf32, #tpu.memory_space<vmem>>, vector<64x32xf32>
    %242 = arith.truncf %241 : vector<64x32xf32> to vector<64x32xbf16>
    %c1_109 = arith.constant 1 : index
    %c0_110 = arith.constant 0 : index
    %c0_111 = arith.constant 0 : index
    %243 = vector.load %arg9[%c1_109, %c0_110, %c0_111] : memref<2x32x32xbf16, #tpu.memory_space<vmem>>, vector<1x32x32xbf16>
    %244 = vector.shape_cast %243 : vector<1x32x32xbf16> to vector<32x32xbf16>
    %cst_112 = arith.constant dense<0.000000e+00> : vector<64x32xf32>
    %245 = tpu.matmul %242, %244, %cst_112 {dimension_numbers = #tpu.dot_dimension_numbers<[1], [0], [0], [1], [0, 0, 1, 1], [], []>} : vector<64x32xbf16>, vector<32x32xbf16>, vector<64x32xf32> -> vector<64x32xf32>
    %c1_113 = arith.constant 1 : index
    %c0_114 = arith.constant 0 : index
    %c0_115 = arith.constant 0 : index
    %246 = vector.load %arg10[%c1_113, %c0_114, %c0_115] : memref<2x1x32xf32, #tpu.memory_space<vmem>>, vector<1x1x32xf32>
    %247 = vector.shape_cast %246 : vector<1x1x32xf32> to vector<1x32xf32>
    %248 = vector.broadcast %247 : vector<1x32xf32> to vector<64x32xf32>
    %249 = arith.addf %245, %248 : vector<64x32xf32>
    %250 = arith.addf %249, %182 : vector<64x32xf32>
    %c1_116 = arith.constant 1 : index
    %c0_117 = arith.constant 0 : index
    %c0_118 = arith.constant 0 : index
    %251 = vector.load %arg11[%c1_116, %c0_117, %c0_118] : memref<2x1x32xf32, #tpu.memory_space<vmem>>, vector<1x1x32xf32>
    %252 = vector.shape_cast %251 : vector<1x1x32xf32> to vector<1x32xf32>
    %c1_119 = arith.constant 1 : index
    %c0_120 = arith.constant 0 : index
    %c0_121 = arith.constant 0 : index
    %253 = vector.load %arg12[%c1_119, %c0_120, %c0_121] : memref<2x1x32xf32, #tpu.memory_space<vmem>>, vector<1x1x32xf32>
    %254 = vector.shape_cast %253 : vector<1x1x32xf32> to vector<1x32xf32>
    %cst_122 = arith.constant dense<0.000000e+00> : vector<64xf32>
    %255 = vector.multi_reduction <add>, %250, %cst_122 [1] : vector<64x32xf32> to vector<64xf32>
    %256 = vector.shape_cast %255 : vector<64xf32> to vector<64x1xf32>
    %cst_123 = arith.constant 3.200000e+01 : f32
    %257 = vector.broadcast %cst_123 : f32 to vector<64x1xf32>
    %258 = arith.divf %256, %257 : vector<64x1xf32>
    %259 = vector.broadcast %258 : vector<64x1xf32> to vector<64x32xf32>
    %260 = arith.subf %250, %259 : vector<64x32xf32>
    %261 = vector.broadcast %258 : vector<64x1xf32> to vector<64x32xf32>
    %262 = arith.subf %250, %261 : vector<64x32xf32>
    %263 = arith.mulf %260, %262 : vector<64x32xf32>
    %cst_124 = arith.constant dense<0.000000e+00> : vector<64xf32>
    %264 = vector.multi_reduction <add>, %263, %cst_124 [1] : vector<64x32xf32> to vector<64xf32>
    %265 = vector.shape_cast %264 : vector<64xf32> to vector<64x1xf32>
    %cst_125 = arith.constant 3.200000e+01 : f32
    %266 = vector.broadcast %cst_125 : f32 to vector<64x1xf32>
    %267 = arith.divf %265, %266 : vector<64x1xf32>
    %268 = vector.broadcast %258 : vector<64x1xf32> to vector<64x32xf32>
    %269 = arith.subf %250, %268 : vector<64x32xf32>
    %cst_126 = arith.constant 9.99999996E-13 : f32
    %270 = vector.broadcast %cst_126 : f32 to vector<64x1xf32>
    %271 = arith.addf %267, %270 : vector<64x1xf32>
    %272 = math.rsqrt %271 : vector<64x1xf32>
    %273 = vector.broadcast %272 : vector<64x1xf32> to vector<64x32xf32>
    %274 = arith.mulf %269, %273 : vector<64x32xf32>
    %275 = vector.broadcast %252 : vector<1x32xf32> to vector<64x32xf32>
    %276 = arith.mulf %274, %275 : vector<64x32xf32>
    %277 = vector.broadcast %254 : vector<1x32xf32> to vector<64x32xf32>
    %278 = arith.addf %276, %277 : vector<64x32xf32>
    %279 = arith.truncf %278 : vector<64x32xf32> to vector<64x32xbf16>
    %c1_127 = arith.constant 1 : index
    %c0_128 = arith.constant 0 : index
    %c0_129 = arith.constant 0 : index
    %280 = vector.load %arg13[%c1_127, %c0_128, %c0_129] : memref<2x32x64xbf16, #tpu.memory_space<vmem>>, vector<1x32x64xbf16>
    %281 = vector.shape_cast %280 : vector<1x32x64xbf16> to vector<32x64xbf16>
    %cst_130 = arith.constant dense<0.000000e+00> : vector<64x64xf32>
    %282 = tpu.matmul %279, %281, %cst_130 {dimension_numbers = #tpu.dot_dimension_numbers<[1], [0], [0], [1], [0, 0, 1, 1], [], []>} : vector<64x32xbf16>, vector<32x64xbf16>, vector<64x64xf32> -> vector<64x64xf32>
    %c1_131 = arith.constant 1 : index
    %c0_132 = arith.constant 0 : index
    %c0_133 = arith.constant 0 : index
    %283 = vector.load %arg14[%c1_131, %c0_132, %c0_133] : memref<2x1x64xf32, #tpu.memory_space<vmem>>, vector<1x1x64xf32>
    %284 = vector.shape_cast %283 : vector<1x1x64xf32> to vector<1x64xf32>
    %285 = vector.broadcast %284 : vector<1x64xf32> to vector<64x64xf32>
    %286 = arith.addf %282, %285 : vector<64x64xf32>
    %cst_134 = arith.constant 5.000000e-01 : f32
    %287 = vector.broadcast %cst_134 : f32 to vector<64x64xf32>
    %288 = arith.mulf %287, %286 : vector<64x64xf32>
    %cst_135 = arith.constant 4.471500e-02 : f32
    %289 = vector.broadcast %cst_135 : f32 to vector<64x64xf32>
    %290 = arith.mulf %289, %286 : vector<64x64xf32>
    %291 = arith.mulf %290, %286 : vector<64x64xf32>
    %292 = arith.mulf %291, %286 : vector<64x64xf32>
    %293 = arith.addf %286, %292 : vector<64x64xf32>
    %cst_136 = arith.constant 0.797884583 : f32
    %294 = vector.broadcast %cst_136 : f32 to vector<64x64xf32>
    %295 = arith.mulf %294, %293 : vector<64x64xf32>
    %296 = math.tanh %295 : vector<64x64xf32>
    %cst_137 = arith.constant 1.000000e+00 : f32
    %297 = vector.broadcast %cst_137 : f32 to vector<64x64xf32>
    %298 = arith.addf %297, %296 : vector<64x64xf32>
    %299 = arith.mulf %288, %298 : vector<64x64xf32>
    %300 = arith.truncf %299 : vector<64x64xf32> to vector<64x64xbf16>
    %c1_138 = arith.constant 1 : index
    %c0_139 = arith.constant 0 : index
    %c0_140 = arith.constant 0 : index
    %301 = vector.load %arg15[%c1_138, %c0_139, %c0_140] : memref<2x64x32xbf16, #tpu.memory_space<vmem>>, vector<1x64x32xbf16>
    %302 = vector.shape_cast %301 : vector<1x64x32xbf16> to vector<64x32xbf16>
    %cst_141 = arith.constant dense<0.000000e+00> : vector<64x32xf32>
    %303 = tpu.matmul %300, %302, %cst_141 {dimension_numbers = #tpu.dot_dimension_numbers<[1], [0], [0], [1], [0, 0, 1, 1], [], []>} : vector<64x64xbf16>, vector<64x32xbf16>, vector<64x32xf32> -> vector<64x32xf32>
    %c1_142 = arith.constant 1 : index
    %c0_143 = arith.constant 0 : index
    %c0_144 = arith.constant 0 : index
    %304 = vector.load %arg16[%c1_142, %c0_143, %c0_144] : memref<2x1x32xf32, #tpu.memory_space<vmem>>, vector<1x1x32xf32>
    %305 = vector.shape_cast %304 : vector<1x1x32xf32> to vector<1x32xf32>
    %306 = vector.broadcast %305 : vector<1x32xf32> to vector<64x32xf32>
    %307 = arith.addf %303, %306 : vector<64x32xf32>
    %308 = arith.addf %307, %278 : vector<64x32xf32>
    %c1_145 = arith.constant 1 : index
    %c0_146 = arith.constant 0 : index
    %c0_147 = arith.constant 0 : index
    %309 = vector.load %arg17[%c1_145, %c0_146, %c0_147] : memref<2x1x32xf32, #tpu.memory_space<vmem>>, vector<1x1x32xf32>
    %310 = vector.shape_cast %309 : vector<1x1x32xf32> to vector<1x32xf32>
    %c1_148 = arith.constant 1 : index
    %c0_149 = arith.constant 0 : index
    %c0_150 = arith.constant 0 : index
    %311 = vector.load %arg18[%c1_148, %c0_149, %c0_150] : memref<2x1x32xf32, #tpu.memory_space<vmem>>, vector<1x1x32xf32>
    %312 = vector.shape_cast %311 : vector<1x1x32xf32> to vector<1x32xf32>
    %cst_151 = arith.constant dense<0.000000e+00> : vector<64xf32>
    %313 = vector.multi_reduction <add>, %308, %cst_151 [1] : vector<64x32xf32> to vector<64xf32>
    %314 = vector.shape_cast %313 : vector<64xf32> to vector<64x1xf32>
    %cst_152 = arith.constant 3.200000e+01 : f32
    %315 = vector.broadcast %cst_152 : f32 to vector<64x1xf32>
    %316 = arith.divf %314, %315 : vector<64x1xf32>
    %317 = vector.broadcast %316 : vector<64x1xf32> to vector<64x32xf32>
    %318 = arith.subf %308, %317 : vector<64x32xf32>
    %319 = vector.broadcast %316 : vector<64x1xf32> to vector<64x32xf32>
    %320 = arith.subf %308, %319 : vector<64x32xf32>
    %321 = arith.mulf %318, %320 : vector<64x32xf32>
    %cst_153 = arith.constant dense<0.000000e+00> : vector<64xf32>
    %322 = vector.multi_reduction <add>, %321, %cst_153 [1] : vector<64x32xf32> to vector<64xf32>
    %323 = vector.shape_cast %322 : vector<64xf32> to vector<64x1xf32>
    %cst_154 = arith.constant 3.200000e+01 : f32
    %324 = vector.broadcast %cst_154 : f32 to vector<64x1xf32>
    %325 = arith.divf %323, %324 : vector<64x1xf32>
    %326 = vector.broadcast %316 : vector<64x1xf32> to vector<64x32xf32>
    %327 = arith.subf %308, %326 : vector<64x32xf32>
    %cst_155 = arith.constant 9.99999996E-13 : f32
    %328 = vector.broadcast %cst_155 : f32 to vector<64x1xf32>
    %329 = arith.addf %325, %328 : vector<64x1xf32>
    %330 = math.rsqrt %329 : vector<64x1xf32>
    %331 = vector.broadcast %330 : vector<64x1xf32> to vector<64x32xf32>
    %332 = arith.mulf %327, %331 : vector<64x32xf32>
    %333 = vector.broadcast %310 : vector<1x32xf32> to vector<64x32xf32>
    %334 = arith.mulf %332, %333 : vector<64x32xf32>
    %335 = vector.broadcast %312 : vector<1x32xf32> to vector<64x32xf32>
    %336 = arith.addf %334, %335 : vector<64x32xf32>
    %c1_156 = arith.constant 1 : index
    %337 = memref.load %arg21[%c1_156] : memref<2xf32, #tpu.memory_space<smem>>
    %338 = vector.broadcast %337 : f32 to vector<64x32xf32>
    %339 = arith.mulf %338, %336 : vector<64x32xf32>
    %340 = arith.addf %186, %339 : vector<64x32xf32>
    %c0_157 = arith.constant 0 : index
    %341 = memref.load %arg22[%c0_157] : memref<1xf32, #tpu.memory_space<smem>>
    %342 = vector.broadcast %341 : f32 to vector<64x32xf32>
    %343 = arith.mulf %342, %340 : vector<64x32xf32>
    %c0_158 = arith.constant 0 : index
    %c0_159 = arith.constant 0 : index
    %344 = vector.load %arg19[%c0_158, %c0_159] : memref<16x64xf32, #tpu.memory_space<vmem>>, vector<16x64xf32>
    %cst_160 = arith.constant dense<0.000000e+00> : vector<16x32xf32>
    %345 = tpu.matmul %344, %343, %cst_160 {dimension_numbers = #tpu.dot_dimension_numbers<[1], [0], [0], [1], [0, 0, 1, 1], [], []>} : vector<16x64xf32>, vector<64x32xf32>, vector<16x32xf32> -> vector<16x32xf32>
    %346 = arith.truncf %345 : vector<16x32xf32> to vector<16x32xbf16>
    %c0_161 = arith.constant 0 : index
    %c0_162 = arith.constant 0 : index
    %347 = vector.load %arg20[%c0_161, %c0_162] : memref<32x24xbf16, #tpu.memory_space<vmem>>, vector<32x24xbf16>
    %cst_163 = arith.constant dense<0.000000e+00> : vector<16x24xf32>
    %348 = tpu.matmul %346, %347, %cst_163 {dimension_numbers = #tpu.dot_dimension_numbers<[1], [0], [0], [1], [0, 0, 1, 1], [], []>} : vector<16x32xbf16>, vector<32x24xbf16>, vector<16x24xf32> -> vector<16x24xf32>
    %c0_164 = arith.constant 0 : index
    %c0_165 = arith.constant 0 : index
    %349 = vector.load %arg23[%c0_164, %c0_165] : memref<16x24xf32, #tpu.memory_space<vmem>>, vector<16x24xf32>
    tpu.vector_store %arg23[%c0_164, %c0_165], %348 {strides = array<i32>} : memref<16x24xf32, #tpu.memory_space<vmem>>, vector<16x24xf32>,
    return
  }
  func.func @transform_0(%arg0: i32) -> (i32, i32) {
    %c0_i32 = arith.constant 0 : i32
    %c0_i32_0 = arith.constant 0 : i32
    %c0_i32_1 = arith.constant 0 : i32
    return %c0_i32, %c0_i32_0 : i32, i32
  }
  func.func @transform_1(%arg0: i32) -> (i32, i32) {
    %c0_i32 = arith.constant 0 : i32
    %c0_i32_0 = arith.constant 0 : i32
    %c0_i32_1 = arith.constant 0 : i32
    return %c0_i32, %c0_i32_0 : i32, i32
  }
  func.func @transform_2(%arg0: i32) -> (i32, i32) {
    %c0_i32 = arith.constant 0 : i32
    %c0_i32_0 = arith.constant 0 : i32
    %c0_i32_1 = arith.constant 0 : i32
    return %c0_i32, %c0_i32_0 : i32, i32
  }
  func.func @transform_3(%arg0: i32) -> (i32, i32) {
    %c0_i32 = arith.constant 0 : i32
    %c0_i32_0 = arith.constant 0 : i32
    %c0_i32_1 = arith.constant 0 : i32
    return %c0_i32, %c0_i32_0 : i32, i32
  }
  func.func @transform_4(%arg0: i32) -> (i32, i32) {
    %c0_i32 = arith.constant 0 : i32
    %c0_i32_0 = arith.constant 0 : i32
    %c0_i32_1 = arith.constant 0 : i32
    return %c0_i32, %c0_i32_0 : i32, i32
  }
  func.func @transform_5(%arg0: i32) -> (i32, i32) {
    %c0_i32 = arith.constant 0 : i32
    %c0_i32_0 = arith.constant 0 : i32
    %c0_i32_1 = arith.constant 0 : i32
    return %c0_i32, %c0_i32_0 : i32, i32
  }
  func.func @transform_6(%arg0: i32) -> (i32, i32, i32) {
    %c0_i32 = arith.constant 0 : i32
    %c0_i32_0 = arith.constant 0 : i32
    %c0_i32_1 = arith.constant 0 : i32
    %c0_i32_2 = arith.constant 0 : i32
    return %c0_i32, %c0_i32_0, %c0_i32_1 : i32, i32, i32
  }
  func.func @transform_7(%arg0: i32) -> (i32, i32, i32) {
    %c0_i32 = arith.constant 0 : i32
    %c0_i32_0 = arith.constant 0 : i32
    %c0_i32_1 = arith.constant 0 : i32
    %c0_i32_2 = arith.constant 0 : i32
    return %c0_i32, %c0_i32_0, %c0_i32_1 : i32, i32, i32
  }
  func.func @transform_8(%arg0: i32) -> (i32, i32, i32) {
    %c0_i32 = arith.constant 0 : i32
    %c0_i32_0 = arith.constant 0 : i32
    %c0_i32_1 = arith.constant 0 : i32
    %c0_i32_2 = arith.constant 0 : i32
    return %c0_i32, %c0_i32_0, %c0_i32_1 : i32, i32, i32
  }
  func.func @transform_9(%arg0: i32) -> (i32, i32, i32) {
    %c0_i32 = arith.constant 0 : i32
    %c0_i32_0 = arith.constant 0 : i32
    %c0_i32_1 = arith.constant 0 : i32
    %c0_i32_2 = arith.constant 0 : i32
    return %c0_i32, %c0_i32_0, %c0_i32_1 : i32, i32, i32
  }
  func.func @transform_10(%arg0: i32) -> (i32, i32, i32) {
    %c0_i32 = arith.constant 0 : i32
    %c0_i32_0 = arith.constant 0 : i32
    %c0_i32_1 = arith.constant 0 : i32
    %c0_i32_2 = arith.constant 0 : i32
    return %c0_i32, %c0_i32_0, %c0_i32_1 : i32, i32, i32
  }
  func.func @transform_11(%arg0: i32) -> (i32, i32, i32) {
    %c0_i32 = arith.constant 0 : i32
    %c0_i32_0 = arith.constant 0 : i32
    %c0_i32_1 = arith.constant 0 : i32
    %c0_i32_2 = arith.constant 0 : i32
    return %c0_i32, %c0_i32_0, %c0_i32_1 : i32, i32, i32
  }
  func.func @transform_12(%arg0: i32) -> (i32, i32, i32) {
    %c0_i32 = arith.constant 0 : i32
    %c0_i32_0 = arith.constant 0 : i32
    %c0_i32_1 = arith.constant 0 : i32
    %c0_i32_2 = arith.constant 0 : i32
    return %c0_i32, %c0_i32_0, %c0_i32_1 : i32, i32, i32
  }
  func.func @transform_13(%arg0: i32) -> (i32, i32, i32) {
    %c0_i32 = arith.constant 0 : i32
    %c0_i32_0 = arith.constant 0 : i32
    %c0_i32_1 = arith.constant 0 : i32
    %c0_i32_2 = arith.constant 0 : i32
    return %c0_i32, %c0_i32_0, %c0_i32_1 : i32, i32, i32
  }
  func.func @transform_14(%arg0: i32) -> (i32, i32, i32) {
    %c0_i32 = arith.constant 0 : i32
    %c0_i32_0 = arith.constant 0 : i32
    %c0_i32_1 = arith.constant 0 : i32
    %c0_i32_2 = arith.constant 0 : i32
    return %c0_i32, %c0_i32_0, %c0_i32_1 : i32, i32, i32
  }
  func.func @transform_15(%arg0: i32) -> (i32, i32, i32) {
    %c0_i32 = arith.constant 0 : i32
    %c0_i32_0 = arith.constant 0 : i32
    %c0_i32_1 = arith.constant 0 : i32
    %c0_i32_2 = arith.constant 0 : i32
    return %c0_i32, %c0_i32_0, %c0_i32_1 : i32, i32, i32
  }
  func.func @transform_16(%arg0: i32) -> (i32, i32, i32) {
    %c0_i32 = arith.constant 0 : i32
    %c0_i32_0 = arith.constant 0 : i32
    %c0_i32_1 = arith.constant 0 : i32
    %c0_i32_2 = arith.constant 0 : i32
    return %c0_i32, %c0_i32_0, %c0_i32_1 : i32, i32, i32
  }
  func.func @transform_17(%arg0: i32) -> (i32, i32, i32) {
    %c0_i32 = arith.constant 0 : i32
    %c0_i32_0 = arith.constant 0 : i32
    %c0_i32_1 = arith.constant 0 : i32
    %c0_i32_2 = arith.constant 0 : i32
    return %c0_i32, %c0_i32_0, %c0_i32_1 : i32, i32, i32
  }
  func.func @transform_18(%arg0: i32) -> (i32, i32) {
    %c0_i32 = arith.constant 0 : i32
    %c0_i32_0 = arith.constant 0 : i32
    %c0_i32_1 = arith.constant 0 : i32
    return %c0_i32, %c0_i32_0 : i32, i32
  }
  func.func @transform_19(%arg0: i32) -> (i32, i32) {
    %c0_i32 = arith.constant 0 : i32
    %c0_i32_0 = arith.constant 0 : i32
    %c0_i32_1 = arith.constant 0 : i32
    return %c0_i32, %c0_i32_0 : i32, i32
  }
  func.func @transform_20(%arg0: i32) -> i32 {
    %c0_i32 = arith.constant 0 : i32
    %c0_i32_0 = arith.constant 0 : i32
    return %c0_i32 : i32
  }
  func.func @transform_21(%arg0: i32) -> i32 {
    %c0_i32 = arith.constant 0 : i32
    %c0_i32_0 = arith.constant 0 : i32
    return %c0_i32 : i32
  }
  func.func @transform_22(%arg0: i32) -> (i32, i32) {
    %c0_i32 = arith.constant 0 : i32
    %c0_i32_0 = arith.constant 0 : i32
    %c0_i32_1 = arith.constant 0 : i32
    return %c0_i32, %c0_i32_0 : i32, i32
  }
}

</mosaic_0001>

<bundles_post_ra>
// kernel: bert_embedding_forward.1
= control target key start
LH: loop header
LB: loop body
LE: loop exit
PB: predicated region body
PF: predicated region fallthrough
CT: control target
= control target key end

     0   :  { %s5304_s0 = inlined_call_operand.vmem [shape: f32[64,128], index: 0, kind: input, shape index: {}]   ;;  %s5305_s1 = inlined_call_operand.vmem [shape: f32[128,32], index: 1, kind: input, shape index: {}]   ;;  %s5306_s2 = inlined_call_operand.vmem [shape: f32[64,32], index: 2, kind: input, shape index: {}]   ;;  %s5307_s3 = inlined_call_operand.vmem [shape: f32[1,32], index: 3, kind: input, shape index: {}]   ;;  %s5308_s4 = inlined_call_operand.vmem [shape: f32[1,32], index: 4, kind: input, shape index: {}]   ;;  %s5309_s5 = inlined_call_operand.vmem [shape: f32[64,64], index: 5, kind: input, shape index: {}]   ;;  %s5310_s6 = inlined_call_operand.vmem [shape: bf16[2,32,96], index: 6, kind: input, shape index: {}]   ;;  %s5311_s7 = inlined_call_operand.vmem [shape: f32[2,1,96], index: 7, kind: input, shape index: {}]   ;;  %s5312_s8 = inlined_call_operand.vmem [shape: bf16[2,32,32], index: 8, kind: input, shape index: {}]   ;;  %s5313_s9 = inlined_call_operand.vmem [shape: f32[2,1,32], index: 9, kind: input, shape index: {}]   ;;  %s5314_s10 = inlined_call_operand.vmem [shape: f32[2,1,32], index: 10, kind: input, shape index: {}]   ;;  %s5315_s11 = inlined_call_operand.vmem [shape: f32[2,1,32], index: 11, kind: input, shape index: {}]   ;;  %s5316_s12 = inlined_call_operand.vmem [shape: bf16[2,32,64], index: 12, kind: input, shape index: {}]   ;;  %s5317_s13 = inlined_call_operand.vmem [shape: f32[2,1,64], index: 13, kind: input, shape index: {}]   ;;  %s5318_s14 = inlined_call_operand.vmem [shape: bf16[2,64,32], index: 14, kind: input, shape index: {}]   ;;  %s5319_s15 = inlined_call_operand.vmem [shape: f32[2,1,32], index: 15, kind: input, shape index: {}]   ;;  %s5320_s16 = inlined_call_operand.vmem [shape: f32[2,1,32], index: 16, kind: input, shape index: {}]   ;;  %s5321_s17 = inlined_call_operand.vmem [shape: f32[2,1,32], index: 17, kind: input, shape index: {}]   ;;  %s5322_s18 = inlined_call_operand.vmem [shape: f32[16,64], index: 18, kind: input, shape index: {}]   ;;  %s5323_s19 = inlined_call_operand.vmem [shape: bf16[32,24], index: 19, kind: input, shape index: {}]   ;;  %s5324_s20 = inlined_call_operand.vmem [shape: f32[2], index: 20, kind: input, shape index: {}]   ;;  %s5325_s21 = inlined_call_operand.<no memory space> [shape: f32[1], index: 21, kind: input, shape index: {}]   ;;  %s5326_s22 = inlined_call_operand.hbm [shape: f32[16,24], index: 22, kind: output, shape index: {}]  }
   0x1   :  { %5332 = sst [smem:[#allocation10_spill]] %s5304_s0 }
   0x2   :  { %5333 = sst [smem:[#allocation11_spill]] %s5305_s1 }
   0x3   :  { %5334 = sst [smem:[#allocation12_spill]] %s5306_s2 }
   0x4   :  { %5335 = sst [smem:[#allocation13_spill]] %s5307_s3 }
   0x5   :  { %5336 = sst [smem:[#allocation14_spill]] %s5308_s4 }
   0x6   :  { %5337 = sst [smem:[#allocation15_spill]] %s5309_s5 }
   0x7   :  { %5338 = sst [smem:[#allocation16_spill]] %s5310_s6 }
   0x8   :  { %28 = vsyncpa [#allocation6], 0 }
   0x9   :  { %29 = vsyncpa [#allocation5], 0  ;;  %s75_s29 = sshll.u32 %s5324_s20, 4  ;;  %s3611_s30 = smov [#allocation4]   ;;  %s76_s29 = int_to_ptr.vmem [resolvable:$true] %s75_s29 }
   0xa   :  { %78 = dma.vmem_to_smem %s76_s29, 16, %s3611_s30, [#allocation6]  }
   0xb   :  { %3607 = dma.done.wait [#allocation6], 16  }
   0xc   :  { %3608 = vsyncadd [#allocation6], 4294967280 }
   0xd   :  { %85 = sfence }
   0xe   :  { %s5339_s23 = sld [smem:[#allocation11_spill]]  ;;  %vm170_vm0 = vcmask 261120   ;;  %v3612_v56 = vmov 32.0   ;;  %s3613_s0 = smov 96  }
   0xf   :  { %s5340_s24 = sld [smem:[#allocation10_spill]]  ;;  %3321 = vrcp.f32 %v3612_v56  ;;  %s3614_s1 = smov 80  }
  0x10   :  { %s5341_s20 = sld [smem:[#allocation12_spill]]  ;;  %s3615_s5 = smov 112  }
  0x11   :  { %s5342_s25 = sld [smem:[#allocation16_spill]]  ;;  %s3616_s6 = smov 64  }
  0x12   :  { %s5346_s29 = sld [smem:[#allocation14_spill]]  ;;  %s3617_s2 = smov 48  }
  0x13   :  { %s3619_s3 = smov [#allocation7]   ;;  %s3071_s30 = sshll.u32 %s5326_s22, 4  ;;  %s3072_s30 = int_to_ptr.hbm [resolvable:$true] %s3071_s30 }
  0x14   :  { %v118_v0 = vld [vmem:[%s5339_s23 + $0x78] sm:$0xff]  ;;  %v117_v1 = vld [vmem:[%s5339_s23 + $0x70] sm:$0xff]  ;;  %v116_v2 = vld [vmem:[%s5339_s23 + $0x68] sm:$0xff]  ;;  %s3621_s4 = smov 8  }
  0x15   :  { %127 = vmatpush.msra.mxu0 %v118_v0  ;;  %v115_v3 = vld [vmem:[%s5339_s23 + $0x60] sm:$0xff]  ;;  %v114_v4 = vld [vmem:[%s5339_s23 + $0x58] sm:$0xff]  ;;  %v113_v5 = vld [vmem:[%s5339_s23 + $0x50] sm:$0xff]  ;;  %v3322_v57 = vpop.eup %3321 }
  0x16   :  { %v112_v6 = vld [vmem:[%s5339_s23 + $0x48] sm:$0xff]  ;;  %v111_v7 = vld [vmem:[%s5339_s23 + $0x40] sm:$0xff]  ;;  %v110_v8 = vld [vmem:[%s5339_s23 + $0x38] sm:$0xff]  ;;  %v196_v58 = vmul.f32 32.0, %v3322_v57  ;;  %vm200_vm1 = vweird.f32 %v3322_v57 }
  0x17   :  { %128 = vmatpush.msra.mxu0 %v117_v1  ;;  %v109_v9 = vld [vmem:[%s5339_s23 + $0x30] sm:$0xff]  ;;  %v108_v10 = vld [vmem:[%s5339_s23 + $0x28] sm:$0xff]  ;;  %v107_v11 = vld [vmem:[%s5339_s23 + $0x20] sm:$0xff] }
  0x18   :  { %v106_v12 = vld [vmem:[%s5339_s23 + $0x18] sm:$0xff]  ;;  %v105_v13 = vld [vmem:[%s5339_s23 + $0x10] sm:$0xff]  ;;  %v104_v14 = vld [vmem:[%s5339_s23 + $0x8] sm:$0xff]  ;;  %v197_v59 = vsub.f32 1.0, %v196_v58 }
  0x19   :  { %129 = vmatpush.msra.mxu0 %v116_v2  ;;  %v103_v15 = vld [vmem:[%s5339_s23] sm:$0xff]  ;;  %v96_v17 = vld [vmem:[%s5340_s24 + $0x8] sm:$0xff]  ;;  %v97_v18 = vld [vmem:[%s5340_s24 + $0x10] sm:$0xff]  ;;  %s5345_s23 = sld [smem:[#allocation13_spill]] }
  0x1a   :  { %v95_v16 = vld [vmem:[%s5340_s24] sm:$0xff]  ;;  %v98_v19 = vld [vmem:[%s5340_s24 + $0x18] sm:$0xff]  ;;  %v100_v21 = vld [vmem:[%s5340_s24 + $0x28] sm:$0xff]  ;;  %v198_v60 = vmul.f32 %v3322_v57, %v197_v59 }
  0x1b   :  { %130 = vmatpush.msra.mxu0 %v115_v3  ;;  %v99_v20 = vld [vmem:[%s5340_s24 + $0x20] sm:$0xff]  ;;  %v101_v22 = vld [vmem:[%s5340_s24 + $0x30] sm:$0xff]  ;;  %v102_v23 = vld [vmem:[%s5340_s24 + $0x38] sm:$0xff]  ;;  %s5349_s24 = sld [smem:[#allocation15_spill]] }
  0x1c   :  { %v119_v24 = vld [vmem:[%s5341_s20] sm:$0xff]  ;;  %v120_v28 = vld [vmem:[%s5341_s20 + $0x8] sm:$0xff]  ;;  %v121_v42 = vld [vmem:[%s5341_s20 + $0x10] sm:$0xff]  ;;  %v199_v61 = vadd.f32 %v3322_v57, %v198_v60 }
  0x1d   :  { %131 = vmatpush.msra.mxu0 %v114_v4  ;;  %v123_v34 = vld [vmem:[%s5341_s20 + $0x20] sm:$0xff]  ;;  %v124_v38 = vld [vmem:[%s5341_s20 + $0x28] sm:$0xff]  ;;  %v125_v43 = vld [vmem:[%s5341_s20 + $0x30] sm:$0xff] }
  0x1e   :  { %v126_v49 = vld [vmem:[%s5341_s20 + $0x38] sm:$0xff]  ;;  %v3847_v62 = vsel %vm200_vm1, %v3322_v57, %v199_v61 }
  0x1f   :  { %132 = vmatpush.msra.mxu0 %v113_v5  ;;  %v122_v53 = vld [vmem:[%s5341_s20 + $0x18] sm:$0xff] }
  0x21   :  { %133 = vmatpush.msra.mxu0 %v112_v6 }
  0x23   :  { %134 = vmatpush.msra.mxu0 %v111_v7 }
  0x25   :  { %135 = vmatpush.msra.mxu0 %v110_v8 }
  0x27   :  { %136 = vmatpush.msra.mxu0 %v109_v9 }
  0x29   :  { %137 = vmatpush.msra.mxu0 %v108_v10 }
  0x2b   :  { %138 = vmatpush.msra.mxu0 %v107_v11 }
  0x2d   :  { %139 = vmatpush.msra.mxu0 %v106_v12 }
  0x2f   :  { %140 = vmatpush.msra.mxu0 %v105_v13 }
  0x31   :  { %141 = vmatpush.msra.mxu0 %v104_v14 }
  0x33   :  { %142 = vmatpush.msra.mxu0 %v103_v15 }
  0x34   :  { %143 = vmatmul.f32.vlgmr.msra.gmra.mxu0 %v95_v16 }
  0x3c   :  { %146 = vmatmul.f32.gmra.mxu0 %v96_v17 }
  0x44   :  { %149 = vmatmul.f32.gmra.mxu0 %v97_v18 }
  0x4c   :  { %152 = vmatmul.f32.gmra.mxu0 %v98_v19 }
  0x54   :  { %155 = vmatmul.f32.gmra.mxu0 %v99_v20 }
  0x5c   :  { %158 = vmatmul.f32.gmra.mxu0 %v100_v21 }
  0x64   :  { %161 = vmatmul.f32.gmra.mxu0 %v101_v22 }
  0x6c   :  { %164 = vmatmul.f32.gmra.mxu0 %v102_v23 }
  0xb1   :  { %v144_v25 = vpop.f32.mrf.mxu0 }
  0xb2   :  { %v145_v26 = vadd.f32 %v144_v25, %v119_v24 }
  0xb4   :  { %v171_v27 = vsel %vm170_vm0, %v145_v26, 0.0 }
  0xb5   :  { %172 = vadd.xlane.f32.xlu2 %v171_v27 }
  0xb9   :  { %v147_v29 = vpop.f32.mrf.mxu0 }
  0xba   :  { %v3819_v30 = vadd.f32 %v147_v29, %v120_v28 }
  0xbc   :  { %v174_v31 = vsel %vm170_vm0, %v3819_v30, 0.0 }
  0xbd   :  { %175 = vadd.xlane.f32.xlu2 %v174_v31 }
  0xc1   :  { %v150_v32 = vpop.f32.mrf.mxu0 }
  0xc2   :  { %v151_v44 = vadd.f32 %v150_v32, %v121_v42 }
  0xc4   :  { %v177_v48 = vsel %vm170_vm0, %v151_v44, 0.0 }
  0xc9   :  { %v153_v33 = vpop.f32.mrf.mxu0 }
  0xca   :  { %v154_v54 = vadd.f32 %v153_v33, %v122_v53 }
  0xcc   :  { %v180_v55 = vsel %vm170_vm0, %v154_v54, 0.0 }
  0xd1   :  { %v156_v35 = vpop.f32.mrf.mxu0 }
  0xd2   :  { %v157_v36 = vadd.f32 %v156_v35, %v123_v34 }
  0xd4   :  { %v183_v37 = vsel %vm170_vm0, %v157_v36, 0.0 }
  0xd5   :  { %184 = vadd.xlane.f32.xlu0 %v183_v37 }
  0xd9   :  { %v159_v39 = vpop.f32.mrf.mxu0 }
  0xda   :  { %v160_v40 = vadd.f32 %v159_v39, %v124_v38  ;;  %v3269_v39 = vld [vmem:[%s5342_s25 + $0x8] sm:$0xff] }
  0xdb   :  { %3290 = vmatpush.bf16.msra.mxu2 %v3269_v39  ;;  %418 = vmatpush.bf16.msra.mxu1 %v3269_v39 }
  0xdc   :  { %v186_v41 = vsel %vm170_vm0, %v160_v40, 0.0 }
  0xdd   :  { %187 = vadd.xlane.f32.xlu0 %v186_v41 }
  0xe1   :  { %v162_v45 = vpop.f32.mrf.mxu0 }
  0xe2   :  { %v163_v46 = vadd.f32 %v162_v45, %v125_v43  ;;  %v3268_v43 = vld [vmem:[%s5342_s25] sm:$0xff] }
  0xe3   :  { %3291 = vmatpush.bf16.msra.mxu2 %v3268_v43  ;;  %419 = vmatpush.bf16.msra.mxu1 %v3268_v43 }
  0xe4   :  { %v189_v47 = vsel %vm170_vm0, %v163_v46, 0.0 }
  0xe5   :  { %190 = vadd.xlane.f32.xlu1 %v189_v47  ;;  %178 = vadd.xlane.f32.xlu0 %v177_v48 }
  0xe9   :  { %v165_v50 = vpop.f32.mrf.mxu0 }
  0xea   :  { %v166_v51 = vadd.f32 %v165_v50, %v126_v49 }
  0xec   :  { %v192_v52 = vsel %vm170_vm0, %v166_v51, 0.0 }
  0xed   :  { %193 = vadd.xlane.f32.xlu1 %v192_v52 }
  0xf5   :  { %181 = vadd.xlane.f32.xlu1 %v180_v55 }
 0x128   :  { %v173_v3 = vpop.xlane.xlu2 %172 }
 0x129   :  { %v202_v7 = vmul.f32 %v3847_v62, %v173_v3 }
 0x12b   :  { %v3861_v10 = vsub.f32 %v145_v26, %v202_v7 }
 0x12d   :  { %v218_v17 = vmul.f32 %v3861_v10, %v3861_v10 }
 0x12f   :  { %v226_v21 = vsel %vm170_vm0, %v218_v17, 0.0 }
 0x130   :  { %v176_v12 = vpop.xlane.xlu2 %175 }
 0x131   :  { %v203_v15 = vmul.f32 %v3847_v62, %v176_v12 }
 0x133   :  { %v3873_v19 = vsub.f32 %v3819_v30, %v203_v15 }
 0x135   :  { %v219_v27 = vmul.f32 %v3873_v19, %v3873_v19 }
 0x137   :  { %v229_v31 = vsel %vm170_vm0, %v219_v27, 0.0 }
 0x148   :  { %v185_v63 = vpop.xlane.xlu0 %184 }
 0x149   :  { %v206_v0 = vmul.f32 %v3847_v62, %v185_v63 }
 0x14b   :  { %v3850_v1 = vsub.f32 %v157_v36, %v206_v0 }
 0x14d   :  { %v222_v2 = vmul.f32 %v3850_v1, %v3850_v1 }
 0x14f   :  { %v238_v4 = vsel %vm170_vm0, %v222_v2, 0.0 }
 0x150   :  { %v188_v5 = vpop.xlane.xlu0 %187  ;;  %239 = vadd.xlane.f32.xlu2 %v238_v4 }
 0x151   :  { %v207_v6 = vmul.f32 %v3847_v62, %v188_v5 }
 0x153   :  { %v3857_v8 = vsub.f32 %v160_v40, %v207_v6 }
 0x155   :  { %v223_v9 = vmul.f32 %v3857_v8, %v3857_v8 }
 0x157   :  { %v241_v11 = vsel %vm170_vm0, %v223_v9, 0.0 }
 0x158   :  { %v191_v13 = vpop.xlane.xlu1 %190  ;;  %242 = vadd.xlane.f32.xlu0 %v241_v11  ;;  %v179_v22 = vpop.xlane.xlu0 %178 }
 0x159   :  { %v208_v14 = vmul.f32 %v3847_v62, %v191_v13  ;;  %v204_v25 = vmul.f32 %v3847_v62, %v179_v22 }
 0x15b   :  { %v3866_v16 = vsub.f32 %v163_v46, %v208_v14  ;;  %v3885_v29 = vsub.f32 %v151_v44, %v204_v25 }
 0x15d   :  { %v224_v18 = vmul.f32 %v3866_v16, %v3866_v16  ;;  %v220_v35 = vmul.f32 %v3885_v29, %v3885_v29 }
 0x15f   :  { %v244_v20 = vsel %vm170_vm0, %v224_v18, 0.0  ;;  %v232_v37 = vsel %vm170_vm0, %v220_v35, 0.0  ;;  %v3931_v18 = vld [vmem:[%s5345_s23] ss:$0 sm:$0xff] }
 0x160   :  { %v194_v23 = vpop.xlane.xlu1 %193  ;;  %245 = vadd.xlane.f32.xlu1 %v244_v20  ;;  %227 = vadd.xlane.f32.xlu0 %v226_v21 }
 0x161   :  { %v209_v24 = vmul.f32 %v3847_v62, %v194_v23 }
 0x163   :  { %v3879_v26 = vsub.f32 %v166_v51, %v209_v24 }
 0x165   :  { %v225_v28 = vmul.f32 %v3879_v26, %v3879_v26 }
 0x167   :  { %v247_v30 = vsel %vm170_vm0, %v225_v28, 0.0 }
 0x168   :  { %v182_v32 = vpop.xlane.xlu1 %181  ;;  %248 = vadd.xlane.f32.xlu2 %v247_v30  ;;  %230 = vadd.xlane.f32.xlu1 %v229_v31  ;;  %v3941_v30 = vld [vmem:[%s5346_s29] ss:$0 sm:$0xff]  ;;  %s3618_s29 = smov 16  }
 0x169   :  { %v205_v33 = vmul.f32 %v3847_v62, %v182_v32 }
 0x16b   :  { %v3890_v34 = vsub.f32 %v154_v54, %v205_v33 }
 0x16d   :  { %v221_v36 = vmul.f32 %v3890_v34, %v3890_v34 }
 0x16f   :  { %v235_v38 = vsel %vm170_vm0, %v221_v36, 0.0 }
 0x170   :  { %233 = vadd.xlane.f32.xlu2 %v232_v37  ;;  %236 = vadd.xlane.f32.xlu0 %v235_v38 }
 0x1c3   :  { %v240_v40 = vpop.xlane.xlu2 %239 }
 0x1c4   :  { %v254_v41 = vmul.f32 %v240_v40, %v3847_v62 }
 0x1c6   :  { %v262_v42 = vadd.f32 1e-12, %v254_v41 }
 0x1c8   :  { %3323 = vrsqrt.f32 %v262_v42  ;;  %vm312_vm3 = vweird.f32 %v262_v42 }
 0x1cb   :  { %v243_v44 = vpop.xlane.xlu0 %242 }
 0x1cc   :  { %v255_v45 = vmul.f32 %v243_v44, %v3847_v62 }
 0x1ce   :  { %v3324_v46 = vpop.eup %3323  ;;  %v263_v47 = vadd.f32 1e-12, %v255_v45 }
 0x1cf   :  { %v307_v48 = vmul.f32 %v3324_v46, %v262_v42  ;;  %vm313_vm2 = vweird.f32 %v3324_v46 }
 0x1d0   :  { %3325 = vrsqrt.f32 %v263_v47  ;;  %vm3911_vm4 = vmor %vm312_vm3, %vm313_vm2  ;;  %vm322_vm6 = vweird.f32 %v263_v47 }
 0x1d1   :  { %v308_v49 = vmul.f32 %v3324_v46, %v307_v48 }
 0x1d3   :  { %v309_v50 = vmul.f32 0.5, %v308_v49  ;;  %v246_v51 = vpop.xlane.xlu1 %245  ;;  %v228_v52 = vpop.xlane.xlu0 %227 }
 0x1d4   :  { %v256_v53 = vmul.f32 %v246_v51, %v3847_v62  ;;  %v250_v54 = vmul.f32 %v228_v52, %v3847_v62 }
 0x1d5   :  { %v310_v55 = vsub.f32 1.5, %v309_v50 }
 0x1d6   :  { %v3326_v56 = vpop.eup %3325  ;;  %v3908_v57 = vadd.f32 1e-12, %v256_v53  ;;  %v258_v58 = vadd.f32 1e-12, %v250_v54 }
 0x1d7   :  { %v317_v59 = vmul.f32 %v3326_v56, %v263_v47  ;;  %v311_v60 = vmul.f32 %v3324_v46, %v310_v55  ;;  %vm323_vm5 = vweird.f32 %v3326_v56 }
 0x1d8   :  { %3327 = vrsqrt.f32 %v3908_v57  ;;  %vm324_vm7 = vmor %vm322_vm6, %vm323_vm5  ;;  %vm272_vm10 = vweird.f32 %v258_v58  ;;  %vm332_vm11 = vweird.f32 %v3908_v57 }
 0x1d9   :  { %v318_v61 = vmul.f32 %v3326_v56, %v317_v59  ;;  %3329 = vrsqrt.f32 %v258_v58  ;;  %v315_v4 = vsel %vm3911_vm4, %v3324_v46, %v311_v60 }
 0x1da   :  { %v350_v17 = vmul.f32 %v315_v4, %v3850_v1 }
 0x1db   :  { %v319_v0 = vmul.f32 0.5, %v318_v61  ;;  %v231_v2 = vpop.xlane.xlu1 %230  ;;  %v249_v3 = vpop.xlane.xlu2 %248 }
 0x1dc   :  { %v251_v5 = vmul.f32 %v231_v2, %v3847_v62  ;;  %v257_v6 = vmul.f32 %v249_v3, %v3847_v62  ;;  %v361_v28 = vmul.f32 %v3931_v18, %v350_v17 }
 0x1dd   :  { %v320_v7 = vsub.f32 1.5, %v319_v0 }
 0x1de   :  { %v3919_v9 = vpop.eup %3327  ;;  %v3921_v11 = vadd.f32 1e-12, %v251_v5  ;;  %v3923_v12 = vadd.f32 1e-12, %v257_v6  ;;  %v3956_v43 = vadd.f32 %v3941_v30, %v361_v28 }
 0x1df   :  { %v3330_v13 = vpop.eup %3329  ;;  %v321_v14 = vmul.f32 %v3326_v56, %v320_v7  ;;  %v327_v15 = vmul.f32 %v3919_v9, %v3908_v57  ;;  %vm333_vm8 = vweird.f32 %v3919_v9 }
 0x1e0   :  { %v267_v20 = vmul.f32 %v3330_v13, %v258_v58  ;;  %3331 = vrsqrt.f32 %v3921_v11  ;;  %vm273_vm9 = vweird.f32 %v3330_v13  ;;  %vm3967_vm13 = vmor %vm332_vm11, %vm333_vm8  ;;  %vm282_vm1 = vweird.f32 %v3921_v11 }
 0x1e1   :  { %v325_v21 = vsel %vm324_vm7, %v3326_v56, %v321_v14  ;;  %v328_v22 = vmul.f32 %v3919_v9, %v327_v15  ;;  %3333 = vrsqrt.f32 %v3923_v12  ;;  %vm274_vm12 = vmor %vm272_vm10, %vm273_vm9  ;;  %vm342_vm3 = vweird.f32 %v3923_v12 }
 0x1e2   :  { %v268_v23 = vmul.f32 %v3330_v13, %v267_v20  ;;  %v351_v24 = vmul.f32 %v325_v21, %v3857_v8  ;;  %vm457_vm11 = vcmask 130048  }
 0x1e3   :  { %v329_v25 = vmul.f32 0.5, %v328_v22  ;;  %v237_v27 = vpop.xlane.xlu0 %236  ;;  %v234_v1 = vpop.xlane.xlu2 %233 }
 0x1e4   :  { %v269_v31 = vmul.f32 0.5, %v268_v23  ;;  %v253_v32 = vmul.f32 %v237_v27, %v3847_v62  ;;  %v252_v33 = vmul.f32 %v234_v1, %v3847_v62  ;;  %v362_v35 = vmul.f32 %v3931_v18, %v351_v24 }
 0x1e5   :  { %v330_v36 = vsub.f32 1.5, %v329_v25 }
 0x1e6   :  { %v3332_v37 = vpop.eup %3331  ;;  %v270_v8 = vsub.f32 1.5, %v269_v31  ;;  %v3946_v38 = vadd.f32 1e-12, %v253_v32  ;;  %v3948_v39 = vadd.f32 1e-12, %v252_v33  ;;  %v3951_v40 = vadd.f32 %v3941_v30, %v362_v35 }
 0x1e7   :  { %v3334_v41 = vpop.eup %3333  ;;  %v277_v42 = vmul.f32 %v3332_v37, %v3921_v11  ;;  %v331_v44 = vmul.f32 %v3919_v9, %v330_v36  ;;  %vm283_vm14 = vweird.f32 %v3332_v37 }
 0x1e8   :  { %v271_v45 = vmul.f32 %v3330_v13, %v270_v8  ;;  %v337_v46 = vmul.f32 %v3334_v41, %v3923_v12  ;;  %3335 = vrsqrt.f32 %v3946_v38  ;;  %v378_v49 = vpack.c.bf16 %v3951_v40, %v3956_v43  ;;  %vm284_vm2 = vmor %vm282_vm1, %vm283_vm14 }
 0x1e9   :  { %v278_v47 = vmul.f32 %v3332_v37, %v277_v42  ;;  %3337 = vrsqrt.f32 %v3948_v39  ;;  %v335_v53 = vsel %vm3967_vm13, %v3919_v9, %v331_v44  ;;  %vm343_vm15 = vweird.f32 %v3334_v41 }
 0x1ea   :  { %v338_v48 = vmul.f32 %v3334_v41, %v337_v46  ;;  %v275_v51 = vsel %vm274_vm12, %v3330_v13, %v271_v45  ;;  %3094 = vmatmul.msk.bf16.vlgmr.msra.gmra.mxu2 %vm170_vm0, %v378_v49  ;;  %v352_v63 = vmul.f32 %v335_v53, %v3866_v16  ;;  %vm344_vm4 = vmor %vm342_vm3, %vm343_vm15  ;;  %vm302_vm7 = vweird.f32 %v3946_v38 }
 0x1eb   :  { %v279_v52 = vmul.f32 0.5, %v278_v47  ;;  %v346_v58 = vmul.f32 %v275_v51, %v3861_v10  ;;  %vm292_vm9 = vweird.f32 %v3948_v39  ;;  %vm527_vm12 = vcmask 523264  }
 0x1ec   :  { %v339_v54 = vmul.f32 0.5, %v338_v48  ;;  %v363_v16 = vmul.f32 %v3931_v18, %v352_v63  ;;  %vm943_vm13 = vcmask 261248  }
 0x1ed   :  { %v280_v55 = vsub.f32 1.5, %v279_v52  ;;  %v357_v7 = vmul.f32 %v3931_v18, %v346_v58 }
 0x1ee   :  { %v3336_v56 = vpop.eup %3335  ;;  %v340_v57 = vsub.f32 1.5, %v339_v54 }
 0x1ef   :  { %v3338_v59 = vpop.eup %3337  ;;  %v281_v60 = vmul.f32 %v3332_v37, %v280_v55  ;;  %v297_v61 = vmul.f32 %v3336_v56, %v3946_v38  ;;  %vm303_vm5 = vweird.f32 %v3336_v56  ;;  %v3988_v20 = vadd.f32 %v3941_v30, %v357_v7 }
 0x1f0   :  { %v341_v0 = vmul.f32 %v3334_v41, %v340_v57  ;;  %v287_v2 = vmul.f32 %v3338_v59, %v3948_v39  ;;  %vm293_vm6 = vweird.f32 %v3338_v59  ;;  %vm304_vm8 = vmor %vm302_vm7, %vm303_vm5 }
 0x1f1   :  { %v285_v3 = vsel %vm284_vm2, %v3332_v37, %v281_v60  ;;  %v298_v4 = vmul.f32 %v3336_v56, %v297_v61  ;;  %vm294_vm10 = vmor %vm292_vm9, %vm293_vm6 }
 0x1f2   :  { %v345_v5 = vsel %vm344_vm4, %v3334_v41, %v341_v0  ;;  %v288_v6 = vmul.f32 %v3338_v59, %v287_v2  ;;  %v347_v10 = vmul.f32 %v285_v3, %v3873_v19 }
 0x1f3   :  { %v299_v9 = vmul.f32 0.5, %v298_v4  ;;  %v353_v11 = vmul.f32 %v345_v5, %v3879_v26  ;;  %v3995_v26 = vadd.f32 %v3941_v30, %v363_v16 }
 0x1f4   :  { %v289_v13 = vmul.f32 0.5, %v288_v6  ;;  %v358_v14 = vmul.f32 %v3931_v18, %v347_v10 }
 0x1f5   :  { %v300_v12 = vsub.f32 1.5, %v299_v9  ;;  %v364_v15 = vmul.f32 %v3931_v18, %v353_v11 }
 0x1f6   :  { %v290_v17 = vsub.f32 1.5, %v289_v13  ;;  %v3991_v19 = vadd.f32 %v3941_v30, %v358_v14 }
 0x1f7   :  { %v301_v21 = vmul.f32 %v3336_v56, %v300_v12  ;;  %v3998_v22 = vadd.f32 %v3941_v30, %v364_v15 }
 0x1f8   :  { %v291_v23 = vmul.f32 %v3338_v59, %v290_v17  ;;  %v376_v24 = vpack.c.bf16 %v3991_v19, %v3988_v20  ;;  %v87_v17 = vld [vmem:[%s5349_s24] sm:$0xff] }
 0x1f9   :  { %v305_v25 = vsel %vm304_vm8, %v3336_v56, %v301_v21  ;;  %v379_v27 = vpack.c.bf16 %v3998_v22, %v3995_v26 }
 0x1fa   :  { %v295_v1 = vsel %vm294_vm10, %v3338_v59, %v291_v23  ;;  %3092 = vmatmul.msk.bf16.vlgmr.msra.gmra.mxu1 %vm170_vm0, %v376_v24  ;;  %v349_v31 = vmul.f32 %v305_v25, %v3890_v34 }
 0x1fb   :  { %3095 = vmatmul.msk.bf16.gmra.mxu2 %vm170_vm0, %v379_v27  ;;  %v348_v28 = vmul.f32 %v295_v1, %v3885_v29  ;;  %v3305_v29 = vld [vmem:[%s5311_s7] ss:$0 sm:$0xff] }
 0x1fc   :  { %v360_v33 = vmul.f32 %v3931_v18, %v349_v31 }
 0x1fd   :  { %v359_v32 = vmul.f32 %v3931_v18, %v348_v28 }
 0x1fe   :  { %v4015_v36 = vadd.f32 %v3941_v30, %v360_v33 }
 0x1ff   :  { %v4012_v35 = vadd.f32 %v3941_v30, %v359_v32  ;;  %v88_v32 = vld [vmem:[%s5349_s24 + $0x8] sm:$0xff] }
 0x201   :  { %v377_v37 = vpack.c.bf16 %v4015_v36, %v4012_v35 }
 0x20a   :  { %3093 = vmatmul.msk.bf16.gmra.mxu1 %vm170_vm0, %v377_v37 }
 0x26d   :  { %v431_v8 = vpop.f32.mrf.mxu2 }
 0x26e   :  { %v432_v39 = vadd.f32 %v3305_v29, %v431_v8 }
 0x275   :  { %v433_v34 = vpop.f32.mrf.mxu2 }
 0x276   :  { %v434_v18 = vadd.f32 %v3305_v29, %v433_v34 }
 0x277   :  { %v421_v38 = vpop.f32.mrf.mxu1 }
 0x278   :  { %v4023_v41 = vpack.c.bf16 %v434_v18, %v432_v39  ;;  %v422_v44 = vadd.f32 %v3305_v29, %v421_v38  ;;  %v89_v38 = vld [vmem:[%s5349_s24 + $0x10] sm:$0xff] }
 0x27a   :  { %453 = vrot.lane.b32.xlu2 %v4023_v41, %s3613_s0 }
 0x27e   :  { %v436_v30 = vpop.f32.mrf.mxu2 }
 0x27f   :  { %v423_v42 = vpop.f32.mrf.mxu1  ;;  %v437_v49 = vadd.f32 %v3305_v29, %v436_v30 }
 0x280   :  { %v424_v45 = vadd.f32 %v3305_v29, %v423_v42 }
 0x282   :  { %v4027_v46 = vpack.c.bf16 %v424_v45, %v422_v44 }
 0x284   :  { %449 = vrot.lane.b32.xlu2 %v4027_v46, %s3613_s0 }
 0x286   :  { %v438_v47 = vpop.f32.mrf.mxu2 }
 0x287   :  { %v426_v48 = vpop.f32.mrf.mxu1  ;;  %v439_v50 = vadd.f32 %v3305_v29, %v438_v47 }
 0x288   :  { %v427_v53 = vadd.f32 %v3305_v29, %v426_v48  ;;  %v90_v48 = vld [vmem:[%s5349_s24 + $0x18] sm:$0xff] }
 0x289   :  { %v4031_v51 = vpack.c.bf16 %v439_v50, %v437_v49 }
 0x28b   :  { %455 = vrot.lane.b32.xlu1 %v4031_v51, %s3613_s0 }
 0x28f   :  { %v428_v52 = vpop.f32.mrf.mxu1 }
 0x290   :  { %v429_v54 = vadd.f32 %v3305_v29, %v428_v52 }
 0x292   :  { %v4035_v55 = vpack.c.bf16 %v429_v54, %v427_v53 }
 0x293   :  { %695 = vrot.lane.b32.xlu1 %v4031_v51, %s3614_s1 }
 0x294   :  { %691 = vrot.lane.b32.xlu2 %v4035_v55, %s3614_s1  ;;  %451 = vrot.lane.b32.xlu0 %v4035_v55, %s3613_s0 }
 0x29b   :  { %689 = vrot.lane.b32.xlu1 %v4027_v46, %s3614_s1 }
 0x29c   :  { %683 = vrot.lane.b32.xlu2 %v4035_v55, %s3615_s5  ;;  %693 = vrot.lane.b32.xlu0 %v4023_v41, %s3614_s1 }
 0x2a3   :  { %685 = vrot.lane.b32.xlu1 %v4023_v41, %s3615_s5 }
 0x2a4   :  { %681 = vrot.lane.b32.xlu0 %v4027_v46, %s3615_s5 }
 0x2ac   :  { %687 = vrot.lane.b32.xlu0 %v4031_v51, %s3615_s5 }
 0x2b4   :  { %626 = vrot.lane.b32.xlu0 %v4031_v51, %s3616_s6 }
 0x2bc   :  { %620 = vrot.lane.b32.xlu0 %v4027_v46, %s3616_s6 }
 0x2d4   :  { %v454_v58 = vpop.permute.xlu2 %453 }
 0x2d5   :  { %v477_v63 = vsel %vm457_vm11, %v454_v58, 0 }
 0x2de   :  { %v450_v0 = vpop.permute.xlu2 %449 }
 0x2df   :  { %v471_v10 = vsel %vm457_vm11, %v450_v0, 0 }
 0x2ee   :  { %v692_v5 = vpop.permute.xlu2 %691 }
 0x2ef   :  { %v713_v7 = vsel %vm457_vm11, %v692_v5, 0 }
 0x2f6   :  { %v684_v14 = vpop.permute.xlu2 %683 }
 0x2fd   :  { %v456_v56 = vpop.permute.xlu1 %455 }
 0x2fe   :  { %v480_v57 = vsel %vm457_vm11, %v456_v56, 0  ;;  %v91_v56 = vld [vmem:[%s5349_s24 + $0x20] sm:$0xff] }
 0x2ff   :  { %486 = vmatpush.bf16.xpose.msrb.mxu2 %v480_v57 }
 0x305   :  { %v696_v59 = vpop.permute.xlu1 %695 }
 0x306   :  { %v719_v60 = vsel %vm457_vm11, %v696_v59, 0  ;;  %v452_v61 = vpop.permute.xlu0 %451 }
 0x307   :  { %725 = vmatpush.bf16.xpose.msrb.mxu1 %v719_v60  ;;  %487 = vmatpush.bf16.xpose.msrb.mxu2 %v477_v63  ;;  %v474_v3 = vsel %vm457_vm11, %v452_v61, 0  ;;  %v92_v61 = vld [vmem:[%s5349_s24 + $0x28] sm:$0xff] }
 0x30d   :  { %v690_v9 = vpop.permute.xlu1 %689 }
 0x30e   :  { %v694_v2 = vpop.permute.xlu0 %693  ;;  %v710_v16 = vsel %vm457_vm11, %v690_v9, 0 }
 0x30f   :  { %488 = vmatpush.bf16.xpose.msrb.mxu2 %v474_v3  ;;  %v716_v4 = vsel %vm457_vm11, %v694_v2, 0 }
 0x310   :  { %726 = vmatpush.bf16.xpose.msrb.mxu1 %v716_v4 }
 0x315   :  { %v686_v12 = vpop.permute.xlu1 %685 }
 0x316   :  { %v682_v6 = vpop.permute.xlu0 %681 }
 0x317   :  { %489 = vmatpush.bf16.xpose.msrb.mxu2 %v471_v10 }
 0x318   :  { %727 = vmatpush.bf16.xpose.msrb.mxu1 %v713_v7 }
 0x31e   :  { %3096 = vmatmul.msk.bf16.vlgmr.msrb.gmra.mxu2 %vm457_vm11, %v4027_v46  ;;  %v688_v11 = vpop.permute.xlu0 %687 }
 0x320   :  { %728 = vmatpush.bf16.xpose.msrb.mxu1 %v710_v16 }
 0x326   :  { %v627_v13 = vpop.permute.xlu0 %626 }
 0x327   :  { %648 = vmatpush.bf16.msra.mxu3 %v627_v13  ;;  %3104 = vmatmul.msk.bf16.vlgmr.msrb.gmra.mxu1 %vm457_vm11, %v682_v6 }
 0x32e   :  { %3097 = vmatmul.msk.bf16.gmra.mxu2 %vm457_vm11, %v4035_v55 }
 0x337   :  { %3105 = vmatmul.msk.bf16.gmra.mxu1 %vm457_vm11, %v684_v14 }
 0x33e   :  { %3098 = vmatmul.msk.bf16.gmra.mxu2 %vm457_vm11, %v4023_v41 }
 0x347   :  { %3106 = vmatmul.msk.bf16.gmra.mxu1 %vm457_vm11, %v686_v12 }
 0x34e   :  { %3099 = vmatmul.msk.bf16.gmra.mxu2 %vm457_vm11, %v4031_v51 }
 0x357   :  { %3107 = vmatmul.msk.bf16.gmra.mxu1 %vm457_vm11, %v688_v11 }
 0x3a1   :  { %v491_v15 = vpop.f32.mrf.mxu2 }
 0x3a2   :  { %v511_v21 = vmul.f32 0.25, %v491_v15 }
 0x3a4   :  { %v730_v23 = vpop.f32.mrf.mxu1  ;;  %v4082_v24 = vadd.f32 %v511_v21, %v87_v17 }
 0x3a5   :  { %v750_v25 = vmul.f32 0.25, %v730_v23 }
 0x3a6   :  { %v528_v27 = vsel %vm527_vm12, %v4082_v24, -inf }
 0x3a7   :  { %529 = vmax.xlane.f32.xlu2 %v528_v27  ;;  %v4086_v1 = vadd.f32 %v750_v25, %v87_v17  ;;  %v93_v25 = vld [vmem:[%s5349_s24 + $0x30] sm:$0xff] }
 0x3a9   :  { %v493_v28 = vpop.f32.mrf.mxu2  ;;  %v766_v31 = vsel %vm527_vm12, %v4086_v1, -inf }
 0x3aa   :  { %v512_v33 = vmul.f32 0.25, %v493_v28  ;;  %767 = vmax.xlane.f32.xlu0 %v766_v31 }
 0x3ac   :  { %v732_v37 = vpop.f32.mrf.mxu1  ;;  %v4093_v8 = vadd.f32 %v512_v33, %v88_v32 }
 0x3ad   :  { %v751_v4 = vmul.f32 0.25, %v732_v37 }
 0x3ae   :  { %v531_v29 = vsel %vm527_vm12, %v4093_v8, -inf }
 0x3af   :  { %532 = vmax.xlane.f32.xlu1 %v531_v29  ;;  %v4135_v10 = vadd.f32 %v751_v4, %v88_v32 }
 0x3b1   :  { %v496_v34 = vpop.f32.mrf.mxu2  ;;  %v769_v16 = vsel %vm527_vm12, %v4135_v10, -inf }
 0x3b2   :  { %v513_v39 = vmul.f32 0.25, %v496_v34 }
 0x3b4   :  { %v735_v18 = vpop.f32.mrf.mxu1  ;;  %v4100_v30 = vadd.f32 %v513_v39, %v89_v38 }
 0x3b5   :  { %v752_v11 = vmul.f32 0.25, %v735_v18 }
 0x3b6   :  { %v534_v42 = vsel %vm527_vm12, %v4100_v30, -inf }
 0x3b7   :  { %535 = vmax.xlane.f32.xlu0 %v534_v42  ;;  %v4143_v14 = vadd.f32 %v752_v11, %v89_v38  ;;  %v94_v38 = vld [vmem:[%s5349_s24 + $0x38] sm:$0xff]  ;;  %v621_v42 = vpop.permute.xlu0 %620 }
 0x3b9   :  { %v498_v44 = vpop.f32.mrf.mxu2  ;;  %v772_v23 = vsel %vm527_vm12, %v4143_v14, -inf }
 0x3ba   :  { %v514_v2 = vmul.f32 0.25, %v498_v44 }
 0x3bc   :  { %v737_v45 = vpop.f32.mrf.mxu1  ;;  %v4129_v3 = vadd.f32 %v514_v2, %v90_v48 }
 0x3bd   :  { %v753_v47 = vmul.f32 0.25, %v737_v45 }
 0x3be   :  { %v537_v5 = vsel %vm527_vm12, %v4129_v3, -inf }
 0x3bf   :  { %624 = vrot.lane.b32.xlu2 %v4023_v41, %s3616_s6  ;;  %v4109_v49 = vadd.f32 %v753_v47, %v90_v48 }
 0x3c1   :  { %v501_v50 = vpop.f32.mrf.mxu2  ;;  %v775_v52 = vsel %vm527_vm12, %v4109_v49, -inf }
 0x3c2   :  { %776 = vmax.xlane.f32.xlu0 %v775_v52  ;;  %v515_v6 = vmul.f32 0.25, %v501_v50 }
 0x3c4   :  { %v740_v53 = vpop.f32.mrf.mxu1  ;;  %v4137_v9 = vadd.f32 %v515_v6, %v91_v56 }
 0x3c5   :  { %v754_v54 = vmul.f32 0.25, %v740_v53 }
 0x3c7   :  { %v4116_v57 = vadd.f32 %v754_v54, %v91_v56 }
 0x3c8   :  { %622 = vrot.lane.b32.xlu1 %v4035_v55, %s3616_s6 }
 0x3c9   :  { %v503_v58 = vpop.f32.mrf.mxu2  ;;  %v778_v59 = vsel %vm527_vm12, %v4116_v57, -inf }
 0x3ca   :  { %v516_v60 = vmul.f32 0.25, %v503_v58  ;;  %779 = vmax.xlane.f32.xlu0 %v778_v59 }
 0x3cc   :  { %v4125_v63 = vadd.f32 %v516_v60, %v92_v61  ;;  %v742_v7 = vpop.f32.mrf.mxu1 }
 0x3cd   :  { %v755_v13 = vmul.f32 0.25, %v742_v7 }
 0x3ce   :  { %v543_v0 = vsel %vm527_vm12, %v4125_v63, -inf }
 0x3cf   :  { %v4145_v15 = vadd.f32 %v755_v13, %v92_v61 }
 0x3d1   :  { %v506_v12 = vpop.f32.mrf.mxu2  ;;  %v781_v28 = vsel %vm527_vm12, %v4145_v15, -inf }
 0x3d2   :  { %544 = vmax.xlane.f32.xlu0 %v543_v0  ;;  %v517_v21 = vmul.f32 0.25, %v506_v12 }
 0x3d4   :  { %v745_v17 = vpop.f32.mrf.mxu1  ;;  %v4154_v31 = vadd.f32 %v517_v21, %v93_v25 }
 0x3d5   :  { %v756_v27 = vmul.f32 0.25, %v745_v17 }
 0x3d6   :  { %v546_v37 = vsel %vm527_vm12, %v4154_v31, -inf }
 0x3d7   :  { %v4156_v32 = vadd.f32 %v756_v27, %v93_v25 }
 0x3d9   :  { %v508_v33 = vpop.f32.mrf.mxu2  ;;  %v784_v34 = vsel %vm527_vm12, %v4156_v32, -inf }
 0x3da   :  { %v518_v29 = vmul.f32 0.25, %v508_v33 }
 0x3dc   :  { %v4165_v39 = vadd.f32 %v518_v29, %v94_v38  ;;  %v747_v56 = vpop.f32.mrf.mxu1 }
 0x3dd   :  { %v757_v61 = vmul.f32 0.25, %v747_v56 }
 0x3de   :  { %v549_v18 = vsel %vm527_vm12, %v4165_v39, -inf }
 0x3df   :  { %v4180_v4 = vadd.f32 %v757_v61, %v94_v38 }
 0x3e1   :  { %v787_v7 = vsel %vm527_vm12, %v4180_v4, -inf }
 0x3e6   :  { %864 = vrot.lane.b32.xlu0 %v4031_v51, %s3617_s2  ;;  %v540_v51 = vsel %vm527_vm12, %v4137_v9, -inf }
 0x3e8   :  { %538 = vmax.xlane.f32.xlu2 %v537_v5 }
 0x3f0   :  { %770 = vmax.xlane.f32.xlu2 %v769_v16 }
 0x3f2   :  { %541 = vmax.xlane.f32.xlu1 %v540_v51 }
 0x3f8   :  { %773 = vmax.xlane.f32.xlu2 %v772_v23 }
 0x3fa   :  { %782 = vmax.xlane.f32.xlu1 %v781_v28 }
 0x400   :  { %547 = vmax.xlane.f32.xlu2 %v546_v37 }
 0x402   :  { %785 = vmax.xlane.f32.xlu1 %v784_v34 }
 0x40a   :  { %550 = vmax.xlane.f32.xlu1 %v549_v18 }
 0x41a   :  { %v530_v44 = vpop.xlane.xlu2 %529 }
 0x41b   :  { %v552_v45 = vsub.f32 %v4082_v24, %v530_v44 }
 0x41d   :  { %v560_v47 = vmul.f32 1.442695, %v552_v45  ;;  %v768_v48 = vpop.xlane.xlu0 %767 }
 0x41e   :  { %v790_v50 = vsub.f32 %v4086_v1, %v768_v48 }
 0x41f   :  { %3339 = vpow2.f32 %v560_v47 }
 0x420   :  { %v798_v52 = vmul.f32 1.442695, %v790_v50 }
 0x422   :  { %3341 = vpow2.f32 %v798_v52  ;;  %v533_v53 = vpop.xlane.xlu1 %532  ;;  %v625_v54 = vpop.permute.xlu2 %624 }
 0x423   :  { %v553_v58 = vsub.f32 %v4093_v8, %v533_v53  ;;  %649 = vmatpush.bf16.msra.mxu3 %v625_v54 }
 0x425   :  { %v4172_v59 = vpop.eup %3339  ;;  %v562_v60 = vmul.f32 1.442695, %v553_v58 }
 0x426   :  { %v576_v24 = vsel %vm527_vm12, %v4172_v59, 0.0 }
 0x427   :  { %577 = vadd.xlane.f32.xlu2 %v576_v24  ;;  %3343 = vpow2.f32 %v562_v60 }
 0x428   :  { %v4176_v0 = vpop.eup %3341 }
 0x429   :  { %v814_v1 = vsel %vm527_vm12, %v4176_v0, 0.0 }
 0x42a   :  { %v536_v2 = vpop.xlane.xlu0 %535  ;;  %815 = vadd.xlane.f32.xlu1 %v814_v1 }
 0x42b   :  { %v554_v8 = vsub.f32 %v4100_v30, %v536_v2 }
 0x42d   :  { %v564_v5 = vmul.f32 1.442695, %v554_v8  ;;  %v4183_v6 = vpop.eup %3343 }
 0x42e   :  { %v579_v11 = vsel %vm527_vm12, %v4183_v6, 0.0 }
 0x42f   :  { %788 = vmax.xlane.f32.xlu2 %v787_v7  ;;  %3345 = vpow2.f32 %v564_v5 }
 0x432   :  { %580 = vadd.xlane.f32.xlu1 %v579_v11 }
 0x435   :  { %v4189_v16 = vpop.eup %3345  ;;  %v777_v30 = vpop.xlane.xlu0 %776 }
 0x436   :  { %v582_v13 = vsel %vm527_vm12, %v4189_v16, 0.0  ;;  %v793_v7 = vsub.f32 %v4109_v49, %v777_v30 }
 0x43a   :  { %v623_v51 = vpop.permute.xlu1 %622  ;;  %583 = vadd.xlane.f32.xlu1 %v582_v13  ;;  %v804_v13 = vmul.f32 1.442695, %v793_v7 }
 0x43b   :  { %650 = vmatpush.bf16.msra.mxu3 %v623_v51 }
 0x43d   :  { %v4193_v12 = vpop.xlane.xlu0 %779 }
 0x43f   :  { %651 = vmatpush.bf16.msra.mxu3 %v621_v42 }
 0x445   :  { %v545_v17 = vpop.xlane.xlu0 %544 }
 0x446   :  { %v557_v34 = vsub.f32 %v4125_v63, %v545_v17 }
 0x458   :  { %v865_v21 = vpop.permute.xlu0 %864 }
 0x459   :  { %886 = vmatpush.bf16.msrb.mxu3 %v865_v21 }
 0x45b   :  { %v539_v23 = vpop.xlane.xlu2 %538 }
 0x45c   :  { %v555_v25 = vsub.f32 %v4129_v3, %v539_v23  ;;  %v570_v3 = vmul.f32 1.442695, %v557_v34  ;;  %v794_v23 = vsub.f32 %v4116_v57, %v4193_v12 }
 0x45e   :  { %v566_v27 = vmul.f32 1.442695, %v555_v25  ;;  %v806_v49 = vmul.f32 1.442695, %v794_v23 }
 0x460   :  { %3347 = vpow2.f32 %v566_v27 }
 0x463   :  { %v771_v28 = vpop.xlane.xlu2 %770 }
 0x464   :  { %v791_v33 = vsub.f32 %v4135_v10, %v771_v28 }
 0x465   :  { %v542_v37 = vpop.xlane.xlu1 %541 }
 0x466   :  { %v4197_v29 = vpop.eup %3347  ;;  %v800_v38 = vmul.f32 1.442695, %v791_v33  ;;  %v556_v18 = vsub.f32 %v4137_v9, %v542_v37 }
 0x467   :  { %v585_v42 = vsel %vm527_vm12, %v4197_v29, 0.0 }
 0x468   :  { %3349 = vpow2.f32 %v800_v38  ;;  %v568_v44 = vmul.f32 1.442695, %v556_v18  ;;  %586 = vadd.xlane.f32.xlu0 %v585_v42 }
 0x46a   :  { %3351 = vpow2.f32 %v568_v44 }
 0x46b   :  { %v774_v45 = vpop.xlane.xlu2 %773  ;;  %3353 = vpow2.f32 %v570_v3 }
 0x46d   :  { %v783_v47 = vpop.xlane.xlu1 %782 }
 0x46e   :  { %v4203_v48 = vpop.eup %3349  ;;  %v795_v28 = vsub.f32 %v4145_v15, %v783_v47 }
 0x46f   :  { %v817_v10 = vsel %vm527_vm12, %v4203_v48, 0.0 }
 0x470   :  { %v4207_v63 = vpop.eup %3351  ;;  %818 = vadd.xlane.f32.xlu2 %v817_v10  ;;  %v808_v37 = vmul.f32 1.442695, %v795_v28 }
 0x471   :  { %v588_v9 = vsel %vm527_vm12, %v4207_v63, 0.0  ;;  %v4211_v52 = vpop.eup %3353 }
 0x472   :  { %589 = vadd.xlane.f32.xlu1 %v588_v9  ;;  %v591_v58 = vsel %vm527_vm12, %v4211_v52, 0.0 }
 0x473   :  { %v548_v50 = vpop.xlane.xlu2 %547 }
 0x474   :  { %v558_v53 = vsub.f32 %v4154_v31, %v548_v50 }
 0x475   :  { %v786_v54 = vpop.xlane.xlu1 %785 }
 0x476   :  { %v572_v56 = vmul.f32 1.442695, %v558_v53  ;;  %v796_v17 = vsub.f32 %v4156_v32, %v786_v54  ;;  %v792_v32 = vsub.f32 %v4143_v14, %v774_v45 }
 0x478   :  { %3355 = vpow2.f32 %v572_v56  ;;  %592 = vadd.xlane.f32.xlu2 %v591_v58 }
 0x47d   :  { %v551_v60 = vpop.xlane.xlu1 %550 }
 0x47e   :  { %v4216_v61 = vpop.eup %3355  ;;  %v559_v24 = vsub.f32 %v4165_v39, %v551_v60 }
 0x47f   :  { %v594_v1 = vsel %vm527_vm12, %v4216_v61, 0.0 }
 0x480   :  { %v574_v2 = vmul.f32 1.442695, %v559_v24  ;;  %595 = vadd.xlane.f32.xlu2 %v594_v1 }
 0x482   :  { %3357 = vpow2.f32 %v574_v2 }
 0x488   :  { %v4221_v8 = vpop.eup %3357 }
 0x489   :  { %v597_v31 = vsel %vm527_vm12, %v4221_v8, 0.0 }
 0x48a   :  { %598 = vadd.xlane.f32.xlu0 %v597_v31 }
 0x48b   :  { %862 = vrot.lane.b32.xlu1 %v4023_v41, %s3617_s2 }
 0x498   :  { %860 = vrot.lane.b32.xlu2 %v4035_v55, %s3617_s2 }
 0x49a   :  { %v578_v39 = vpop.xlane.xlu2 %577 }
 0x49b   :  { %3359 = vrcp.f32 %v578_v39 }
 0x49d   :  { %v4229_v5 = vpop.xlane.xlu1 %815 }
 0x49e   :  { %858 = vrot.lane.b32.xlu0 %v4027_v46, %s3617_s2  ;;  %v810_v46 = vmul.f32 1.442695, %v796_v17 }
 0x4a1   :  { %v3360_v51 = vpop.eup %3359 }
 0x4a2   :  { %v608_v21 = vmul.f32 %v3360_v51, %v4172_v59  ;;  %v789_v34 = vpop.xlane.xlu2 %788 }
 0x4a3   :  { %v797_v38 = vsub.f32 %v4180_v4, %v789_v34 }
 0x4a5   :  { %v581_v11 = vpop.xlane.xlu1 %580  ;;  %v812_v42 = vmul.f32 1.442695, %v797_v38 }
 0x4a6   :  { %3361 = vrcp.f32 %v581_v11 }
 0x4a7   :  { %3363 = vpow2.f32 %v804_v13 }
 0x4a8   :  { %3365 = vpow2.f32 %v810_v46 }
 0x4a9   :  { %3367 = vpow2.f32 %v806_v49 }
 0x4ac   :  { %v3362_v41 = vpop.eup %3361 }
 0x4ad   :  { %v609_v55 = vmul.f32 %v3362_v41, %v4183_v6  ;;  %v4239_v27 = vpop.eup %3363  ;;  %v802_v6 = vmul.f32 1.442695, %v792_v32  ;;  %v584_v45 = vpop.xlane.xlu1 %583 }
 0x4ae   :  { %v823_v30 = vsel %vm527_vm12, %v4239_v27, 0.0  ;;  %v4245_v59 = vpop.eup %3365 }
 0x4af   :  { %v616_v25 = vpack.c.bf16 %v609_v55, %v608_v21  ;;  %v832_v57 = vsel %vm527_vm12, %v4245_v59, 0.0  ;;  %v4249_v12 = vpop.eup %3367  ;;  %3369 = vpow2.f32 %v802_v6 }
 0x4b0   :  { %v826_v33 = vsel %vm527_vm12, %v4249_v12, 0.0  ;;  %3371 = vpow2.f32 %v808_v37 }
 0x4b1   :  { %3100 = vmatmul.msk.bf16.vlgmr.msra.gmra.mxu3 %vm527_vm12, %v616_v25  ;;  %3373 = vpow2.f32 %v812_v42 }
 0x4b2   :  { %3375 = vrcp.f32 %v584_v45 }
 0x4b5   :  { %824 = vadd.xlane.f32.xlu1 %v823_v30  ;;  %v4254_v14 = vpop.eup %3369 }
 0x4b6   :  { %v820_v18 = vsel %vm527_vm12, %v4254_v14, 0.0  ;;  %v4259_v44 = vpop.eup %3371 }
 0x4b7   :  { %v829_v15 = vsel %vm527_vm12, %v4259_v44, 0.0  ;;  %v4263_v3 = vpop.eup %3373 }
 0x4b8   :  { %v835_v47 = vsel %vm527_vm12, %v4263_v3, 0.0  ;;  %v3376_v10 = vpop.eup %3375 }
 0x4b9   :  { %v610_v53 = vmul.f32 %v3376_v10, %v4189_v16 }
 0x4bd   :  { %833 = vadd.xlane.f32.xlu1 %v832_v57 }
 0x4c1   :  { %827 = vadd.xlane.f32.xlu2 %v826_v33 }
 0x4c8   :  { %821 = vadd.xlane.f32.xlu0 %v820_v18 }
 0x4d0   :  { %830 = vadd.xlane.f32.xlu0 %v829_v15 }
 0x4d8   :  { %836 = vadd.xlane.f32.xlu0 %v835_v47 }
 0x4db   :  { %v587_v4 = vpop.xlane.xlu0 %586 }
 0x4dc   :  { %3377 = vrcp.f32 %v587_v4 }
 0x4e2   :  { %v3378_v9 = vpop.eup %3377 }
 0x4e3   :  { %v819_v50 = vpop.xlane.xlu2 %818  ;;  %v611_v54 = vmul.f32 %v3378_v9, %v4197_v29 }
 0x4e5   :  { %v617_v56 = vpack.c.bf16 %v611_v54, %v610_v53  ;;  %v590_v58 = vpop.xlane.xlu1 %589 }
 0x4e6   :  { %3379 = vrcp.f32 %v590_v58  ;;  %v3271_v58 = vld [vmem:[%s5312_s8 + $0x8] sm:$0xff] }
 0x4e7   :  { %3101 = vmatmul.msk.bf16.gmra.mxu3 %vm527_vm12, %v617_v56  ;;  %1002 = vmatpush.bf16.msrb.mxu0 %v3271_v58 }
 0x4eb   :  { %v593_v60 = vpop.xlane.xlu2 %592 }
 0x4ec   :  { %3381 = vrcp.f32 %v593_v60  ;;  %v3380_v24 = vpop.eup %3379 }
 0x4ed   :  { %v612_v2 = vmul.f32 %v3380_v24, %v4207_v63 }
 0x4f2   :  { %v3382_v1 = vpop.eup %3381 }
 0x4f3   :  { %v613_v31 = vmul.f32 %v3382_v1, %v4211_v52  ;;  %v596_v7 = vpop.xlane.xlu2 %595 }
 0x4f4   :  { %3383 = vrcp.f32 %v596_v7 }
 0x4f5   :  { %v618_v39 = vpack.c.bf16 %v613_v31, %v612_v2 }
 0x4f7   :  { %3102 = vmatmul.msk.bf16.gmra.mxu3 %vm527_vm12, %v618_v39  ;;  %v3270_v39 = vld [vmem:[%s5312_s8] sm:$0xff] }
 0x4f8   :  { %1003 = vmatpush.bf16.msrb.mxu0 %v3270_v39 }
 0x4fa   :  { %v3384_v13 = vpop.eup %3383 }
 0x4fb   :  { %v861_v11 = vpop.permute.xlu2 %860  ;;  %v614_v17 = vmul.f32 %v3384_v13, %v4216_v61 }
 0x4fd   :  { %v863_v16 = vpop.permute.xlu1 %862  ;;  %v599_v29 = vpop.xlane.xlu0 %598 }
 0x4fe   :  { %3385 = vrcp.f32 %v599_v29  ;;  %887 = vmatpush.bf16.msrb.mxu3 %v863_v16 }
 0x4ff   :  { %3387 = vrcp.f32 %v819_v50 }
 0x500   :  { %3389 = vrcp.f32 %v4229_v5 }
 0x502   :  { %888 = vmatpush.bf16.msrb.mxu3 %v861_v11 }
 0x504   :  { %v3386_v51 = vpop.eup %3385 }
 0x505   :  { %v615_v41 = vmul.f32 %v3386_v51, %v4221_v8  ;;  %v3388_v52 = vpop.eup %3387 }
 0x506   :  { %v3390_v55 = vpop.eup %3389  ;;  %v847_v23 = vmul.f32 %v3388_v52, %v4203_v48 }
 0x507   :  { %v619_v63 = vpack.c.bf16 %v615_v41, %v614_v17  ;;  %v846_v46 = vmul.f32 %v3390_v55, %v4176_v0 }
 0x509   :  { %3103 = vmatmul.msk.bf16.gmra.mxu3 %vm527_vm12, %v619_v63  ;;  %v854_v25 = vpack.c.bf16 %v847_v23, %v846_v46 }
 0x510   :  { %v859_v21 = vpop.permute.xlu0 %858 }
 0x511   :  { %889 = vmatpush.bf16.msrb.mxu3 %v859_v21 }
 0x519   :  { %3108 = vmatmul.msk.bf16.vlgmr.msrb.gmra.mxu3 %vm527_vm12, %v854_v25 }
 0x528   :  { %v825_v8 = vpop.xlane.xlu1 %824 }
 0x529   :  { %3391 = vrcp.f32 %v825_v8 }
 0x52f   :  { %v3392_v5 = vpop.eup %3391 }
 0x530   :  { %v849_v48 = vmul.f32 %v3392_v5, %v4239_v27  ;;  %v834_v15 = vpop.xlane.xlu1 %833  ;;  %v3306_v5 = vld [vmem:[%s5313_s9] ss:$0 sm:$0xff] }
 0x534   :  { %v653_v61 = vpop.f32.mrf.mxu3  ;;  %v828_v28 = vpop.xlane.xlu2 %827 }
 0x535   :  { %673 = vst.msk [vmem:[#allocation2] sm:$0xff] %vm457_vm11, %v653_v61 }
 0x53b   :  { %v822_v49 = vpop.xlane.xlu0 %821 }
 0x53c   :  { %3393 = vrcp.f32 %v822_v49  ;;  %v655_v30 = vpop.f32.mrf.mxu3 }
 0x53d   :  { %674 = vst.msk [vmem:[#allocation2 + $0x8] sm:$0xff] %vm457_vm11, %v655_v30 }
 0x542   :  { %v3394_v32 = vpop.eup %3393 }
 0x543   :  { %v848_v6 = vmul.f32 %v3394_v32, %v4254_v14  ;;  %v831_v0 = vpop.xlane.xlu0 %830 }
 0x544   :  { %3395 = vrcp.f32 %v831_v0 }
 0x545   :  { %v855_v57 = vpack.c.bf16 %v849_v48, %v848_v6  ;;  %3397 = vrcp.f32 %v828_v28 }
 0x547   :  { %3109 = vmatmul.msk.bf16.gmra.mxu3 %vm527_vm12, %v855_v57 }
 0x54a   :  { %v3396_v33 = vpop.eup %3395 }
 0x54b   :  { %v3398_v37 = vpop.eup %3397  ;;  %v851_v34 = vmul.f32 %v3396_v33, %v4259_v44  ;;  %v837_v18 = vpop.xlane.xlu0 %836 }
 0x54c   :  { %v850_v38 = vmul.f32 %v3398_v37, %v4249_v12  ;;  %3399 = vrcp.f32 %v837_v18 }
 0x54d   :  { %3401 = vrcp.f32 %v834_v15 }
 0x54e   :  { %v856_v42 = vpack.c.bf16 %v851_v34, %v850_v38 }
 0x552   :  { %v3400_v27 = vpop.eup %3399 }
 0x553   :  { %v3402_v14 = vpop.eup %3401  ;;  %v853_v45 = vmul.f32 %v3400_v27, %v4263_v3 }
 0x554   :  { %v852_v47 = vmul.f32 %v3402_v14, %v4245_v59 }
 0x556   :  { %v857_v4 = vpack.c.bf16 %v853_v45, %v852_v47 }
 0x557   :  { %3110 = vmatmul.msk.bf16.gmra.mxu3 %vm527_vm12, %v856_v42 }
 0x567   :  { %3111 = vmatmul.msk.bf16.gmra.mxu3 %vm527_vm12, %v857_v4 }
 0x56a   :  { %v658_v10 = vpop.f32.mrf.mxu3 }
 0x56b   :  { %675 = vst.msk [vmem:[#allocation2 + $0x10] sm:$0xff] %vm457_vm11, %v658_v10 }
 0x572   :  { %v660_v12 = vpop.f32.mrf.mxu3 }
 0x573   :  { %676 = vst.msk [vmem:[#allocation2 + $0x18] sm:$0xff] %vm457_vm11, %v660_v12 }
 0x57a   :  { %v663_v44 = vpop.f32.mrf.mxu3 }
 0x57b   :  { %677 = vst.msk [vmem:[#allocation2 + $0x20] sm:$0xff] %vm457_vm11, %v663_v44 }
 0x582   :  { %v665_v9 = vpop.f32.mrf.mxu3 }
 0x583   :  { %678 = vst.msk [vmem:[#allocation2 + $0x28] sm:$0xff] %vm457_vm11, %v665_v9 }
 0x58c   :  { %v668_v50 = vpop.f32.mrf.mxu3 }
 0x58d   :  { %679 = vst.msk [vmem:[#allocation2 + $0x30] sm:$0xff] %vm457_vm11, %v668_v50 }
 0x594   :  { %v670_v3 = vpop.f32.mrf.mxu3 }
 0x595   :  { %680 = vst.msk [vmem:[#allocation2 + $0x38] sm:$0xff] %vm457_vm11, %v670_v3 }
 0x59c   :  { %v891_v59 = vpop.f32.mrf.mxu3 }
 0x59d   :  { %919 = vrot.lane.b32.xlu2 %v891_v59, %s3618_s29 }
 0x5a4   :  { %v893_v53 = vpop.f32.mrf.mxu3 }
 0x5a5   :  { %921 = vrot.lane.b32.xlu1 %v893_v53, %s3618_s29 }
 0x5ca   :  { %v896_v54 = vpop.f32.mrf.mxu3 }
 0x5cb   :  { %923 = vrot.lane.b32.xlu0 %v896_v54, %s3618_s29 }
 0x5d2   :  { %v898_v56 = vpop.f32.mrf.mxu3 }
 0x5d3   :  { %925 = vrot.lane.b32.xlu2 %v898_v56, %s3618_s29 }
 0x5da   :  { %v901_v60 = vpop.f32.mrf.mxu3 }
 0x5db   :  { %927 = vrot.lane.b32.xlu0 %v901_v60, %s3618_s29 }
 0x5e2   :  { %v903_v24 = vpop.f32.mrf.mxu3 }
 0x5e3   :  { %929 = vrot.lane.b32.xlu1 %v903_v24, %s3618_s29 }
 0x5ea   :  { %v906_v1 = vpop.f32.mrf.mxu3 }
 0x5eb   :  { %931 = vrot.lane.b32.xlu2 %v906_v1, %s3618_s29 }
 0x5f2   :  { %v908_v2 = vpop.f32.mrf.mxu3 }
 0x5f3   :  { %933 = vrot.lane.b32.xlu0 %v908_v2, %s3618_s29 }
 0x5f7   :  { %v920_v31 = vpop.permute.xlu2 %919 }
 0x5f8   :  { %944 = vst.msk [vmem:[#allocation2] sm:$0xff] %vm943_vm13, %v920_v31 }
 0x5ff   :  { %v952_v16 = vld [vmem:[#allocation2] sm:$0xff] }
 0x617   :  { %v922_v7 = vpop.permute.xlu1 %921 }
 0x618   :  { %945 = vst.msk [vmem:[#allocation2 + $0x8] sm:$0xff] %vm943_vm13, %v922_v7 }
 0x61f   :  { %v953_v29 = vld [vmem:[#allocation2 + $0x8] sm:$0xff] }
 0x620   :  { %v960_v11 = vpack.c.bf16 %v953_v29, %v952_v16 }
 0x622   :  { %3120 = vmatmul.msk.bf16.vlgmr.msrb.gmra.mxu0 %vm170_vm0, %v960_v11 }
 0x62d   :  { %v926_v13 = vpop.permute.xlu2 %925 }
 0x62e   :  { %947 = vst.msk [vmem:[#allocation2 + $0x18] sm:$0xff] %vm943_vm13, %v926_v13 }
 0x635   :  { %v955_v63 = vld [vmem:[#allocation2 + $0x18] sm:$0xff] }
 0x63d   :  { %v924_v51 = vpop.permute.xlu0 %923 }
 0x63e   :  { %946 = vst.msk [vmem:[#allocation2 + $0x10] sm:$0xff] %vm943_vm13, %v924_v51 }
 0x645   :  { %v932_v17 = vpop.permute.xlu2 %931  ;;  %v954_v41 = vld [vmem:[#allocation2 + $0x10] sm:$0xff] }
 0x646   :  { %950 = vst.msk [vmem:[#allocation2 + $0x30] sm:$0xff] %vm943_vm13, %v932_v17  ;;  %v961_v52 = vpack.c.bf16 %v955_v63, %v954_v41 }
 0x648   :  { %3121 = vmatmul.msk.bf16.gmra.mxu0 %vm170_vm0, %v961_v52 }
 0x64d   :  { %v928_v21 = vpop.permute.xlu0 %927  ;;  %v958_v8 = vld [vmem:[#allocation2 + $0x30] sm:$0xff] }
 0x64e   :  { %948 = vst.msk [vmem:[#allocation2 + $0x20] sm:$0xff] %vm943_vm13, %v928_v21 }
 0x655   :  { %v930_v55 = vpop.permute.xlu1 %929  ;;  %v956_v23 = vld [vmem:[#allocation2 + $0x20] sm:$0xff] }
 0x656   :  { %949 = vst.msk [vmem:[#allocation2 + $0x28] sm:$0xff] %vm943_vm13, %v930_v55 }
 0x65d   :  { %v957_v46 = vld [vmem:[#allocation2 + $0x28] sm:$0xff] }
 0x65e   :  { %v962_v25 = vpack.c.bf16 %v957_v46, %v956_v23 }
 0x660   :  { %3122 = vmatmul.msk.bf16.gmra.mxu0 %vm170_vm0, %v962_v25 }
 0x665   :  { %v934_v61 = vpop.permute.xlu0 %933 }
 0x666   :  { %951 = vst.msk [vmem:[#allocation2 + $0x38] sm:$0xff] %vm943_vm13, %v934_v61 }
 0x66d   :  { %v959_v49 = vld [vmem:[#allocation2 + $0x38] sm:$0xff] }
 0x66e   :  { %v963_v30 = vpack.c.bf16 %v959_v49, %v958_v8 }
 0x670   :  { %3123 = vmatmul.msk.bf16.gmra.mxu0 %vm170_vm0, %v963_v30 }
 0x69f   :  { %v1005_v32 = vpop.f32.mrf.mxu0 }
 0x6a0   :  { %v1006_v6 = vadd.f32 %v3306_v5, %v1005_v32 }
 0x6a2   :  { %v1025_v48 = vadd.f32 %v1006_v6, %v3988_v20 }
 0x6a4   :  { %v1035_v0 = vsel %vm170_vm0, %v1025_v48, 0.0 }
 0x6a5   :  { %1036 = vadd.xlane.f32.xlu1 %v1035_v0 }
 0x6a7   :  { %v1007_v57 = vpop.f32.mrf.mxu0 }
 0x6a8   :  { %v1008_v28 = vadd.f32 %v3306_v5, %v1007_v57  ;;  %v3273_v57 = vld [vmem:[%s5316_s12 + $0x8] sm:$0xff] }
 0x6a9   :  { %1275 = vmatpush.bf16.msra.mxu2 %v3273_v57 }
 0x6aa   :  { %v1026_v33 = vadd.f32 %v1008_v28, %v3991_v19 }
 0x6ac   :  { %v1038_v37 = vsel %vm170_vm0, %v1026_v33, 0.0 }
 0x6ad   :  { %1039 = vadd.xlane.f32.xlu2 %v1038_v37  ;;  %v3272_v37 = vld [vmem:[%s5316_s12] sm:$0xff] }
 0x6ae   :  { %1276 = vmatpush.bf16.msra.mxu2 %v3272_v37 }
 0x6c5   :  { %v1010_v34 = vpop.f32.mrf.mxu0 }
 0x6c6   :  { %v1011_v38 = vadd.f32 %v3306_v5, %v1010_v34 }
 0x6c8   :  { %v1027_v18 = vadd.f32 %v1011_v38, %v4012_v35 }
 0x6ca   :  { %v1041_v42 = vsel %vm170_vm0, %v1027_v18, 0.0 }
 0x6cb   :  { %1042 = vadd.xlane.f32.xlu0 %v1041_v42 }
 0x6cd   :  { %v1012_v15 = vpop.f32.mrf.mxu0 }
 0x6ce   :  { %v1013_v27 = vadd.f32 %v3306_v5, %v1012_v15 }
 0x6d0   :  { %v1028_v20 = vadd.f32 %v1013_v27, %v4015_v36 }
 0x6d2   :  { %v1044_v14 = vsel %vm170_vm0, %v1028_v20, 0.0 }
 0x6d3   :  { %1045 = vadd.xlane.f32.xlu1 %v1044_v14 }
 0x6dd   :  { %v1015_v45 = vpop.f32.mrf.mxu0 }
 0x6de   :  { %v1016_v47 = vadd.f32 %v3306_v5, %v1015_v45 }
 0x6e0   :  { %v1029_v19 = vadd.f32 %v1016_v47, %v3956_v43 }
 0x6e2   :  { %v1047_v4 = vsel %vm170_vm0, %v1029_v19, 0.0 }
 0x6e3   :  { %1048 = vadd.xlane.f32.xlu2 %v1047_v4 }
 0x6e5   :  { %v1017_v10 = vpop.f32.mrf.mxu0 }
 0x6e6   :  { %v1018_v12 = vadd.f32 %v3306_v5, %v1017_v10 }
 0x6e8   :  { %v1030_v35 = vadd.f32 %v1018_v12, %v3951_v40 }
 0x6ea   :  { %v1050_v44 = vsel %vm170_vm0, %v1030_v35, 0.0 }
 0x6eb   :  { %1051 = vadd.xlane.f32.xlu0 %v1050_v44 }
 0x6ed   :  { %v1020_v9 = vpop.f32.mrf.mxu0 }
 0x6ee   :  { %v1021_v50 = vadd.f32 %v3306_v5, %v1020_v9 }
 0x6f0   :  { %v1031_v36 = vadd.f32 %v1021_v50, %v3995_v26 }
 0x6f2   :  { %v1053_v3 = vsel %vm170_vm0, %v1031_v36, 0.0 }
 0x6f3   :  { %1054 = vadd.xlane.f32.xlu0 %v1053_v3 }
 0x6f5   :  { %v1022_v54 = vpop.f32.mrf.mxu0 }
 0x6f6   :  { %v1023_v40 = vadd.f32 %v3306_v5, %v1022_v54 }
 0x6f8   :  { %v1032_v1 = vadd.f32 %v1023_v40, %v3998_v22 }
 0x6fa   :  { %v1056_v31 = vsel %vm170_vm0, %v1032_v1, 0.0 }
 0x718   :  { %v1037_v59 = vpop.xlane.xlu1 %1036 }
 0x719   :  { %v1059_v43 = vmul.f32 %v1037_v59, %v3847_v62 }
 0x71b   :  { %v4341_v53 = vsub.f32 %v1025_v48, %v1059_v43  ;;  %v4401_v43 = vld [vmem:[%s5314_s10] ss:$0 sm:$0xff] }
 0x71d   :  { %v1075_v56 = vmul.f32 %v4341_v53, %v4341_v53 }
 0x71f   :  { %v1083_v58 = vsel %vm170_vm0, %v1075_v56, 0.0 }
 0x720   :  { %1084 = vadd.xlane.f32.xlu1 %v1083_v58  ;;  %v1040_v60 = vpop.xlane.xlu2 %1039  ;;  %v4407_v58 = vld [vmem:[%s5315_s11] ss:$0 sm:$0xff] }
 0x721   :  { %v1060_v24 = vmul.f32 %v1040_v60, %v3847_v62 }
 0x723   :  { %v4347_v26 = vsub.f32 %v1026_v33, %v1060_v24 }
 0x725   :  { %v1076_v2 = vmul.f32 %v4347_v26, %v4347_v26 }
 0x727   :  { %v1086_v39 = vsel %vm170_vm0, %v1076_v2, 0.0 }
 0x728   :  { %1057 = vadd.xlane.f32.xlu1 %v1056_v31  ;;  %1087 = vadd.xlane.f32.xlu2 %v1086_v39 }
 0x73e   :  { %v1043_v7 = vpop.xlane.xlu0 %1042 }
 0x73f   :  { %v1061_v16 = vmul.f32 %v1043_v7, %v3847_v62 }
 0x741   :  { %v4355_v29 = vsub.f32 %v1027_v18, %v1061_v16 }
 0x743   :  { %v1077_v11 = vmul.f32 %v4355_v29, %v4355_v29 }
 0x745   :  { %v1089_v13 = vsel %vm170_vm0, %v1077_v11, 0.0 }
 0x746   :  { %v1046_v22 = vpop.xlane.xlu1 %1045  ;;  %1090 = vadd.xlane.f32.xlu2 %v1089_v13 }
 0x747   :  { %v1062_v51 = vmul.f32 %v1046_v22, %v3847_v62 }
 0x749   :  { %v4361_v17 = vsub.f32 %v1028_v20, %v1062_v51 }
 0x74b   :  { %v1078_v41 = vmul.f32 %v4361_v17, %v4361_v17 }
 0x74d   :  { %v1092_v63 = vsel %vm170_vm0, %v1078_v41, 0.0 }
 0x74e   :  { %1093 = vadd.xlane.f32.xlu0 %v1092_v63 }
 0x756   :  { %v1049_v52 = vpop.xlane.xlu2 %1048 }
 0x757   :  { %v1063_v21 = vmul.f32 %v1049_v52, %v3847_v62 }
 0x759   :  { %v4367_v55 = vsub.f32 %v1029_v19, %v1063_v21 }
 0x75b   :  { %v1079_v23 = vmul.f32 %v4367_v55, %v4367_v55 }
 0x75d   :  { %v1095_v46 = vsel %vm170_vm0, %v1079_v23, 0.0 }
 0x75e   :  { %v1052_v25 = vpop.xlane.xlu0 %1051  ;;  %1096 = vadd.xlane.f32.xlu1 %v1095_v46 }
 0x75f   :  { %v1064_v61 = vmul.f32 %v1052_v25, %v3847_v62 }
 0x761   :  { %v4373_v8 = vsub.f32 %v1030_v35, %v1064_v61 }
 0x763   :  { %v1080_v49 = vmul.f32 %v4373_v8, %v4373_v8 }
 0x765   :  { %v1098_v30 = vsel %vm170_vm0, %v1080_v49, 0.0 }
 0x766   :  { %v1055_v5 = vpop.xlane.xlu0 %1054  ;;  %1099 = vadd.xlane.f32.xlu2 %v1098_v30 }
 0x767   :  { %v1065_v32 = vmul.f32 %v1055_v5, %v3847_v62 }
 0x769   :  { %v4379_v6 = vsub.f32 %v1031_v36, %v1065_v32 }
 0x76b   :  { %v1081_v48 = vmul.f32 %v4379_v6, %v4379_v6 }
 0x76d   :  { %v1101_v0 = vsel %vm170_vm0, %v1081_v48, 0.0 }
 0x76e   :  { %1102 = vadd.xlane.f32.xlu0 %v1101_v0 }
 0x793   :  { %v1085_v28 = vpop.xlane.xlu1 %1084 }
 0x794   :  { %v1107_v33 = vmul.f32 %v1085_v28, %v3847_v62 }
 0x796   :  { %v1115_v34 = vadd.f32 1e-12, %v1107_v33 }
 0x798   :  { %3403 = vrsqrt.f32 %v1115_v34  ;;  %vm1129_vm15 = vweird.f32 %v1115_v34 }
 0x79b   :  { %v1058_v38 = vpop.xlane.xlu1 %1057  ;;  %v1088_v18 = vpop.xlane.xlu2 %1087 }
 0x79c   :  { %v1066_v42 = vmul.f32 %v1058_v38, %v3847_v62  ;;  %v1108_v15 = vmul.f32 %v1088_v18, %v3847_v62 }
 0x79e   :  { %v3404_v27 = vpop.eup %3403  ;;  %v4393_v20 = vsub.f32 %v1032_v1, %v1066_v42  ;;  %v1116_v14 = vadd.f32 1e-12, %v1108_v15 }
 0x79f   :  { %v1124_v45 = vmul.f32 %v3404_v27, %v1115_v34  ;;  %vm1130_vm14 = vweird.f32 %v3404_v27 }
 0x7a0   :  { %3405 = vrsqrt.f32 %v1116_v14  ;;  %v1082_v47 = vmul.f32 %v4393_v20, %v4393_v20  ;;  %vm1131_vm1 = vmor %vm1129_vm15, %vm1130_vm14  ;;  %vm1139_vm3 = vweird.f32 %v1116_v14 }
 0x7a1   :  { %v1125_v19 = vmul.f32 %v3404_v27, %v1124_v45 }
 0x7a2   :  { %v1104_v4 = vsel %vm170_vm0, %v1082_v47, 0.0 }
 0x7a3   :  { %v1126_v10 = vmul.f32 0.5, %v1125_v19  ;;  %1105 = vadd.xlane.f32.xlu1 %v1104_v4 }
 0x7a5   :  { %v1127_v12 = vsub.f32 1.5, %v1126_v10 }
 0x7a6   :  { %v3406_v35 = vpop.eup %3405 }
 0x7a7   :  { %v1128_v44 = vmul.f32 %v3404_v27, %v1127_v12  ;;  %v1134_v9 = vmul.f32 %v3406_v35, %v1116_v14  ;;  %vm1140_vm2 = vweird.f32 %v3406_v35 }
 0x7a8   :  { %vm1141_vm4 = vmor %vm1139_vm3, %vm1140_vm2 }
 0x7a9   :  { %v1135_v50 = vmul.f32 %v3406_v35, %v1134_v9  ;;  %v1132_v36 = vsel %vm1131_vm1, %v3404_v27, %v1128_v44 }
 0x7aa   :  { %v1203_v54 = vmul.f32 %v1132_v36, %v4341_v53 }
 0x7ab   :  { %v1136_v3 = vmul.f32 0.5, %v1135_v50 }
 0x7ac   :  { %v1214_v60 = vmul.f32 %v4401_v43, %v1203_v54 }
 0x7ad   :  { %v1137_v59 = vsub.f32 1.5, %v1136_v3 }
 0x7ae   :  { %v4413_v2 = vadd.f32 %v4407_v58, %v1214_v60 }
 0x7af   :  { %v1138_v56 = vmul.f32 %v3406_v35, %v1137_v59 }
 0x7b1   :  { %v1142_v40 = vsel %vm1141_vm4, %v3406_v35, %v1138_v56 }
 0x7b2   :  { %v1204_v24 = vmul.f32 %v1142_v40, %v4347_v26 }
 0x7b4   :  { %v1215_v1 = vmul.f32 %v4401_v43, %v1204_v24 }
 0x7b6   :  { %v4416_v53 = vadd.f32 %v4407_v58, %v1215_v1 }
 0x7b8   :  { %v1233_v31 = vpack.c.bf16 %v4416_v53, %v4413_v2 }
 0x7b9   :  { %v1091_v39 = vpop.xlane.xlu2 %1090 }
 0x7ba   :  { %v1109_v7 = vmul.f32 %v1091_v39, %v3847_v62  ;;  %3132 = vmatmul.msk.bf16.vlgmr.msra.gmra.mxu2 %vm170_vm0, %v1233_v31 }
 0x7bc   :  { %v1117_v16 = vadd.f32 1e-12, %v1109_v7 }
 0x7be   :  { %3407 = vrsqrt.f32 %v1117_v16  ;;  %vm1149_vm6 = vweird.f32 %v1117_v16 }
 0x7c1   :  { %v1094_v11 = vpop.xlane.xlu0 %1093 }
 0x7c2   :  { %v1110_v26 = vmul.f32 %v1094_v11, %v3847_v62 }
 0x7c4   :  { %v3408_v13 = vpop.eup %3407  ;;  %v1118_v22 = vadd.f32 1e-12, %v1110_v26 }
 0x7c5   :  { %v1144_v51 = vmul.f32 %v3408_v13, %v1117_v16  ;;  %vm1150_vm5 = vweird.f32 %v3408_v13 }
 0x7c6   :  { %3409 = vrsqrt.f32 %v1118_v22  ;;  %vm1151_vm7 = vmor %vm1149_vm6, %vm1150_vm5  ;;  %vm1159_vm9 = vweird.f32 %v1118_v22 }
 0x7c7   :  { %v1145_v41 = vmul.f32 %v3408_v13, %v1144_v51 }
 0x7c9   :  { %v1146_v63 = vmul.f32 0.5, %v1145_v41 }
 0x7cb   :  { %v1147_v52 = vsub.f32 1.5, %v1146_v63 }
 0x7cc   :  { %v3410_v21 = vpop.eup %3409 }
 0x7cd   :  { %v1148_v23 = vmul.f32 %v3408_v13, %v1147_v52  ;;  %v1154_v46 = vmul.f32 %v3410_v21, %v1118_v22  ;;  %vm1160_vm8 = vweird.f32 %v3410_v21 }
 0x7ce   :  { %vm1161_vm10 = vmor %vm1159_vm9, %vm1160_vm8 }
 0x7cf   :  { %v1155_v25 = vmul.f32 %v3410_v21, %v1154_v46  ;;  %v1152_v61 = vsel %vm1151_vm7, %v3408_v13, %v1148_v23 }
 0x7d0   :  { %v1205_v48 = vmul.f32 %v1152_v61, %v4355_v29 }
 0x7d1   :  { %v1156_v49 = vmul.f32 0.5, %v1155_v25  ;;  %v1097_v30 = vpop.xlane.xlu1 %1096 }
 0x7d2   :  { %v1111_v5 = vmul.f32 %v1097_v30, %v3847_v62  ;;  %v1216_v37 = vmul.f32 %v4401_v43, %v1205_v48  ;;  %v3277_v48 = vld [vmem:[%s5318_s14 + $0x18] sm:$0xff] }
 0x7d3   :  { %v1157_v32 = vsub.f32 1.5, %v1156_v49  ;;  %1426 = vmatpush.bf16.msra.mxu1 %v3277_v48 }
 0x7d4   :  { %v1119_v0 = vadd.f32 1e-12, %v1111_v5  ;;  %v4430_v27 = vadd.f32 %v4407_v58, %v1216_v37 }
 0x7d5   :  { %v1158_v57 = vmul.f32 %v3410_v21, %v1157_v32 }
 0x7d6   :  { %3411 = vrsqrt.f32 %v1119_v0  ;;  %vm1169_vm15 = vweird.f32 %v1119_v0 }
 0x7d7   :  { %v1162_v28 = vsel %vm1161_vm10, %v3410_v21, %v1158_v57 }
 0x7d8   :  { %v1206_v33 = vmul.f32 %v1162_v28, %v4361_v17  ;;  %v3276_v28 = vld [vmem:[%s5318_s14 + $0x10] sm:$0xff] }
 0x7d9   :  { %v1100_v34 = vpop.xlane.xlu2 %1099  ;;  %1427 = vmatpush.bf16.msra.mxu1 %v3276_v28 }
 0x7da   :  { %v1112_v38 = vmul.f32 %v1100_v34, %v3847_v62  ;;  %v1217_v18 = vmul.f32 %v4401_v43, %v1206_v33  ;;  %v4481_v33 = vld [vmem:[%s5317_s13] ss:$0 sm:$0xff] }
 0x7dc   :  { %v3412_v42 = vpop.eup %3411  ;;  %v1120_v15 = vadd.f32 1e-12, %v1112_v38  ;;  %v4433_v29 = vadd.f32 %v4407_v58, %v1217_v18 }
 0x7dd   :  { %v1164_v14 = vmul.f32 %v3412_v42, %v1119_v0  ;;  %vm1170_vm14 = vweird.f32 %v3412_v42 }
 0x7de   :  { %3413 = vrsqrt.f32 %v1120_v15  ;;  %v1234_v17 = vpack.c.bf16 %v4433_v29, %v4430_v27  ;;  %vm1171_vm1 = vmor %vm1169_vm15, %vm1170_vm14  ;;  %vm1179_vm3 = vweird.f32 %v1120_v15 }
 0x7df   :  { %v1165_v45 = vmul.f32 %v3412_v42, %v1164_v14 }
 0x7e0   :  { %3133 = vmatmul.msk.bf16.gmra.mxu2 %vm170_vm0, %v1234_v17 }
 0x7e1   :  { %v1166_v47 = vmul.f32 0.5, %v1165_v45 }
 0x7e3   :  { %v1167_v19 = vsub.f32 1.5, %v1166_v47 }
 0x7e4   :  { %v3414_v4 = vpop.eup %3413 }
 0x7e5   :  { %v1168_v10 = vmul.f32 %v3412_v42, %v1167_v19  ;;  %v1174_v12 = vmul.f32 %v3414_v4, %v1120_v15  ;;  %vm1180_vm2 = vweird.f32 %v3414_v4 }
 0x7e6   :  { %vm1181_vm4 = vmor %vm1179_vm3, %vm1180_vm2 }
 0x7e7   :  { %v1175_v35 = vmul.f32 %v3414_v4, %v1174_v12  ;;  %v1172_v44 = vsel %vm1171_vm1, %v3412_v42, %v1168_v10 }
 0x7e8   :  { %v1207_v36 = vmul.f32 %v1172_v44, %v4367_v55  ;;  %v1103_v55 = vpop.xlane.xlu0 %1102 }
 0x7e9   :  { %v1176_v9 = vmul.f32 0.5, %v1175_v35  ;;  %v1113_v31 = vmul.f32 %v1103_v55, %v3847_v62 }
 0x7ea   :  { %v1218_v56 = vmul.f32 %v4401_v43, %v1207_v36 }
 0x7eb   :  { %v1177_v50 = vsub.f32 1.5, %v1176_v9  ;;  %v1121_v39 = vadd.f32 1e-12, %v1113_v31 }
 0x7ec   :  { %v4443_v60 = vadd.f32 %v4407_v58, %v1218_v56 }
 0x7ed   :  { %v1178_v3 = vmul.f32 %v3414_v4, %v1177_v50  ;;  %3415 = vrsqrt.f32 %v1121_v39  ;;  %vm1189_vm6 = vweird.f32 %v1121_v39 }
 0x7ef   :  { %v1182_v59 = vsel %vm1181_vm4, %v3414_v4, %v1178_v3 }
 0x7f0   :  { %v1208_v54 = vmul.f32 %v1182_v59, %v4373_v8 }
 0x7f2   :  { %v1219_v40 = vmul.f32 %v4401_v43, %v1208_v54 }
 0x7f3   :  { %v3416_v8 = vpop.eup %3415 }
 0x7f4   :  { %v4446_v24 = vadd.f32 %v4407_v58, %v1219_v40  ;;  %v1184_v7 = vmul.f32 %v3416_v8, %v1121_v39  ;;  %vm1190_vm5 = vweird.f32 %v3416_v8 }
 0x7f5   :  { %vm1191_vm7 = vmor %vm1189_vm6, %vm1190_vm5 }
 0x7f6   :  { %v1235_v1 = vpack.c.bf16 %v4446_v24, %v4443_v60  ;;  %v1185_v16 = vmul.f32 %v3416_v8, %v1184_v7 }
 0x7f8   :  { %3134 = vmatmul.msk.bf16.gmra.mxu2 %vm170_vm0, %v1235_v1  ;;  %v1186_v22 = vmul.f32 0.5, %v1185_v16 }
 0x7fa   :  { %v1187_v51 = vsub.f32 1.5, %v1186_v22 }
 0x7fc   :  { %v1188_v63 = vmul.f32 %v3416_v8, %v1187_v51 }
 0x7fe   :  { %v1192_v23 = vsel %vm1191_vm7, %v3416_v8, %v1188_v63 }
 0x7ff   :  { %v1209_v61 = vmul.f32 %v1192_v23, %v4379_v6 }
 0x801   :  { %v1220_v32 = vmul.f32 %v4401_v43, %v1209_v61 }
 0x803   :  { %v4461_v57 = vadd.f32 %v4407_v58, %v1220_v32 }
 0x816   :  { %v1106_v11 = vpop.xlane.xlu1 %1105 }
 0x817   :  { %v1114_v26 = vmul.f32 %v1106_v11, %v3847_v62 }
 0x819   :  { %v1122_v13 = vadd.f32 1e-12, %v1114_v26 }
 0x81b   :  { %3417 = vrsqrt.f32 %v1122_v13  ;;  %vm1199_vm9 = vweird.f32 %v1122_v13 }
 0x821   :  { %v3418_v41 = vpop.eup %3417 }
 0x822   :  { %v1194_v52 = vmul.f32 %v3418_v41, %v1122_v13  ;;  %vm1200_vm8 = vweird.f32 %v3418_v41 }
 0x823   :  { %vm1201_vm10 = vmor %vm1199_vm9, %vm1200_vm8 }
 0x824   :  { %v1195_v21 = vmul.f32 %v3418_v41, %v1194_v52 }
 0x826   :  { %v1196_v46 = vmul.f32 0.5, %v1195_v21 }
 0x828   :  { %v1197_v25 = vsub.f32 1.5, %v1196_v46 }
 0x82a   :  { %v1198_v49 = vmul.f32 %v3418_v41, %v1197_v25 }
 0x82c   :  { %v1202_v30 = vsel %vm1201_vm10, %v3418_v41, %v1198_v49 }
 0x82d   :  { %v1210_v5 = vmul.f32 %v1202_v30, %v4393_v20 }
 0x82f   :  { %v1221_v0 = vmul.f32 %v4401_v43, %v1210_v5  ;;  %v3275_v43 = vld [vmem:[%s5318_s14 + $0x8] sm:$0xff] }
 0x830   :  { %1428 = vmatpush.bf16.msra.mxu1 %v3275_v43 }
 0x831   :  { %v4464_v6 = vadd.f32 %v4407_v58, %v1221_v0  ;;  %v3274_v58 = vld [vmem:[%s5318_s14] sm:$0xff] }
 0x833   :  { %v1236_v20 = vpack.c.bf16 %v4464_v6, %v4461_v57 }
 0x834   :  { %1429 = vmatpush.bf16.msra.mxu1 %v3274_v58 }
 0x835   :  { %3135 = vmatmul.msk.bf16.gmra.mxu2 %vm170_vm0, %v1236_v20 }
 0x83d   :  { %v1278_v37 = vpop.f32.mrf.mxu2 }
 0x83e   :  { %v1279_v34 = vadd.f32 %v4481_v33, %v1278_v37 }
 0x840   :  { %v1306_v38 = vmul.f32 0.044715, %v1279_v34  ;;  %v1298_v50 = vmul.f32 0.5, %v1279_v34 }
 0x842   :  { %v1314_v18 = vmul.f32 %v1306_v38, %v1279_v34 }
 0x844   :  { %v1322_v42 = vmul.f32 %v1314_v18, %v1279_v34 }
 0x845   :  { %v1280_v15 = vpop.f32.mrf.mxu2 }
 0x846   :  { %v1330_v14 = vadd.f32 %v1322_v42, %v1279_v34  ;;  %v1281_v17 = vadd.f32 %v4481_v33, %v1280_v15 }
 0x848   :  { %v1307_v45 = vmul.f32 0.044715, %v1281_v17  ;;  %v1338_v47 = vmul.f32 0.7978846, %v1330_v14  ;;  %v1299_v36 = vmul.f32 0.5, %v1281_v17 }
 0x84a   :  { %v1315_v19 = vmul.f32 %v1307_v45, %v1281_v17  ;;  %3419 = vtanh.f32 %v1338_v47 }
 0x84c   :  { %v1323_v4 = vmul.f32 %v1315_v19, %v1281_v17 }
 0x84e   :  { %v1331_v10 = vadd.f32 %v1323_v4, %v1281_v17 }
 0x850   :  { %v1339_v12 = vmul.f32 0.7978846, %v1331_v10  ;;  %v3420_v35 = vpop.eup %3419 }
 0x851   :  { %v1354_v44 = vadd.f32 1.0, %v3420_v35 }
 0x852   :  { %3421 = vtanh.f32 %v1339_v12 }
 0x853   :  { %v1362_v59 = vmul.f32 %v1354_v44, %v1298_v50 }
 0x858   :  { %v3422_v9 = vpop.eup %3421 }
 0x859   :  { %v1355_v3 = vadd.f32 1.0, %v3422_v9 }
 0x85b   :  { %v1363_v54 = vmul.f32 %v1355_v3, %v1299_v36 }
 0x85d   :  { %v1370_v56 = vpack.c.bf16 %v1363_v54, %v1362_v59 }
 0x85f   :  { %3152 = vmatmul.msk.bf16.vlgmr.msra.gmra.mxu1 %vm527_vm12, %v1370_v56 }
 0x863   :  { %v1283_v40 = vpop.f32.mrf.mxu2 }
 0x864   :  { %v1284_v1 = vadd.f32 %v4481_v33, %v1283_v40 }
 0x866   :  { %v1308_v55 = vmul.f32 0.044715, %v1284_v1  ;;  %v1300_v61 = vmul.f32 0.5, %v1284_v1 }
 0x868   :  { %v1316_v31 = vmul.f32 %v1308_v55, %v1284_v1 }
 0x86a   :  { %v1324_v39 = vmul.f32 %v1316_v31, %v1284_v1 }
 0x86b   :  { %v1285_v8 = vpop.f32.mrf.mxu2 }
 0x86c   :  { %v1286_v7 = vadd.f32 %v4481_v33, %v1285_v8  ;;  %v1332_v16 = vadd.f32 %v1324_v39, %v1284_v1 }
 0x86e   :  { %v1309_v11 = vmul.f32 0.044715, %v1286_v7  ;;  %v1340_v13 = vmul.f32 0.7978846, %v1332_v16  ;;  %v1301_v49 = vmul.f32 0.5, %v1286_v7 }
 0x870   :  { %v1317_v26 = vmul.f32 %v1309_v11, %v1286_v7  ;;  %3423 = vtanh.f32 %v1340_v13 }
 0x872   :  { %v1325_v22 = vmul.f32 %v1317_v26, %v1286_v7 }
 0x874   :  { %v1333_v51 = vadd.f32 %v1325_v22, %v1286_v7 }
 0x876   :  { %v1341_v41 = vmul.f32 0.7978846, %v1333_v51  ;;  %v3424_v63 = vpop.eup %3423 }
 0x877   :  { %v1356_v23 = vadd.f32 1.0, %v3424_v63 }
 0x878   :  { %3425 = vtanh.f32 %v1341_v41 }
 0x879   :  { %v1364_v32 = vmul.f32 %v1356_v23, %v1300_v61 }
 0x87b   :  { %v1288_v52 = vpop.f32.mrf.mxu2 }
 0x87c   :  { %v1289_v21 = vadd.f32 %v4481_v33, %v1288_v52 }
 0x87e   :  { %v3426_v46 = vpop.eup %3425  ;;  %v1310_v25 = vmul.f32 0.044715, %v1289_v21  ;;  %v1302_v47 = vmul.f32 0.5, %v1289_v21 }
 0x87f   :  { %v1357_v30 = vadd.f32 1.0, %v3426_v46 }
 0x880   :  { %v1318_v5 = vmul.f32 %v1310_v25, %v1289_v21 }
 0x881   :  { %v1365_v48 = vmul.f32 %v1357_v30, %v1301_v49 }
 0x882   :  { %v1326_v0 = vmul.f32 %v1318_v5, %v1289_v21 }
 0x883   :  { %v1290_v28 = vpop.f32.mrf.mxu2  ;;  %v1371_v20 = vpack.c.bf16 %v1365_v48, %v1364_v32 }
 0x884   :  { %v1291_v43 = vadd.f32 %v4481_v33, %v1290_v28  ;;  %v1334_v58 = vadd.f32 %v1326_v0, %v1289_v21 }
 0x885   :  { %3153 = vmatmul.msk.bf16.gmra.mxu1 %vm527_vm12, %v1371_v20 }
 0x886   :  { %v1311_v37 = vmul.f32 0.044715, %v1291_v43  ;;  %v1342_v38 = vmul.f32 0.7978846, %v1334_v58  ;;  %v1303_v19 = vmul.f32 0.5, %v1291_v43 }
 0x888   :  { %v1319_v34 = vmul.f32 %v1311_v37, %v1291_v43  ;;  %3427 = vtanh.f32 %v1342_v38 }
 0x88a   :  { %v1327_v18 = vmul.f32 %v1319_v34, %v1291_v43 }
 0x88c   :  { %v1335_v42 = vadd.f32 %v1327_v18, %v1291_v43 }
 0x88e   :  { %v1343_v15 = vmul.f32 0.7978846, %v1335_v42  ;;  %v3428_v14 = vpop.eup %3427 }
 0x88f   :  { %v1358_v17 = vadd.f32 1.0, %v3428_v14 }
 0x890   :  { %3429 = vtanh.f32 %v1343_v15 }
 0x891   :  { %v1366_v10 = vmul.f32 %v1358_v17, %v1302_v47 }
 0x896   :  { %v3430_v45 = vpop.eup %3429 }
 0x897   :  { %v1359_v4 = vadd.f32 1.0, %v3430_v45 }
 0x899   :  { %v1367_v12 = vmul.f32 %v1359_v4, %v1303_v19 }
 0x89b   :  { %v1372_v35 = vpack.c.bf16 %v1367_v12, %v1366_v10 }
 0x89d   :  { %3154 = vmatmul.msk.bf16.gmra.mxu1 %vm527_vm12, %v1372_v35 }
 0x8b8   :  { %v1293_v44 = vpop.f32.mrf.mxu2 }
 0x8b9   :  { %v1294_v9 = vadd.f32 %v4481_v33, %v1293_v44 }
 0x8bb   :  { %v1312_v50 = vmul.f32 0.044715, %v1294_v9  ;;  %v1304_v26 = vmul.f32 0.5, %v1294_v9 }
 0x8bd   :  { %v1320_v36 = vmul.f32 %v1312_v50, %v1294_v9 }
 0x8bf   :  { %v1328_v3 = vmul.f32 %v1320_v36, %v1294_v9 }
 0x8c0   :  { %v1295_v59 = vpop.f32.mrf.mxu2 }
 0x8c1   :  { %v1296_v54 = vadd.f32 %v4481_v33, %v1295_v59  ;;  %v1336_v56 = vadd.f32 %v1328_v3, %v1294_v9  ;;  %v3310_v33 = vld [vmem:[%s5319_s15] ss:$0 sm:$0xff] }
 0x8c3   :  { %v1313_v40 = vmul.f32 0.044715, %v1296_v54  ;;  %v1344_v55 = vmul.f32 0.7978846, %v1336_v56  ;;  %v1305_v13 = vmul.f32 0.5, %v1296_v54 }
 0x8c5   :  { %v1321_v1 = vmul.f32 %v1313_v40, %v1296_v54  ;;  %3431 = vtanh.f32 %v1344_v55 }
 0x8c7   :  { %v1329_v31 = vmul.f32 %v1321_v1, %v1296_v54 }
 0x8c9   :  { %v1337_v39 = vadd.f32 %v1329_v31, %v1296_v54 }
 0x8cb   :  { %v1345_v8 = vmul.f32 0.7978846, %v1337_v39  ;;  %v3432_v7 = vpop.eup %3431 }
 0x8cc   :  { %v1360_v16 = vadd.f32 1.0, %v3432_v7 }
 0x8cd   :  { %3433 = vtanh.f32 %v1345_v8 }
 0x8ce   :  { %v1368_v51 = vmul.f32 %v1360_v16, %v1304_v26 }
 0x8d3   :  { %v3434_v11 = vpop.eup %3433 }
 0x8d4   :  { %v1361_v22 = vadd.f32 1.0, %v3434_v11 }
 0x8d6   :  { %v1369_v41 = vmul.f32 %v1361_v22, %v1305_v13 }
 0x8d8   :  { %v1373_v63 = vpack.c.bf16 %v1369_v41, %v1368_v51 }
 0x8da   :  { %3155 = vmatmul.msk.bf16.gmra.mxu1 %vm527_vm12, %v1373_v63 }
 0x8dc   :  { %v1431_v52 = vpop.f32.mrf.mxu1 }
 0x8dd   :  { %v1432_v21 = vadd.f32 %v3310_v33, %v1431_v52 }
 0x8df   :  { %v1451_v23 = vadd.f32 %v1432_v21, %v4413_v2 }
 0x8e1   :  { %v1461_v46 = vsel %vm170_vm0, %v1451_v23, 0.0 }
 0x8e2   :  { %1462 = vadd.xlane.f32.xlu2 %v1461_v46 }
 0x8e4   :  { %v1433_v25 = vpop.f32.mrf.mxu1 }
 0x8e5   :  { %v1434_v61 = vadd.f32 %v3310_v33, %v1433_v25  ;;  %v3278_v25 = vld [vmem:[%s5342_s25 + $0x10] sm:$0xff] }
 0x8e7   :  { %v1452_v49 = vadd.f32 %v1434_v61, %v4416_v53 }
 0x8e9   :  { %v1464_v30 = vsel %vm170_vm0, %v1452_v49, 0.0 }
 0x8ea   :  { %1465 = vadd.xlane.f32.xlu0 %v1464_v30 }
 0x902   :  { %v1436_v5 = vpop.f32.mrf.mxu1 }
 0x903   :  { %v1437_v32 = vadd.f32 %v3310_v33, %v1436_v5 }
 0x905   :  { %v1453_v48 = vadd.f32 %v1437_v32, %v4430_v27 }
 0x907   :  { %v1467_v0 = vsel %vm170_vm0, %v1453_v48, 0.0 }
 0x908   :  { %1468 = vadd.xlane.f32.xlu1 %v1467_v0 }
 0x90a   :  { %v1438_v28 = vpop.f32.mrf.mxu1 }
 0x90b   :  { %v1439_v20 = vadd.f32 %v3310_v33, %v1438_v28 }
 0x90d   :  { %v1454_v2 = vadd.f32 %v1439_v20, %v4433_v29 }
 0x90f   :  { %v1470_v43 = vsel %vm170_vm0, %v1454_v2, 0.0 }
 0x910   :  { %1471 = vadd.xlane.f32.xlu2 %v1470_v43 }
 0x91a   :  { %v1441_v58 = vpop.f32.mrf.mxu1 }
 0x91b   :  { %v1442_v37 = vadd.f32 %v3310_v33, %v1441_v58 }
 0x91d   :  { %v1455_v53 = vadd.f32 %v1442_v37, %v4443_v60 }
 0x91f   :  { %v1473_v34 = vsel %vm170_vm0, %v1455_v53, 0.0 }
 0x920   :  { %1474 = vadd.xlane.f32.xlu0 %v1473_v34 }
 0x922   :  { %v1443_v38 = vpop.f32.mrf.mxu1 }
 0x923   :  { %v1444_v18 = vadd.f32 %v3310_v33, %v1443_v38 }
 0x925   :  { %v1456_v27 = vadd.f32 %v1444_v18, %v4446_v24 }
 0x927   :  { %v1476_v42 = vsel %vm170_vm0, %v1456_v27, 0.0 }
 0x928   :  { %1477 = vadd.xlane.f32.xlu1 %v1476_v42 }
 0x955   :  { %v1463_v15 = vpop.xlane.xlu2 %1462 }
 0x956   :  { %v1485_v29 = vmul.f32 %v1463_v15, %v3847_v62 }
 0x957   :  { %v1446_v14 = vpop.f32.mrf.mxu1 }
 0x958   :  { %v4511_v17 = vsub.f32 %v1451_v23, %v1485_v29  ;;  %v1447_v45 = vadd.f32 %v3310_v33, %v1446_v14 }
 0x95a   :  { %v1457_v47 = vadd.f32 %v1447_v45, %v4461_v57  ;;  %v1501_v60 = vmul.f32 %v4511_v17, %v4511_v17 }
 0x95c   :  { %v1479_v19 = vsel %vm170_vm0, %v1457_v47, 0.0  ;;  %v1509_v4 = vsel %vm170_vm0, %v1501_v60, 0.0  ;;  %v4573_v60 = vld [vmem:[%s5320_s16] ss:$0 sm:$0xff] }
 0x95d   :  { %v1466_v24 = vpop.xlane.xlu0 %1465  ;;  %1480 = vadd.xlane.f32.xlu1 %v1479_v19  ;;  %1510 = vadd.xlane.f32.xlu2 %v1509_v4 }
 0x95e   :  { %v1486_v10 = vmul.f32 %v1466_v24, %v3847_v62 }
 0x95f   :  { %v1448_v12 = vpop.f32.mrf.mxu1 }
 0x960   :  { %v4519_v35 = vsub.f32 %v1452_v49, %v1486_v10  ;;  %v1449_v44 = vadd.f32 %v3310_v33, %v1448_v12  ;;  %v3279_v33 = vld [vmem:[%s5342_s25 + $0x18] sm:$0xff]  ;;  %v4579_v10 = vld [vmem:[%s5321_s17] ss:$0 sm:$0xff] }
 0x961   :  { %1721 = vmatpush.bf16.msra.mxu3 %v3279_v33 }
 0x962   :  { %v1502_v9 = vmul.f32 %v4519_v35, %v4519_v35  ;;  %v1458_v57 = vadd.f32 %v1449_v44, %v4464_v6 }
 0x964   :  { %v1512_v50 = vsel %vm170_vm0, %v1502_v9, 0.0  ;;  %v1482_v36 = vsel %vm170_vm0, %v1458_v57, 0.0 }
 0x965   :  { %1513 = vadd.xlane.f32.xlu0 %v1512_v50  ;;  %1483 = vadd.xlane.f32.xlu2 %v1482_v36 }
 0x966   :  { %1722 = vmatpush.bf16.msra.mxu3 %v3278_v25 }
 0x97b   :  { %v1469_v3 = vpop.xlane.xlu1 %1468 }
 0x97c   :  { %v1487_v59 = vmul.f32 %v1469_v3, %v3847_v62 }
 0x97e   :  { %v4527_v54 = vsub.f32 %v1453_v48, %v1487_v59 }
 0x980   :  { %v1503_v56 = vmul.f32 %v4527_v54, %v4527_v54 }
 0x982   :  { %v1515_v40 = vsel %vm170_vm0, %v1503_v56, 0.0 }
 0x983   :  { %1516 = vadd.xlane.f32.xlu0 %v1515_v40  ;;  %v1472_v1 = vpop.xlane.xlu2 %1471 }
 0x984   :  { %v1488_v6 = vmul.f32 %v1472_v1, %v3847_v62 }
 0x986   :  { %v4533_v55 = vsub.f32 %v1454_v2, %v1488_v6 }
 0x988   :  { %v1504_v31 = vmul.f32 %v4533_v55, %v4533_v55 }
 0x98a   :  { %v1518_v39 = vsel %vm170_vm0, %v1504_v31, 0.0 }
 0x98b   :  { %1519 = vadd.xlane.f32.xlu1 %v1518_v39 }
 0x993   :  { %v1475_v8 = vpop.xlane.xlu0 %1474 }
 0x994   :  { %v1489_v7 = vmul.f32 %v1475_v8, %v3847_v62 }
 0x996   :  { %v4539_v16 = vsub.f32 %v1455_v53, %v1489_v7 }
 0x998   :  { %v1505_v11 = vmul.f32 %v4539_v16, %v4539_v16 }
 0x99a   :  { %v1521_v26 = vsel %vm170_vm0, %v1505_v11, 0.0 }
 0x99b   :  { %v1478_v13 = vpop.xlane.xlu1 %1477  ;;  %1522 = vadd.xlane.f32.xlu2 %v1521_v26 }
 0x99c   :  { %v1490_v22 = vmul.f32 %v1478_v13, %v3847_v62 }
 0x99e   :  { %v4545_v51 = vsub.f32 %v1456_v27, %v1490_v22 }
 0x9a0   :  { %v1506_v41 = vmul.f32 %v4545_v51, %v4545_v51 }
 0x9a2   :  { %v1524_v63 = vsel %vm170_vm0, %v1506_v41, 0.0 }
 0x9a3   :  { %1525 = vadd.xlane.f32.xlu0 %v1524_v63 }
 0x9d0   :  { %v1481_v52 = vpop.xlane.xlu1 %1480  ;;  %v1511_v21 = vpop.xlane.xlu2 %1510 }
 0x9d1   :  { %v1491_v23 = vmul.f32 %v1481_v52, %v3847_v62  ;;  %v1533_v46 = vmul.f32 %v1511_v21, %v3847_v62 }
 0x9d3   :  { %v4558_v61 = vsub.f32 %v1457_v47, %v1491_v23  ;;  %v1541_v49 = vadd.f32 1e-12, %v1533_v46 }
 0x9d5   :  { %3435 = vrsqrt.f32 %v1541_v49  ;;  %v1507_v30 = vmul.f32 %v4558_v61, %v4558_v61  ;;  %vm1555_vm15 = vweird.f32 %v1541_v49 }
 0x9d7   :  { %v1527_v5 = vsel %vm170_vm0, %v1507_v30, 0.0 }
 0x9d8   :  { %v1514_v32 = vpop.xlane.xlu0 %1513  ;;  %1528 = vadd.xlane.f32.xlu1 %v1527_v5  ;;  %v1484_v48 = vpop.xlane.xlu2 %1483 }
 0x9d9   :  { %v1534_v0 = vmul.f32 %v1514_v32, %v3847_v62  ;;  %v1492_v28 = vmul.f32 %v1484_v48, %v3847_v62 }
 0x9db   :  { %v3436_v20 = vpop.eup %3435  ;;  %v1542_v2 = vadd.f32 1e-12, %v1534_v0  ;;  %v4565_v43 = vsub.f32 %v1458_v57, %v1492_v28 }
 0x9dc   :  { %v1550_v58 = vmul.f32 %v3436_v20, %v1541_v49  ;;  %vm1556_vm14 = vweird.f32 %v3436_v20 }
 0x9dd   :  { %3437 = vrsqrt.f32 %v1542_v2  ;;  %v1508_v37 = vmul.f32 %v4565_v43, %v4565_v43  ;;  %vm1557_vm1 = vmor %vm1555_vm15, %vm1556_vm14  ;;  %vm1565_vm3 = vweird.f32 %v1542_v2 }
 0x9de   :  { %v1551_v53 = vmul.f32 %v3436_v20, %v1550_v58 }
 0x9df   :  { %v1530_v34 = vsel %vm170_vm0, %v1508_v37, 0.0 }
 0x9e0   :  { %v1552_v38 = vmul.f32 0.5, %v1551_v53  ;;  %1531 = vadd.xlane.f32.xlu2 %v1530_v34 }
 0x9e2   :  { %v1553_v18 = vsub.f32 1.5, %v1552_v38 }
 0x9e3   :  { %v3438_v27 = vpop.eup %3437 }
 0x9e4   :  { %v1554_v42 = vmul.f32 %v3436_v20, %v1553_v18  ;;  %v1560_v15 = vmul.f32 %v3438_v27, %v1542_v2  ;;  %vm1566_vm2 = vweird.f32 %v3438_v27 }
 0x9e5   :  { %vm1567_vm4 = vmor %vm1565_vm3, %vm1566_vm2 }
 0x9e6   :  { %v1561_v29 = vmul.f32 %v3438_v27, %v1560_v15  ;;  %v1558_v14 = vsel %vm1557_vm1, %v3436_v20, %v1554_v42 }
 0x9e7   :  { %v1629_v19 = vmul.f32 %v1558_v14, %v4511_v17 }
 0x9e8   :  { %v1562_v45 = vmul.f32 0.5, %v1561_v29 }
 0x9e9   :  { %v1640_v12 = vmul.f32 %v4573_v60, %v1629_v19 }
 0x9ea   :  { %v1563_v47 = vsub.f32 1.5, %v1562_v45 }
 0x9eb   :  { %v4585_v57 = vadd.f32 %v4579_v10, %v1640_v12 }
 0x9ec   :  { %v1564_v4 = vmul.f32 %v3438_v27, %v1563_v47 }
 0x9ee   :  { %v1568_v24 = vsel %vm1567_vm4, %v3438_v27, %v1564_v4 }
 0x9ef   :  { %v1630_v44 = vmul.f32 %v1568_v24, %v4519_v35 }
 0x9f1   :  { %v1641_v9 = vmul.f32 %v4573_v60, %v1630_v44 }
 0x9f3   :  { %v4588_v17 = vadd.f32 %v4579_v10, %v1641_v9 }
 0x9f5   :  { %v1677_v50 = vpack.c.bf16 %v4588_v17, %v4585_v57 }
 0x9f6   :  { %v1517_v36 = vpop.xlane.xlu0 %1516 }
 0x9f7   :  { %v1535_v3 = vmul.f32 %v1517_v36, %v3847_v62  ;;  %3169 = vmatmul.msk.bf16.vlgmr.msra.gmra.mxu3 %vm170_vm0, %v1677_v50 }
 0x9f9   :  { %v1543_v59 = vadd.f32 1e-12, %v1535_v3 }
 0x9fb   :  { %3439 = vrsqrt.f32 %v1543_v59  ;;  %vm1575_vm6 = vweird.f32 %v1543_v59 }
 0x9fe   :  { %v1520_v56 = vpop.xlane.xlu1 %1519 }
 0x9ff   :  { %v1536_v35 = vmul.f32 %v1520_v56, %v3847_v62 }
 0xa01   :  { %v3440_v40 = vpop.eup %3439  ;;  %v1544_v1 = vadd.f32 1e-12, %v1536_v35 }
 0xa02   :  { %v1570_v6 = vmul.f32 %v3440_v40, %v1543_v59  ;;  %vm1576_vm5 = vweird.f32 %v3440_v40 }
 0xa03   :  { %3441 = vrsqrt.f32 %v1544_v1  ;;  %vm1577_vm7 = vmor %vm1575_vm6, %vm1576_vm5  ;;  %vm1585_vm9 = vweird.f32 %v1544_v1 }
 0xa04   :  { %v1571_v31 = vmul.f32 %v3440_v40, %v1570_v6 }
 0xa06   :  { %v1572_v39 = vmul.f32 0.5, %v1571_v31 }
 0xa08   :  { %v1573_v8 = vsub.f32 1.5, %v1572_v39 }
 0xa09   :  { %v3442_v7 = vpop.eup %3441 }
 0xa0a   :  { %v1574_v11 = vmul.f32 %v3440_v40, %v1573_v8  ;;  %v1580_v26 = vmul.f32 %v3442_v7, %v1544_v1  ;;  %vm1586_vm8 = vweird.f32 %v3442_v7 }
 0xa0b   :  { %vm1587_vm10 = vmor %vm1585_vm9, %vm1586_vm8 }
 0xa0c   :  { %v1581_v13 = vmul.f32 %v3442_v7, %v1580_v26  ;;  %v1578_v22 = vsel %vm1577_vm7, %v3440_v40, %v1574_v11 }
 0xa0d   :  { %v1631_v21 = vmul.f32 %v1578_v22, %v4527_v54 }
 0xa0e   :  { %v1582_v41 = vmul.f32 0.5, %v1581_v13  ;;  %v1523_v63 = vpop.xlane.xlu2 %1522 }
 0xa0f   :  { %v1537_v33 = vmul.f32 %v1523_v63, %v3847_v62  ;;  %v1642_v30 = vmul.f32 %v4573_v60, %v1631_v21 }
 0xa10   :  { %v1583_v52 = vsub.f32 1.5, %v1582_v41 }
 0xa11   :  { %v1545_v23 = vadd.f32 1e-12, %v1537_v33  ;;  %v4602_v20 = vadd.f32 %v4579_v10, %v1642_v30 }
 0xa12   :  { %v1584_v46 = vmul.f32 %v3442_v7, %v1583_v52 }
 0xa13   :  { %3443 = vrsqrt.f32 %v1545_v23  ;;  %vm1595_vm15 = vweird.f32 %v1545_v23 }
 0xa14   :  { %v1588_v25 = vsel %vm1587_vm10, %v3442_v7, %v1584_v46 }
 0xa15   :  { %v1632_v49 = vmul.f32 %v1588_v25, %v4533_v55 }
 0xa16   :  { %v1526_v5 = vpop.xlane.xlu0 %1525 }
 0xa17   :  { %v1538_v32 = vmul.f32 %v1526_v5, %v3847_v62  ;;  %v1643_v48 = vmul.f32 %v4573_v60, %v1632_v49 }
 0xa19   :  { %v3444_v0 = vpop.eup %3443  ;;  %v1546_v28 = vadd.f32 1e-12, %v1538_v32  ;;  %v4605_v54 = vadd.f32 %v4579_v10, %v1643_v48 }
 0xa1a   :  { %v1590_v2 = vmul.f32 %v3444_v0, %v1545_v23  ;;  %vm1596_vm14 = vweird.f32 %v3444_v0 }
 0xa1b   :  { %3445 = vrsqrt.f32 %v1546_v28  ;;  %v1678_v55 = vpack.c.bf16 %v4605_v54, %v4602_v20  ;;  %vm1597_vm1 = vmor %vm1595_vm15, %vm1596_vm14  ;;  %vm1605_vm3 = vweird.f32 %v1546_v28 }
 0xa1c   :  { %v1591_v58 = vmul.f32 %v3444_v0, %v1590_v2 }
 0xa1d   :  { %3170 = vmatmul.msk.bf16.gmra.mxu3 %vm170_vm0, %v1678_v55 }
 0xa1e   :  { %v1592_v37 = vmul.f32 0.5, %v1591_v58 }
 0xa20   :  { %v1593_v53 = vsub.f32 1.5, %v1592_v37 }
 0xa21   :  { %v3446_v34 = vpop.eup %3445 }
 0xa22   :  { %v1594_v38 = vmul.f32 %v3444_v0, %v1593_v53  ;;  %v1600_v18 = vmul.f32 %v3446_v34, %v1546_v28  ;;  %vm1606_vm2 = vweird.f32 %v3446_v34 }
 0xa23   :  { %vm1607_vm4 = vmor %vm1605_vm3, %vm1606_vm2 }
 0xa24   :  { %v1601_v27 = vmul.f32 %v3446_v34, %v1600_v18  ;;  %v1598_v42 = vsel %vm1597_vm1, %v3444_v0, %v1594_v38 }
 0xa25   :  { %v1633_v14 = vmul.f32 %v1598_v42, %v4539_v16 }
 0xa26   :  { %v1602_v15 = vmul.f32 0.5, %v1601_v27 }
 0xa27   :  { %v1644_v4 = vmul.f32 %v4573_v60, %v1633_v14 }
 0xa28   :  { %v1603_v29 = vsub.f32 1.5, %v1602_v15 }
 0xa29   :  { %v4615_v12 = vadd.f32 %v4579_v10, %v1644_v4 }
 0xa2a   :  { %v1604_v45 = vmul.f32 %v3446_v34, %v1603_v29 }
 0xa2c   :  { %v1608_v47 = vsel %vm1607_vm4, %v3446_v34, %v1604_v45 }
 0xa2d   :  { %v1634_v19 = vmul.f32 %v1608_v47, %v4545_v51 }
 0xa2f   :  { %v1645_v24 = vmul.f32 %v4573_v60, %v1634_v19 }
 0xa31   :  { %v4618_v44 = vadd.f32 %v4579_v10, %v1645_v24 }
 0xa33   :  { %v1679_v9 = vpack.c.bf16 %v4618_v44, %v4615_v12 }
 0xa35   :  { %3171 = vmatmul.msk.bf16.gmra.mxu3 %vm170_vm0, %v1679_v9 }
 0xa4b   :  { %v1529_v16 = vpop.xlane.xlu1 %1528 }
 0xa4c   :  { %v1539_v50 = vmul.f32 %v1529_v16, %v3847_v62 }
 0xa4e   :  { %v1547_v36 = vadd.f32 1e-12, %v1539_v50 }
 0xa50   :  { %3447 = vrsqrt.f32 %v1547_v36  ;;  %vm1615_vm6 = vweird.f32 %v1547_v36 }
 0xa53   :  { %v1532_v51 = vpop.xlane.xlu2 %1531 }
 0xa54   :  { %v1540_v3 = vmul.f32 %v1532_v51, %v3847_v62 }
 0xa56   :  { %v3448_v59 = vpop.eup %3447  ;;  %v1548_v56 = vadd.f32 1e-12, %v1540_v3 }
 0xa57   :  { %v1610_v35 = vmul.f32 %v3448_v59, %v1547_v36  ;;  %vm1616_vm5 = vweird.f32 %v3448_v59 }
 0xa58   :  { %3449 = vrsqrt.f32 %v1548_v56  ;;  %vm1617_vm7 = vmor %vm1615_vm6, %vm1616_vm5  ;;  %vm1625_vm9 = vweird.f32 %v1548_v56 }
 0xa59   :  { %v1611_v40 = vmul.f32 %v3448_v59, %v1610_v35 }
 0xa5b   :  { %v1612_v1 = vmul.f32 0.5, %v1611_v40 }
 0xa5d   :  { %v1613_v6 = vsub.f32 1.5, %v1612_v1 }
 0xa5e   :  { %v3450_v31 = vpop.eup %3449 }
 0xa5f   :  { %v1614_v39 = vmul.f32 %v3448_v59, %v1613_v6  ;;  %v1620_v8 = vmul.f32 %v3450_v31, %v1548_v56  ;;  %vm1626_vm8 = vweird.f32 %v3450_v31 }
 0xa60   :  { %vm1627_vm10 = vmor %vm1625_vm9, %vm1626_vm8 }
 0xa61   :  { %v1621_v7 = vmul.f32 %v3450_v31, %v1620_v8  ;;  %v1618_v11 = vsel %vm1617_vm7, %v3448_v59, %v1614_v39 }
 0xa62   :  { %v1635_v22 = vmul.f32 %v1618_v11, %v4558_v61 }
 0xa63   :  { %v1622_v26 = vmul.f32 0.5, %v1621_v7 }
 0xa64   :  { %v1646_v52 = vmul.f32 %v4573_v60, %v1635_v22 }
 0xa65   :  { %v1623_v13 = vsub.f32 1.5, %v1622_v26 }
 0xa66   :  { %v4630_v23 = vadd.f32 %v4579_v10, %v1646_v52 }
 0xa67   :  { %v1624_v41 = vmul.f32 %v3450_v31, %v1623_v13 }
 0xa69   :  { %v1628_v63 = vsel %vm1627_vm10, %v3450_v31, %v1624_v41  ;;  %v3563_v41 = vld [vmem:[%s5349_s24 + $0x8] sm:$0xff] }
 0xa6a   :  { %v1636_v33 = vmul.f32 %v1628_v63, %v4565_v43  ;;  %v3313_v43 = vld [vmem:[%s5311_s7 + $0x1] ss:$0 sm:$0xff] }
 0xa6c   :  { %v1647_v21 = vmul.f32 %v4573_v60, %v1636_v33 }
 0xa6e   :  { %v4633_v46 = vadd.f32 %v4579_v10, %v1647_v21 }
 0xa70   :  { %v1680_v25 = vpack.c.bf16 %v4633_v46, %v4630_v23 }
 0xa72   :  { %3172 = vmatmul.msk.bf16.gmra.mxu3 %vm170_vm0, %v1680_v25 }
 0xa7a   :  { %v1724_v61 = vpop.f32.mrf.mxu3 }
 0xa7b   :  { %v1725_v37 = vadd.f32 %v3313_v43, %v1724_v61  ;;  %v3564_v61 = vld [vmem:[%s5349_s24] sm:$0xff] }
 0xa82   :  { %v1726_v49 = vpop.f32.mrf.mxu3 }
 0xa83   :  { %v1727_v58 = vadd.f32 %v3313_v43, %v1726_v49 }
 0xa85   :  { %v4651_v53 = vpack.c.bf16 %v1727_v58, %v1725_v37 }
 0xaa0   :  { %v1729_v30 = vpop.f32.mrf.mxu3 }
 0xaa1   :  { %v1730_v60 = vadd.f32 %v3313_v43, %v1729_v30 }
 0xaa8   :  { %v1731_v5 = vpop.f32.mrf.mxu3 }
 0xaa9   :  { %v1732_v32 = vadd.f32 %v3313_v43, %v1731_v5 }
 0xaab   :  { %v4641_v48 = vpack.c.bf16 %v1732_v32, %v1730_v60 }
 0xaad   :  { %1992 = vrot.lane.b32.xlu2 %v4641_v48, %s3614_s1 }
 0xab8   :  { %v1734_v10 = vpop.f32.mrf.mxu3 }
 0xab9   :  { %v1735_v28 = vadd.f32 %v3313_v43, %v1734_v10 }
 0xac0   :  { %v1736_v0 = vpop.f32.mrf.mxu3 }
 0xac1   :  { %v1737_v2 = vadd.f32 %v3313_v43, %v1736_v0 }
 0xac3   :  { %v4645_v55 = vpack.c.bf16 %v1737_v2, %v1735_v28 }
 0xac5   :  { %1994 = vrot.lane.b32.xlu1 %v4645_v55, %s3614_s1 }
 0xacd   :  { %1756 = vrot.lane.b32.xlu1 %v4645_v55, %s3613_s0 }
 0xad5   :  { %1752 = vrot.lane.b32.xlu1 %v4651_v53, %s3613_s0 }
 0xadd   :  { %2159 = vrot.lane.b32.xlu1 %v4651_v53, %s3617_s2 }
 0xaf5   :  { %v1739_v34 = vpop.f32.mrf.mxu3 }
 0xaf6   :  { %v1740_v18 = vadd.f32 %v3313_v43, %v1739_v34 }
 0xafd   :  { %v1741_v38 = vpop.f32.mrf.mxu3 }
 0xafe   :  { %v1742_v27 = vadd.f32 %v3313_v43, %v1741_v38 }
 0xb00   :  { %v1747_v42 = vpack.c.bf16 %v1742_v27, %v1740_v18  ;;  %v3565_v18 = vld [vmem:[%s5349_s24 + $0x10] sm:$0xff] }
 0xb02   :  { %1758 = vrot.lane.b32.xlu2 %v1747_v42, %s3613_s0  ;;  %1996 = vrot.lane.b32.xlu0 %v1747_v42, %s3614_s1 }
 0xb07   :  { %v1993_v15 = vpop.permute.xlu2 %1992 }
 0xb08   :  { %v2014_v6 = vsel %vm457_vm11, %v1993_v15, 0 }
 0xb0a   :  { %1754 = vrot.lane.b32.xlu2 %v4641_v48, %s3613_s0  ;;  %1990 = vrot.lane.b32.xlu0 %v4651_v53, %s3614_s1 }
 0xb12   :  { %1988 = vrot.lane.b32.xlu2 %v1747_v42, %s3615_s5  ;;  %1982 = vrot.lane.b32.xlu0 %v4651_v53, %s3615_s5 }
 0xb1a   :  { %2161 = vrot.lane.b32.xlu2 %v4641_v48, %s3617_s2  ;;  %1984 = vrot.lane.b32.xlu0 %v4641_v48, %s3615_s5 }
 0xb22   :  { %2165 = vrot.lane.b32.xlu2 %v1747_v42, %s3617_s2  ;;  %1986 = vrot.lane.b32.xlu0 %v4645_v55, %s3615_s5  ;;  %s5198_s5 = sld [smem:[#allocation4]] }
 0xb2a   :  { %1927 = vrot.lane.b32.xlu2 %v1747_v42, %s3616_s6  ;;  %2163 = vrot.lane.b32.xlu0 %v4645_v55, %s3617_s2 }
 0xb37   :  { %v1995_v29 = vpop.permute.xlu1 %1994 }
 0xb38   :  { %v2017_v35 = vsel %vm457_vm11, %v1995_v29, 0 }
 0xb3f   :  { %v1757_v47 = vpop.permute.xlu1 %1756 }
 0xb40   :  { %v1779_v4 = vsel %vm457_vm11, %v1757_v47, 0 }
 0xb47   :  { %v1753_v16 = vpop.permute.xlu1 %1752 }
 0xb48   :  { %v1773_v51 = vsel %vm457_vm11, %v1753_v16, 0 }
 0xb4f   :  { %v2160_v11 = vpop.permute.xlu1 %2159 }
 0xb5c   :  { %v1759_v14 = vpop.permute.xlu2 %1758 }
 0xb5d   :  { %v1782_v45 = vsel %vm457_vm11, %v1759_v14, 0 }
 0xb5e   :  { %1788 = vmatpush.bf16.xpose.msra.mxu0 %v1782_v45 }
 0xb64   :  { %v1755_v19 = vpop.permute.xlu2 %1754 }
 0xb65   :  { %v1776_v9 = vsel %vm457_vm11, %v1755_v19, 0  ;;  %v3566_v19 = vld [vmem:[%s5349_s24 + $0x18] sm:$0xff] }
 0xb66   :  { %1789 = vmatpush.bf16.xpose.msra.mxu0 %v1779_v4 }
 0xb6c   :  { %v1989_v24 = vpop.permute.xlu2 %1988 }
 0xb6e   :  { %1790 = vmatpush.bf16.xpose.msra.mxu0 %v1776_v9 }
 0xb74   :  { %v1997_v50 = vpop.permute.xlu0 %1996  ;;  %v2162_v36 = vpop.permute.xlu2 %2161 }
 0xb75   :  { %v2020_v3 = vsel %vm457_vm11, %v1997_v50, 0 }
 0xb76   :  { %1791 = vmatpush.bf16.xpose.msra.mxu0 %v1773_v51  ;;  %2026 = vmatpush.bf16.xpose.msrb.mxu1 %v2020_v3  ;;  %v3567_v3 = vld [vmem:[%s5349_s24 + $0x20] sm:$0xff] }
 0xb7c   :  { %v1991_v59 = vpop.permute.xlu0 %1990  ;;  %v2166_v56 = vpop.permute.xlu2 %2165 }
 0xb7d   :  { %3173 = vmatmul.msk.bf16.vlgmr.msra.gmra.mxu0 %vm457_vm11, %v4651_v53  ;;  %2187 = vmatpush.bf16.msrb.mxu3 %v2166_v56  ;;  %v2011_v39 = vsel %vm457_vm11, %v1991_v59, 0 }
 0xb7e   :  { %2027 = vmatpush.bf16.xpose.msrb.mxu1 %v2017_v35 }
 0xb84   :  { %v1983_v40 = vpop.permute.xlu0 %1982  ;;  %v1928_v1 = vpop.permute.xlu2 %1927 }
 0xb85   :  { %1949 = vmatpush.bf16.msrb.mxu2 %v1928_v1 }
 0xb86   :  { %2028 = vmatpush.bf16.xpose.msrb.mxu1 %v2014_v6 }
 0xb8c   :  { %v1985_v31 = vpop.permute.xlu0 %1984 }
 0xb8d   :  { %3174 = vmatmul.msk.bf16.gmra.mxu0 %vm457_vm11, %v4641_v48 }
 0xb8e   :  { %2029 = vmatpush.bf16.xpose.msrb.mxu1 %v2011_v39 }
 0xb94   :  { %v1987_v8 = vpop.permute.xlu0 %1986 }
 0xb95   :  { %3181 = vmatmul.msk.bf16.vlgmr.msrb.gmra.mxu1 %vm457_vm11, %v1983_v40 }
 0xb9c   :  { %v2164_v7 = vpop.permute.xlu0 %2163 }
 0xb9d   :  { %3175 = vmatmul.msk.bf16.gmra.mxu0 %vm457_vm11, %v4645_v55  ;;  %2188 = vmatpush.bf16.msrb.mxu3 %v2164_v7 }
 0xba1   :  { %2189 = vmatpush.bf16.msrb.mxu3 %v2162_v36 }
 0xba5   :  { %3182 = vmatmul.msk.bf16.gmra.mxu1 %vm457_vm11, %v1985_v31  ;;  %2190 = vmatpush.bf16.msrb.mxu3 %v2160_v11  ;;  %v3569_v11 = vld [vmem:[%s5349_s24 + $0x28] sm:$0xff] }
 0xbad   :  { %3176 = vmatmul.msk.bf16.gmra.mxu0 %vm457_vm11, %v1747_v42 }
 0xbb5   :  { %3183 = vmatmul.msk.bf16.gmra.mxu1 %vm457_vm11, %v1987_v8  ;;  %v3568_v8 = vld [vmem:[%s5349_s24 + $0x30] sm:$0xff] }
 0xbc5   :  { %3184 = vmatmul.msk.bf16.gmra.mxu1 %vm457_vm11, %v1989_v24 }
 0xbfa   :  { %v1793_v26 = vpop.f32.mrf.mxu0 }
 0xbfb   :  { %v1813_v30 = vmul.f32 0.25, %v1793_v26 }
 0xbfd   :  { %v4709_v10 = vadd.f32 %v3564_v61, %v1813_v30 }
 0xbff   :  { %v1829_v58 = vsel %vm527_vm12, %v4709_v10, -inf }
 0xc02   :  { %v1795_v13 = vpop.f32.mrf.mxu0 }
 0xc03   :  { %v1814_v22 = vmul.f32 0.25, %v1795_v13 }
 0xc05   :  { %v4698_v63 = vadd.f32 %v3563_v41, %v1814_v22 }
 0xc07   :  { %v1832_v33 = vsel %vm527_vm12, %v4698_v63, -inf }
 0xc08   :  { %1833 = vmax.xlane.f32.xlu2 %v1832_v33 }
 0xc0a   :  { %v1798_v52 = vpop.f32.mrf.mxu0 }
 0xc0b   :  { %v1815_v28 = vmul.f32 0.25, %v1798_v52 }
 0xc0d   :  { %v4720_v27 = vadd.f32 %v3565_v18, %v1815_v28 }
 0xc0f   :  { %v1835_v29 = vsel %vm527_vm12, %v4720_v27, -inf }
 0xc12   :  { %v2031_v21 = vpop.f32.mrf.mxu1  ;;  %v1800_v43 = vpop.f32.mrf.mxu0 }
 0xc13   :  { %v2051_v25 = vmul.f32 0.25, %v2031_v21  ;;  %v1816_v24 = vmul.f32 0.25, %v1800_v43 }
 0xc15   :  { %v4705_v49 = vadd.f32 %v3564_v61, %v2051_v25  ;;  %v4735_v36 = vadd.f32 %v3566_v19, %v1816_v24 }
 0xc17   :  { %v2067_v5 = vsel %vm527_vm12, %v4705_v49, -inf  ;;  %v1838_v40 = vsel %vm527_vm12, %v4735_v36, -inf }
 0xc18   :  { %2068 = vmax.xlane.f32.xlu1 %v2067_v5 }
 0xc1a   :  { %v2033_v60 = vpop.f32.mrf.mxu1  ;;  %v1803_v37 = vpop.f32.mrf.mxu0 }
 0xc1b   :  { %v2052_v32 = vmul.f32 0.25, %v2033_v60  ;;  %v1817_v56 = vmul.f32 0.25, %v1803_v37 }
 0xc1d   :  { %v4711_v0 = vadd.f32 %v3563_v41, %v2052_v32  ;;  %v4746_v39 = vadd.f32 %v3567_v3, %v1817_v56  ;;  %v3570_v32 = vld [vmem:[%s5349_s24 + $0x38] sm:$0xff] }
 0xc1f   :  { %v2070_v2 = vsel %vm527_vm12, %v4711_v0, -inf  ;;  %v1841_v41 = vsel %vm527_vm12, %v4746_v39, -inf }
 0xc20   :  { %2071 = vmax.xlane.f32.xlu0 %v2070_v2  ;;  %1830 = vmax.xlane.f32.xlu1 %v1829_v58 }
 0xc22   :  { %v2036_v34 = vpop.f32.mrf.mxu1  ;;  %v1805_v45 = vpop.f32.mrf.mxu0 }
 0xc23   :  { %v2053_v38 = vmul.f32 0.25, %v2036_v34  ;;  %v1818_v13 = vmul.f32 0.25, %v1805_v45 }
 0xc25   :  { %v4722_v42 = vadd.f32 %v3565_v18, %v2053_v38  ;;  %v4764_v21 = vadd.f32 %v3569_v11, %v1818_v13 }
 0xc27   :  { %v2073_v15 = vsel %vm527_vm12, %v4722_v42, -inf  ;;  %v1844_v61 = vsel %vm527_vm12, %v4764_v21, -inf }
 0xc28   :  { %2074 = vmax.xlane.f32.xlu2 %v2073_v15  ;;  %1836 = vmax.xlane.f32.xlu1 %v1835_v29 }
 0xc2a   :  { %v2038_v14 = vpop.f32.mrf.mxu1  ;;  %v1808_v51 = vpop.f32.mrf.mxu0 }
 0xc2b   :  { %v2054_v47 = vmul.f32 0.25, %v2038_v14  ;;  %v1819_v1 = vmul.f32 0.25, %v1808_v51 }
 0xc2d   :  { %v4731_v4 = vadd.f32 %v3566_v19, %v2054_v47  ;;  %v4751_v7 = vadd.f32 %v3568_v8, %v1819_v1 }
 0xc2f   :  { %v2076_v9 = vsel %vm527_vm12, %v4731_v4, -inf  ;;  %v1847_v33 = vsel %vm527_vm12, %v4751_v7, -inf }
 0xc30   :  { %2077 = vmax.xlane.f32.xlu1 %v2076_v9 }
 0xc32   :  { %v2041_v16 = vpop.f32.mrf.mxu1  ;;  %v1810_v60 = vpop.f32.mrf.mxu0 }
 0xc33   :  { %v2055_v50 = vmul.f32 0.25, %v2041_v16  ;;  %v1820_v2 = vmul.f32 0.25, %v1810_v60 }
 0xc35   :  { %v4740_v59 = vadd.f32 %v3567_v3, %v2055_v50  ;;  %v4779_v34 = vadd.f32 %v3570_v32, %v1820_v2 }
 0xc37   :  { %v2079_v35 = vsel %vm527_vm12, %v4740_v59, -inf  ;;  %v1850_v38 = vsel %vm527_vm12, %v4779_v34, -inf }
 0xc38   :  { %2080 = vmax.xlane.f32.xlu2 %v2079_v35  ;;  %1839 = vmax.xlane.f32.xlu1 %v1838_v40 }
 0xc3a   :  { %v2043_v6 = vpop.f32.mrf.mxu1 }
 0xc3b   :  { %v2056_v31 = vmul.f32 0.25, %v2043_v6 }
 0xc3d   :  { %v4756_v26 = vadd.f32 %v3569_v11, %v2056_v31 }
 0xc3f   :  { %v2082_v22 = vsel %vm527_vm12, %v4756_v26, -inf }
 0xc40   :  { %2083 = vmax.xlane.f32.xlu0 %v2082_v22  ;;  %1842 = vmax.xlane.f32.xlu1 %v1841_v41 }
 0xc41   :  { %1848 = vmax.xlane.f32.xlu2 %v1847_v33 }
 0xc42   :  { %v2046_v52 = vpop.f32.mrf.mxu1 }
 0xc43   :  { %v2057_v25 = vmul.f32 0.25, %v2046_v52 }
 0xc45   :  { %v4768_v5 = vadd.f32 %v3568_v8, %v2057_v25 }
 0xc47   :  { %v2085_v58 = vsel %vm527_vm12, %v4768_v5, -inf }
 0xc48   :  { %1845 = vmax.xlane.f32.xlu0 %v1844_v61 }
 0xc4a   :  { %v2048_v30 = vpop.f32.mrf.mxu1 }
 0xc4b   :  { %v2058_v43 = vmul.f32 0.25, %v2048_v30 }
 0xc4d   :  { %v4773_v28 = vadd.f32 %v3570_v32, %v2058_v43 }
 0xc4f   :  { %v2088_v37 = vsel %vm527_vm12, %v4773_v28, -inf }
 0xc50   :  { %2086 = vmax.xlane.f32.xlu0 %v2085_v58  ;;  %2089 = vmax.xlane.f32.xlu1 %v2088_v37 }
 0xc58   :  { %1851 = vmax.xlane.f32.xlu0 %v1850_v38 }
 0xc7b   :  { %v1834_v18 = vpop.xlane.xlu2 %1833 }
 0xc7c   :  { %v1854_v14 = vsub.f32 %v4698_v63, %v1834_v18 }
 0xc7e   :  { %v1863_v47 = vmul.f32 1.442695, %v1854_v14 }
 0xc8b   :  { %v2069_v15 = vpop.xlane.xlu1 %2068 }
 0xc8c   :  { %v2091_v29 = vsub.f32 %v4705_v49, %v2069_v15 }
 0xc8e   :  { %v2099_v45 = vmul.f32 1.442695, %v2091_v29 }
 0xc90   :  { %3451 = vpow2.f32 %v2099_v45 }
 0xc91   :  { %3453 = vpow2.f32 %v1863_v47 }
 0xc93   :  { %v1831_v19 = vpop.xlane.xlu1 %1830  ;;  %v2072_v24 = vpop.xlane.xlu0 %2071 }
 0xc94   :  { %v1853_v9 = vsub.f32 %v4709_v10, %v1831_v19  ;;  %v2092_v51 = vsub.f32 %v4711_v0, %v2072_v24 }
 0xc96   :  { %v4786_v16 = vpop.eup %3451  ;;  %v1861_v50 = vmul.f32 1.442695, %v1853_v9  ;;  %v2101_v49 = vmul.f32 1.442695, %v2092_v51 }
 0xc97   :  { %v2115_v3 = vsel %vm527_vm12, %v4786_v16, 0.0  ;;  %v4791_v35 = vpop.eup %3453 }
 0xc98   :  { %2116 = vadd.xlane.f32.xlu0 %v2115_v3  ;;  %3455 = vpow2.f32 %v1861_v50  ;;  %v1880_v6 = vsel %vm527_vm12, %v4791_v35, 0.0 }
 0xc99   :  { %3457 = vpow2.f32 %v2101_v49 }
 0xc9b   :  { %v1837_v63 = vpop.xlane.xlu1 %1836  ;;  %v2075_v56 = vpop.xlane.xlu2 %2074 }
 0xc9c   :  { %v2093_v40 = vsub.f32 %v4722_v42, %v2075_v56  ;;  %v1855_v37 = vsub.f32 %v4720_v27, %v1837_v63 }
 0xc9e   :  { %v2103_v1 = vmul.f32 1.442695, %v2093_v40  ;;  %v4794_v10 = vpop.eup %3455  ;;  %v1865_v18 = vmul.f32 1.442695, %v1855_v37 }
 0xc9f   :  { %v1877_v0 = vsel %vm527_vm12, %v4794_v10, 0.0  ;;  %v4801_v11 = vpop.eup %3457 }
 0xca0   :  { %1881 = vadd.xlane.f32.xlu0 %v1880_v6  ;;  %3459 = vpow2.f32 %v2103_v1  ;;  %1878 = vadd.xlane.f32.xlu1 %v1877_v0  ;;  %v2118_v22 = vsel %vm527_vm12, %v4801_v11, 0.0 }
 0xca3   :  { %v2078_v31 = vpop.xlane.xlu1 %2077 }
 0xca4   :  { %v2094_v8 = vsub.f32 %v4731_v4, %v2078_v31 }
 0xca6   :  { %v2105_v13 = vmul.f32 1.442695, %v2094_v8  ;;  %v4803_v42 = vpop.eup %3459 }
 0xca7   :  { %v2121_v41 = vsel %vm527_vm12, %v4803_v42, 0.0 }
 0xca8   :  { %3461 = vpow2.f32 %v2105_v13  ;;  %2119 = vadd.xlane.f32.xlu1 %v2118_v22  ;;  %2122 = vadd.xlane.f32.xlu0 %v2121_v41 }
 0xcab   :  { %v2081_v33 = vpop.xlane.xlu2 %2080 }
 0xcac   :  { %v2095_v52 = vsub.f32 %v4740_v59, %v2081_v33 }
 0xcae   :  { %v4810_v25 = vpop.eup %3461  ;;  %v2107_v4 = vmul.f32 1.442695, %v2095_v52 }
 0xcaf   :  { %v2124_v61 = vsel %vm527_vm12, %v4810_v25, 0.0 }
 0xcb0   :  { %2125 = vadd.xlane.f32.xlu2 %v2124_v61  ;;  %3463 = vpow2.f32 %v2107_v4 }
 0xcb3   :  { %v2084_v30 = vpop.xlane.xlu0 %2083 }
 0xcb4   :  { %v2096_v43 = vsub.f32 %v4756_v26, %v2084_v30  ;;  %v1840_v26 = vpop.xlane.xlu1 %1839  ;;  %v1849_v3 = vpop.xlane.xlu2 %1848 }
 0xcb5   :  { %v1856_v9 = vsub.f32 %v4735_v36, %v1840_v26  ;;  %v1859_v63 = vsub.f32 %v4751_v7, %v1849_v3 }
 0xcb6   :  { %v2109_v60 = vmul.f32 1.442695, %v2096_v43  ;;  %v4815_v32 = vpop.eup %3463 }
 0xcb7   :  { %v2127_v2 = vsel %vm527_vm12, %v4815_v32, 0.0  ;;  %v1867_v51 = vmul.f32 1.442695, %v1856_v9  ;;  %v1873_v1 = vmul.f32 1.442695, %v1859_v63 }
 0xcb8   :  { %3465 = vpow2.f32 %v2109_v60  ;;  %2128 = vadd.xlane.f32.xlu2 %v2127_v2 }
 0xcb9   :  { %3467 = vpow2.f32 %v1865_v18 }
 0xcbb   :  { %v1846_v38 = vpop.xlane.xlu0 %1845 }
 0xcbc   :  { %v1843_v15 = vpop.xlane.xlu1 %1842  ;;  %v1858_v29 = vsub.f32 %v4764_v21, %v1846_v38 }
 0xcbe   :  { %v4819_v59 = vpop.eup %3465  ;;  %v1871_v45 = vmul.f32 1.442695, %v1858_v29 }
 0xcbf   :  { %v2130_v58 = vsel %vm527_vm12, %v4819_v59, 0.0  ;;  %v4831_v47 = vpop.eup %3467 }
 0xcc0   :  { %2131 = vadd.xlane.f32.xlu0 %v2130_v58  ;;  %3469 = vpow2.f32 %v1871_v45 }
 0xcc1   :  { %1925 = vrot.lane.b32.xlu1 %v4645_v55, %s3616_s6 }
 0xcc3   :  { %v2087_v14 = vpop.xlane.xlu0 %2086 }
 0xcc4   :  { %v2097_v55 = vsub.f32 %v4768_v5, %v2087_v14  ;;  %v2090_v19 = vpop.xlane.xlu1 %2089  ;;  %v1857_v5 = vsub.f32 %v4746_v39, %v1843_v15 }
 0xcc5   :  { %v2098_v27 = vsub.f32 %v4773_v28, %v2090_v19 }
 0xcc6   :  { %v4837_v24 = vpop.eup %3469  ;;  %v1869_v28 = vmul.f32 1.442695, %v1857_v5 }
 0xcc7   :  { %v2113_v21 = vmul.f32 1.442695, %v2098_v27  ;;  %v1892_v50 = vsel %vm527_vm12, %v4837_v24, 0.0 }
 0xccb   :  { %v1852_v56 = vpop.xlane.xlu0 %1851 }
 0xccc   :  { %v1860_v39 = vsub.f32 %v4779_v34, %v1852_v56 }
 0xcce   :  { %v1875_v31 = vmul.f32 1.442695, %v1860_v39 }
 0xcd0   :  { %1921 = vrot.lane.b32.xlu2 %v4651_v53, %s3616_s6  ;;  %v2111_v53 = vmul.f32 1.442695, %v2097_v55 }
 0xcd2   :  { %3471 = vpow2.f32 %v2111_v53 }
 0xcd3   :  { %3473 = vpow2.f32 %v2113_v21 }
 0xcd4   :  { %1923 = vrot.lane.b32.xlu0 %v4641_v48, %s3616_s6  ;;  %v1883_v48 = vsel %vm527_vm12, %v4831_v47, 0.0  ;;  %3475 = vpow2.f32 %v1867_v51 }
 0xcd5   :  { %3477 = vpow2.f32 %v1869_v28 }
 0xcd6   :  { %3479 = vpow2.f32 %v1873_v1 }
 0xcd7   :  { %3481 = vpow2.f32 %v1875_v31 }
 0xcd8   :  { %v4843_v49 = vpop.eup %3471 }
 0xcd9   :  { %v2133_v36 = vsel %vm527_vm12, %v4843_v49, 0.0  ;;  %v4848_v40 = vpop.eup %3473 }
 0xcda   :  { %v2136_v6 = vsel %vm527_vm12, %v4848_v40, 0.0  ;;  %v4853_v0 = vpop.eup %3475 }
 0xcdb   :  { %v1886_v7 = vsel %vm527_vm12, %v4853_v0, 0.0  ;;  %v4857_v8 = vpop.eup %3477 }
 0xcdc   :  { %v1889_v13 = vsel %vm527_vm12, %v4857_v8, 0.0  ;;  %v4861_v22 = vpop.eup %3479 }
 0xcdd   :  { %v1895_v34 = vsel %vm527_vm12, %v4861_v22, 0.0  ;;  %v4865_v41 = vpop.eup %3481 }
 0xcde   :  { %v1898_v33 = vsel %vm527_vm12, %v4865_v41, 0.0 }
 0xceb   :  { %1884 = vadd.xlane.f32.xlu1 %v1883_v48 }
 0xcf3   :  { %1893 = vadd.xlane.f32.xlu1 %v1892_v50 }
 0xcf9   :  { %2134 = vadd.xlane.f32.xlu2 %v2133_v36 }
 0xcfe   :  { %2137 = vadd.xlane.f32.xlu0 %v2136_v6 }
 0xd01   :  { %1887 = vadd.xlane.f32.xlu2 %v1886_v7 }
 0xd06   :  { %1890 = vadd.xlane.f32.xlu0 %v1889_v13 }
 0xd09   :  { %1896 = vadd.xlane.f32.xlu2 %v1895_v34 }
 0xd0b   :  { %v2117_v52 = vpop.xlane.xlu0 %2116 }
 0xd0c   :  { %3483 = vrcp.f32 %v2117_v52 }
 0xd0e   :  { %1899 = vadd.xlane.f32.xlu0 %v1898_v33 }
 0xd12   :  { %v3484_v43 = vpop.eup %3483 }
 0xd13   :  { %v1879_v4 = vpop.xlane.xlu1 %1878  ;;  %v1882_v30 = vpop.xlane.xlu0 %1881  ;;  %v2147_v2 = vmul.f32 %v3484_v43, %v4786_v16 }
 0xd1b   :  { %v2120_v61 = vpop.xlane.xlu1 %2119  ;;  %v2123_v38 = vpop.xlane.xlu0 %2122 }
 0xd1c   :  { %3485 = vrcp.f32 %v2120_v61 }
 0xd22   :  { %v3486_v60 = vpop.eup %3485 }
 0xd23   :  { %v2148_v58 = vmul.f32 %v3486_v60, %v4801_v11  ;;  %v2126_v37 = vpop.xlane.xlu2 %2125 }
 0xd24   :  { %3487 = vrcp.f32 %v2126_v37 }
 0xd25   :  { %v2155_v26 = vpack.c.bf16 %v2148_v58, %v2147_v2  ;;  %3489 = vrcp.f32 %v2123_v38 }
 0xd27   :  { %3185 = vmatmul.msk.bf16.vlgmr.msrb.gmra.mxu3 %vm527_vm12, %v2155_v26 }
 0xd2a   :  { %v3488_v18 = vpop.eup %3487 }
 0xd2b   :  { %v3490_v15 = vpop.eup %3489  ;;  %v2150_v29 = vmul.f32 %v3488_v18, %v4810_v25  ;;  %v2129_v16 = vpop.xlane.xlu2 %2128 }
 0xd2c   :  { %v2149_v14 = vmul.f32 %v3490_v15, %v4803_v42  ;;  %v3281_v15 = vld [vmem:[%s5312_s8 + $0x18] sm:$0xff] }
 0xd2d   :  { %2304 = vmatpush.bf16.msrb.mxu0 %v3281_v15 }
 0xd2e   :  { %v2156_v19 = vpack.c.bf16 %v2150_v29, %v2149_v14 }
 0xd33   :  { %v1926_v45 = vpop.permute.xlu1 %1925  ;;  %v2132_v55 = vpop.xlane.xlu0 %2131 }
 0xd34   :  { %1950 = vmatpush.bf16.msrb.mxu2 %v1926_v45  ;;  %3491 = vrcp.f32 %v2132_v55  ;;  %v1922_v5 = vpop.permute.xlu2 %1921  ;;  %v3280_v45 = vld [vmem:[%s5312_s8 + $0x10] sm:$0xff]  ;;  %s5204_s8 = sld [smem:[#allocation4 + $0x1]] }
 0xd35   :  { %3493 = vrcp.f32 %v2129_v16  ;;  %2305 = vmatpush.bf16.msrb.mxu0 %v3280_v45 }
 0xd36   :  { %3495 = vrcp.f32 %v1882_v30 }
 0xd37   :  { %3186 = vmatmul.msk.bf16.gmra.mxu3 %vm527_vm12, %v2156_v19  ;;  %3497 = vrcp.f32 %v1879_v4 }
 0xd3a   :  { %v3492_v11 = vpop.eup %3491 }
 0xd3b   :  { %v3494_v48 = vpop.eup %3493  ;;  %v2152_v53 = vmul.f32 %v3492_v11, %v4819_v59 }
 0xd3c   :  { %v3496_v27 = vpop.eup %3495  ;;  %v2151_v25 = vmul.f32 %v3494_v48, %v4815_v32 }
 0xd3d   :  { %v3498_v9 = vpop.eup %3497  ;;  %v1910_v51 = vmul.f32 %v3496_v27, %v4791_v35 }
 0xd3e   :  { %v2157_v21 = vpack.c.bf16 %v2152_v53, %v2151_v25  ;;  %v1909_v50 = vmul.f32 %v3498_v9, %v4794_v10 }
 0xd40   :  { %v1917_v3 = vpack.c.bf16 %v1910_v51, %v1909_v50 }
 0xd46   :  { %v1924_v42 = vpop.permute.xlu0 %1923 }
 0xd47   :  { %1951 = vmatpush.bf16.msrb.mxu2 %v1924_v42  ;;  %3187 = vmatmul.msk.bf16.gmra.mxu3 %vm527_vm12, %v2157_v21 }
 0xd4b   :  { %1952 = vmatpush.bf16.msrb.mxu2 %v1922_v5 }
 0xd4e   :  { %3177 = vmatmul.msk.bf16.vlgmr.msrb.gmra.mxu2 %vm527_vm12, %v1917_v3 }
 0xd5e   :  { %v1885_v59 = vpop.xlane.xlu1 %1884 }
 0xd66   :  { %v1894_v33 = vpop.xlane.xlu1 %1893 }
 0xd6c   :  { %v2135_v28 = vpop.xlane.xlu2 %2134 }
 0xd6d   :  { %3499 = vrcp.f32 %v2135_v28 }
 0xd71   :  { %v2138_v63 = vpop.xlane.xlu0 %2137 }
 0xd72   :  { %3501 = vrcp.f32 %v2138_v63 }
 0xd73   :  { %3503 = vrcp.f32 %v1885_v59  ;;  %v3500_v56 = vpop.eup %3499 }
 0xd74   :  { %v1888_v32 = vpop.xlane.xlu2 %1887  ;;  %v2153_v10 = vmul.f32 %v3500_v56, %v4843_v49 }
 0xd75   :  { %3505 = vrcp.f32 %v1888_v32 }
 0xd78   :  { %v3502_v36 = vpop.eup %3501 }
 0xd79   :  { %v2154_v35 = vmul.f32 %v3502_v36, %v4848_v40  ;;  %v3504_v1 = vpop.eup %3503  ;;  %v1891_v13 = vpop.xlane.xlu0 %1890 }
 0xd7a   :  { %v1911_v31 = vmul.f32 %v3504_v1, %v4831_v47  ;;  %3507 = vrcp.f32 %v1891_v13 }
 0xd7b   :  { %v2158_v39 = vpack.c.bf16 %v2154_v35, %v2153_v10  ;;  %v3506_v6 = vpop.eup %3505  ;;  %3509 = vrcp.f32 %v1894_v33 }
 0xd7c   :  { %v1912_v7 = vmul.f32 %v3506_v6, %v4853_v0  ;;  %v1897_v43 = vpop.xlane.xlu2 %1896 }
 0xd7d   :  { %3188 = vmatmul.msk.bf16.gmra.mxu3 %vm527_vm12, %v2158_v39 }
 0xd7e   :  { %v1918_v34 = vpack.c.bf16 %v1912_v7, %v1911_v31  ;;  %v3314_v31 = vld [vmem:[%s5313_s9 + $0x1] ss:$0 sm:$0xff] }
 0xd80   :  { %3178 = vmatmul.msk.bf16.gmra.mxu2 %vm527_vm12, %v1918_v34  ;;  %v3508_v52 = vpop.eup %3507 }
 0xd81   :  { %v3510_v49 = vpop.eup %3509  ;;  %v1913_v40 = vmul.f32 %v3508_v52, %v4857_v8  ;;  %v1900_v61 = vpop.xlane.xlu0 %1899 }
 0xd82   :  { %v1914_v4 = vmul.f32 %v3510_v49, %v4837_v24  ;;  %3511 = vrcp.f32 %v1900_v61 }
 0xd83   :  { %3513 = vrcp.f32 %v1897_v43 }
 0xd84   :  { %v1919_v30 = vpack.c.bf16 %v1914_v4, %v1913_v40 }
 0xd88   :  { %v3512_v47 = vpop.eup %3511 }
 0xd89   :  { %v3514_v0 = vpop.eup %3513  ;;  %v1916_v60 = vmul.f32 %v3512_v47, %v4865_v41 }
 0xd8a   :  { %v1915_v2 = vmul.f32 %v3514_v0, %v4861_v22 }
 0xd8c   :  { %v1920_v58 = vpack.c.bf16 %v1916_v60, %v1915_v2 }
 0xd90   :  { %3179 = vmatmul.msk.bf16.gmra.mxu2 %vm527_vm12, %v1919_v30 }
 0xda0   :  { %3180 = vmatmul.msk.bf16.gmra.mxu2 %vm527_vm12, %v1920_v58 }
 0xdaa   :  { %v2192_v26 = vpop.f32.mrf.mxu3 }
 0xdab   :  { %2220 = vrot.lane.b32.xlu1 %v2192_v26, %s3618_s29 }
 0xdb2   :  { %v2194_v24 = vpop.f32.mrf.mxu3 }
 0xdb3   :  { %2222 = vrot.lane.b32.xlu2 %v2194_v24, %s3618_s29 }
 0xdba   :  { %v2197_v8 = vpop.f32.mrf.mxu3 }
 0xdbb   :  { %2224 = vrot.lane.b32.xlu0 %v2197_v8, %s3618_s29 }
 0xdc2   :  { %v2199_v37 = vpop.f32.mrf.mxu3 }
 0xdc3   :  { %2226 = vrot.lane.b32.xlu0 %v2199_v37, %s3618_s29 }
 0xdca   :  { %v2202_v38 = vpop.f32.mrf.mxu3 }
 0xdcb   :  { %2228 = vrot.lane.b32.xlu1 %v2202_v38, %s3618_s29 }
 0xdd1   :  { %v1954_v41 = vpop.f32.mrf.mxu2 }
 0xdd2   :  { %1974 = vst.msk [vmem:[#allocation2] sm:$0xff] %vm457_vm11, %v1954_v41  ;;  %v2204_v22 = vpop.f32.mrf.mxu3 }
 0xdd3   :  { %2230 = vrot.lane.b32.xlu2 %v2204_v22, %s3618_s29 }
 0xdd9   :  { %v1956_v18 = vpop.f32.mrf.mxu2 }
 0xdda   :  { %1975 = vst.msk [vmem:[#allocation2 + $0x8] sm:$0xff] %vm457_vm11, %v1956_v18 }
 0xe00   :  { %v2207_v29 = vpop.f32.mrf.mxu3 }
 0xe01   :  { %2232 = vrot.lane.b32.xlu0 %v2207_v29, %s3618_s29 }
 0xe03   :  { %v1959_v14 = vpop.f32.mrf.mxu2 }
 0xe04   :  { %1976 = vst.msk [vmem:[#allocation2 + $0x10] sm:$0xff] %vm457_vm11, %v1959_v14 }
 0xe08   :  { %v2209_v55 = vpop.f32.mrf.mxu3 }
 0xe09   :  { %2234 = vrot.lane.b32.xlu1 %v2209_v55, %s3618_s29 }
 0xe0b   :  { %v1961_v19 = vpop.f32.mrf.mxu2 }
 0xe0c   :  { %1977 = vst.msk [vmem:[#allocation2 + $0x18] sm:$0xff] %vm457_vm11, %v1961_v19 }
 0xe0d   :  { %v2223_v16 = vpop.permute.xlu2 %2222 }
 0xe0e   :  { %2245 = vst.msk [vmem:[#allocation2 + $0x8] sm:$0xff] %vm943_vm13, %v2223_v16 }
 0xe13   :  { %v1964_v11 = vpop.f32.mrf.mxu2 }
 0xe14   :  { %1978 = vst.msk [vmem:[#allocation2 + $0x20] sm:$0xff] %vm457_vm11, %v1964_v11 }
 0xe15   :  { %v2253_v9 = vld [vmem:[#allocation2 + $0x8] sm:$0xff] }
 0xe1b   :  { %v1966_v48 = vpop.f32.mrf.mxu2 }
 0xe1c   :  { %1979 = vst.msk [vmem:[#allocation2 + $0x28] sm:$0xff] %vm457_vm11, %v1966_v48 }
 0xe1d   :  { %v2221_v53 = vpop.permute.xlu1 %2220 }
 0xe1e   :  { %2244 = vst.msk [vmem:[#allocation2] sm:$0xff] %vm943_vm13, %v2221_v53 }
 0xe23   :  { %v1969_v27 = vpop.f32.mrf.mxu2 }
 0xe24   :  { %1980 = vst.msk [vmem:[#allocation2 + $0x30] sm:$0xff] %vm457_vm11, %v1969_v27 }
 0xe25   :  { %v2252_v25 = vld [vmem:[#allocation2] sm:$0xff] }
 0xe26   :  { %v2260_v42 = vpack.c.bf16 %v2253_v9, %v2252_v25 }
 0xe28   :  { %3202 = vmatmul.msk.bf16.vlgmr.msrb.gmra.mxu0 %vm170_vm0, %v2260_v42 }
 0xe2b   :  { %v1971_v21 = vpop.f32.mrf.mxu2 }
 0xe2c   :  { %1981 = vst.msk [vmem:[#allocation2 + $0x38] sm:$0xff] %vm457_vm11, %v1971_v21 }
 0xe2d   :  { %v2225_v50 = vpop.permute.xlu0 %2224  ;;  %v2231_v51 = vpop.permute.xlu2 %2230 }
 0xe2e   :  { %2246 = vst.msk [vmem:[#allocation2 + $0x10] sm:$0xff] %vm943_vm13, %v2225_v50 }
 0xe2f   :  { %2249 = vst.msk [vmem:[#allocation2 + $0x28] sm:$0xff] %vm943_vm13, %v2231_v51 }
 0xe35   :  { %v2227_v5 = vpop.permute.xlu0 %2226  ;;  %v2254_v28 = vld [vmem:[#allocation2 + $0x10] sm:$0xff] }
 0xe36   :  { %2247 = vst.msk [vmem:[#allocation2 + $0x18] sm:$0xff] %vm943_vm13, %v2227_v5  ;;  %v2257_v56 = vld [vmem:[#allocation2 + $0x28] sm:$0xff] }
 0xe3d   :  { %v2229_v3 = vpop.permute.xlu1 %2228  ;;  %v2255_v59 = vld [vmem:[#allocation2 + $0x18] sm:$0xff] }
 0xe3e   :  { %2248 = vst.msk [vmem:[#allocation2 + $0x20] sm:$0xff] %vm943_vm13, %v2229_v3  ;;  %v2261_v63 = vpack.c.bf16 %v2255_v59, %v2254_v28 }
 0xe40   :  { %3203 = vmatmul.msk.bf16.gmra.mxu0 %vm170_vm0, %v2261_v63 }
 0xe45   :  { %v2256_v32 = vld [vmem:[#allocation2 + $0x20] sm:$0xff] }
 0xe46   :  { %v2262_v36 = vpack.c.bf16 %v2257_v56, %v2256_v32 }
 0xe50   :  { %3204 = vmatmul.msk.bf16.gmra.mxu0 %vm170_vm0, %v2262_v36 }
 0xe73   :  { %v2233_v10 = vpop.permute.xlu0 %2232 }
 0xe74   :  { %2250 = vst.msk [vmem:[#allocation2 + $0x30] sm:$0xff] %vm943_vm13, %v2233_v10 }
 0xe7b   :  { %v2235_v35 = vpop.permute.xlu1 %2234  ;;  %v2258_v1 = vld [vmem:[#allocation2 + $0x30] sm:$0xff] }
 0xe7c   :  { %2251 = vst.msk [vmem:[#allocation2 + $0x38] sm:$0xff] %vm943_vm13, %v2235_v35 }
 0xe83   :  { %v2259_v39 = vld [vmem:[#allocation2 + $0x38] sm:$0xff] }
 0xe84   :  { %v2263_v6 = vpack.c.bf16 %v2259_v39, %v2258_v1 }
 0xe86   :  { %3205 = vmatmul.msk.bf16.gmra.mxu0 %vm170_vm0, %v2263_v6 }
 0xea5   :  { %v2307_v7 = vpop.f32.mrf.mxu0 }
 0xea6   :  { %v2308_v13 = vadd.f32 %v3314_v31, %v2307_v7 }
 0xea8   :  { %v2327_v34 = vadd.f32 %v2308_v13, %v4585_v57 }
 0xeaa   :  { %v2339_v33 = vsel %vm170_vm0, %v2327_v34, 0.0 }
 0xeab   :  { %2340 = vadd.xlane.f32.xlu2 %v2339_v33 }
 0xead   :  { %v2309_v52 = vpop.f32.mrf.mxu0 }
 0xeae   :  { %v2310_v49 = vadd.f32 %v3314_v31, %v2309_v52 }
 0xeb0   :  { %v2328_v40 = vadd.f32 %v2310_v49, %v4588_v17 }
 0xeb2   :  { %v2342_v4 = vsel %vm170_vm0, %v2328_v40, 0.0 }
 0xeb3   :  { %2343 = vadd.xlane.f32.xlu0 %v2342_v4 }
 0xebd   :  { %v2312_v61 = vpop.f32.mrf.mxu0 }
 0xebe   :  { %v2313_v30 = vadd.f32 %v3314_v31, %v2312_v61 }
 0xec0   :  { %v2329_v43 = vadd.f32 %v2313_v30, %v4602_v20 }
 0xec2   :  { %v2345_v47 = vsel %vm170_vm0, %v2329_v43, 0.0 }
 0xec3   :  { %2346 = vadd.xlane.f32.xlu1 %v2345_v47 }
 0xec5   :  { %v2314_v0 = vpop.f32.mrf.mxu0 }
 0xec6   :  { %v2315_v60 = vadd.f32 %v3314_v31, %v2314_v0  ;;  %v3283_v0 = vld [vmem:[%s5316_s12 + $0x18] sm:$0xff] }
 0xec7   :  { %2581 = vmatpush.bf16.msra.mxu2 %v3283_v0 }
 0xec8   :  { %v2330_v2 = vadd.f32 %v2315_v60, %v4605_v54 }
 0xeca   :  { %v2348_v58 = vsel %vm170_vm0, %v2330_v2, 0.0 }
 0xecb   :  { %2349 = vadd.xlane.f32.xlu2 %v2348_v58 }
 0xecd   :  { %v2317_v26 = vpop.f32.mrf.mxu0 }
 0xece   :  { %v2318_v24 = vadd.f32 %v3314_v31, %v2317_v26  ;;  %v3282_v26 = vld [vmem:[%s5316_s12 + $0x10] sm:$0xff] }
 0xecf   :  { %2582 = vmatpush.bf16.msra.mxu2 %v3282_v26 }
 0xed0   :  { %v2331_v8 = vadd.f32 %v2318_v24, %v4615_v12 }
 0xed2   :  { %v2351_v37 = vsel %vm170_vm0, %v2331_v8, 0.0 }
 0xed3   :  { %2352 = vadd.xlane.f32.xlu0 %v2351_v37 }
 0xed5   :  { %v2319_v38 = vpop.f32.mrf.mxu0 }
 0xed6   :  { %v2320_v41 = vadd.f32 %v3314_v31, %v2319_v38 }
 0xed8   :  { %v2332_v22 = vadd.f32 %v2320_v41, %v4618_v44 }
 0xeda   :  { %v2354_v18 = vsel %vm170_vm0, %v2332_v22, 0.0 }
 0xedb   :  { %2355 = vadd.xlane.f32.xlu1 %v2354_v18 }
 0xf03   :  { %v2322_v15 = vpop.f32.mrf.mxu0 }
 0xf04   :  { %v2323_v29 = vadd.f32 %v3314_v31, %v2322_v15 }
 0xf06   :  { %v2333_v14 = vadd.f32 %v2323_v29, %v4630_v23 }
 0xf08   :  { %v2357_v45 = vsel %vm170_vm0, %v2333_v14, 0.0 }
 0xf09   :  { %2358 = vadd.xlane.f32.xlu1 %v2357_v45 }
 0xf0b   :  { %v2324_v11 = vpop.f32.mrf.mxu0 }
 0xf0c   :  { %v2325_v53 = vadd.f32 %v3314_v31, %v2324_v11 }
 0xf0e   :  { %v2334_v42 = vadd.f32 %v2325_v53, %v4633_v46 }
 0xf10   :  { %v2360_v5 = vsel %vm170_vm0, %v2334_v42, 0.0 }
 0xf1e   :  { %v2341_v55 = vpop.xlane.xlu2 %2340 }
 0xf1f   :  { %v2363_v19 = vmul.f32 %v2341_v55, %v3847_v62 }
 0xf21   :  { %v4945_v16 = vsub.f32 %v2327_v34, %v2363_v19 }
 0xf23   :  { %v2379_v48 = vmul.f32 %v4945_v16, %v4945_v16 }
 0xf25   :  { %v2387_v27 = vsel %vm170_vm0, %v2379_v48, 0.0 }
 0xf26   :  { %v2344_v25 = vpop.xlane.xlu0 %2343  ;;  %2388 = vadd.xlane.f32.xlu2 %v2387_v27 }
 0xf27   :  { %v2364_v9 = vmul.f32 %v2344_v25, %v3847_v62 }
 0xf29   :  { %v4952_v21 = vsub.f32 %v2328_v40, %v2364_v9 }
 0xf2b   :  { %v2380_v50 = vmul.f32 %v4952_v21, %v4952_v21 }
 0xf2d   :  { %v2390_v51 = vsel %vm170_vm0, %v2380_v50, 0.0 }
 0xf2e   :  { %2391 = vadd.xlane.f32.xlu0 %v2390_v51  ;;  %2361 = vadd.xlane.f32.xlu2 %v2360_v5  ;;  %v5006_v5 = vld [vmem:[%s5314_s10 + $0x1] ss:$0 sm:$0xff]  ;;  %s3069_s10 = sshll.u32 %s3619_s3, 4  ;;  %s3070_s10 = int_to_ptr.vmem [resolvable:$true] %s3069_s10 }
 0xf36   :  { %v2347_v3 = vpop.xlane.xlu1 %2346 }
 0xf37   :  { %v2365_v28 = vmul.f32 %v2347_v3, %v3847_v62 }
 0xf39   :  { %v4959_v59 = vsub.f32 %v2329_v43, %v2365_v28 }
 0xf3b   :  { %v2381_v63 = vmul.f32 %v4959_v59, %v4959_v59 }
 0xf3d   :  { %v2393_v32 = vsel %vm170_vm0, %v2381_v63, 0.0 }
 0xf3e   :  { %2394 = vadd.xlane.f32.xlu0 %v2393_v32  ;;  %v2350_v56 = vpop.xlane.xlu2 %2349 }
 0xf3f   :  { %v2366_v36 = vmul.f32 %v2350_v56, %v3847_v62  ;;  %v5012_v56 = vld [vmem:[%s5315_s11 + $0x1] ss:$0 sm:$0xff] }
 0xf41   :  { %v4965_v10 = vsub.f32 %v2330_v2, %v2366_v36 }
 0xf43   :  { %v2382_v35 = vmul.f32 %v4965_v10, %v4965_v10 }
 0xf45   :  { %v2396_v1 = vsel %vm170_vm0, %v2382_v35, 0.0 }
 0xf46   :  { %v2353_v39 = vpop.xlane.xlu0 %2352  ;;  %2397 = vadd.xlane.f32.xlu1 %v2396_v1 }
 0xf47   :  { %v2367_v6 = vmul.f32 %v2353_v39, %v3847_v62 }
 0xf49   :  { %v4971_v31 = vsub.f32 %v2331_v8, %v2367_v6 }
 0xf4b   :  { %v2383_v7 = vmul.f32 %v4971_v31, %v4971_v31 }
 0xf4d   :  { %v2399_v13 = vsel %vm170_vm0, %v2383_v7, 0.0 }
 0xf4e   :  { %v2356_v34 = vpop.xlane.xlu1 %2355  ;;  %2400 = vadd.xlane.f32.xlu2 %v2399_v13 }
 0xf4f   :  { %v2368_v33 = vmul.f32 %v2356_v34, %v3847_v62 }
 0xf51   :  { %v4977_v52 = vsub.f32 %v2332_v22, %v2368_v33 }
 0xf53   :  { %v2384_v49 = vmul.f32 %v4977_v52, %v4977_v52 }
 0xf55   :  { %v2402_v40 = vsel %vm170_vm0, %v2384_v49, 0.0 }
 0xf56   :  { %2403 = vadd.xlane.f32.xlu0 %v2402_v40 }
 0xf7c   :  { %v2359_v4 = vpop.xlane.xlu1 %2358 }
 0xf7d   :  { %v2369_v61 = vmul.f32 %v2359_v4, %v3847_v62 }
 0xf7f   :  { %v4983_v30 = vsub.f32 %v2333_v14, %v2369_v61 }
 0xf81   :  { %v2385_v43 = vmul.f32 %v4983_v30, %v4983_v30 }
 0xf83   :  { %v2405_v47 = vsel %vm170_vm0, %v2385_v43, 0.0 }
 0xf84   :  { %2406 = vadd.xlane.f32.xlu1 %v2405_v47 }
 0xf99   :  { %v2389_v60 = vpop.xlane.xlu2 %2388 }
 0xf9a   :  { %v2411_v2 = vmul.f32 %v2389_v60, %v3847_v62 }
 0xf9c   :  { %v2419_v58 = vadd.f32 1e-12, %v2411_v2 }
 0xf9e   :  { %3515 = vrsqrt.f32 %v2419_v58  ;;  %vm2433_vm13 = vweird.f32 %v2419_v58 }
 0xfa1   :  { %v2392_v24 = vpop.xlane.xlu0 %2391  ;;  %v2362_v8 = vpop.xlane.xlu2 %2361 }
 0xfa2   :  { %v2412_v37 = vmul.f32 %v2392_v24, %v3847_v62  ;;  %v2370_v38 = vmul.f32 %v2362_v8, %v3847_v62 }
 0xfa4   :  { %v3516_v41 = vpop.eup %3515  ;;  %v2420_v22 = vadd.f32 1e-12, %v2412_v37  ;;  %v4997_v18 = vsub.f32 %v2334_v42, %v2370_v38 }
 0xfa5   :  { %v2428_v15 = vmul.f32 %v3516_v41, %v2419_v58  ;;  %vm2434_vm11 = vweird.f32 %v3516_v41 }
 0xfa6   :  { %3517 = vrsqrt.f32 %v2420_v22  ;;  %v2386_v29 = vmul.f32 %v4997_v18, %v4997_v18  ;;  %vm2435_vm14 = vmor %vm2433_vm13, %vm2434_vm11  ;;  %vm2443_vm1 = vweird.f32 %v2420_v22 }
 0xfa7   :  { %v2429_v14 = vmul.f32 %v3516_v41, %v2428_v15 }
 0xfa8   :  { %v2408_v45 = vsel %vm170_vm0, %v2386_v29, 0.0 }
 0xfa9   :  { %v2430_v55 = vmul.f32 0.5, %v2429_v14  ;;  %2409 = vadd.xlane.f32.xlu2 %v2408_v45 }
 0xfab   :  { %v2431_v19 = vsub.f32 1.5, %v2430_v55 }
 0xfac   :  { %v3518_v11 = vpop.eup %3517 }
 0xfad   :  { %v2432_v48 = vmul.f32 %v3516_v41, %v2431_v19  ;;  %v2438_v53 = vmul.f32 %v3518_v11, %v2420_v22  ;;  %vm2444_vm15 = vweird.f32 %v3518_v11 }
 0xfae   :  { %vm2445_vm2 = vmor %vm2443_vm1, %vm2444_vm15 }
 0xfaf   :  { %v2439_v27 = vmul.f32 %v3518_v11, %v2438_v53  ;;  %v2436_v25 = vsel %vm2435_vm14, %v3516_v41, %v2432_v48 }
 0xfb0   :  { %v2507_v3 = vmul.f32 %v2436_v25, %v4945_v16 }
 0xfb1   :  { %v2440_v9 = vmul.f32 0.5, %v2439_v27  ;;  %v2395_v42 = vpop.xlane.xlu0 %2394 }
 0xfb2   :  { %v2413_v50 = vmul.f32 %v2395_v42, %v3847_v62  ;;  %v2518_v36 = vmul.f32 %v5006_v5, %v2507_v3 }
 0xfb3   :  { %v2441_v51 = vsub.f32 1.5, %v2440_v9 }
 0xfb4   :  { %v2421_v28 = vadd.f32 1e-12, %v2413_v50  ;;  %v5019_v7 = vadd.f32 %v5012_v56, %v2518_v36 }
 0xfb5   :  { %v2442_v63 = vmul.f32 %v3518_v11, %v2441_v51 }
 0xfb6   :  { %3519 = vrsqrt.f32 %v2421_v28  ;;  %vm2453_vm4 = vweird.f32 %v2421_v28 }
 0xfb7   :  { %v2446_v32 = vsel %vm2445_vm2, %v3518_v11, %v2442_v63 }
 0xfb8   :  { %v2508_v35 = vmul.f32 %v2446_v32, %v4952_v21 }
 0xfb9   :  { %v2398_v1 = vpop.xlane.xlu1 %2397 }
 0xfba   :  { %v2519_v39 = vmul.f32 %v5006_v5, %v2508_v35  ;;  %v2414_v16 = vmul.f32 %v2398_v1, %v3847_v62 }
 0xfbc   :  { %v3520_v6 = vpop.eup %3519  ;;  %v5022_v13 = vadd.f32 %v5012_v56, %v2519_v39  ;;  %v2422_v34 = vadd.f32 1e-12, %v2414_v16 }
 0xfbd   :  { %v2448_v33 = vmul.f32 %v3520_v6, %v2421_v28  ;;  %vm2454_vm3 = vweird.f32 %v3520_v6 }
 0xfbe   :  { %v2537_v49 = vpack.c.bf16 %v5022_v13, %v5019_v7  ;;  %3521 = vrsqrt.f32 %v2422_v34  ;;  %vm2455_vm5 = vmor %vm2453_vm4, %vm2454_vm3  ;;  %vm2463_vm7 = vweird.f32 %v2422_v34 }
 0xfbf   :  { %v2449_v40 = vmul.f32 %v3520_v6, %v2448_v33 }
 0xfc0   :  { %3221 = vmatmul.msk.bf16.vlgmr.msra.gmra.mxu2 %vm170_vm0, %v2537_v49 }
 0xfc1   :  { %v2450_v21 = vmul.f32 0.5, %v2449_v40  ;;  %v2401_v4 = vpop.xlane.xlu2 %2400 }
 0xfc2   :  { %v2415_v61 = vmul.f32 %v2401_v4, %v3847_v62 }
 0xfc3   :  { %v2451_v43 = vsub.f32 1.5, %v2450_v21 }
 0xfc4   :  { %v3522_v47 = vpop.eup %3521  ;;  %v2423_v0 = vadd.f32 1e-12, %v2415_v61 }
 0xfc5   :  { %v2452_v60 = vmul.f32 %v3520_v6, %v2451_v43  ;;  %v2458_v2 = vmul.f32 %v3522_v47, %v2422_v34  ;;  %vm2464_vm6 = vweird.f32 %v3522_v47 }
 0xfc6   :  { %3523 = vrsqrt.f32 %v2423_v0  ;;  %vm2465_vm8 = vmor %vm2463_vm7, %vm2464_vm6  ;;  %vm2473_vm10 = vweird.f32 %v2423_v0 }
 0xfc7   :  { %v2459_v58 = vmul.f32 %v3522_v47, %v2458_v2  ;;  %v2456_v26 = vsel %vm2455_vm5, %v3520_v6, %v2452_v60 }
 0xfc8   :  { %v2509_v22 = vmul.f32 %v2456_v26, %v4959_v59 }
 0xfc9   :  { %v2460_v24 = vmul.f32 0.5, %v2459_v58  ;;  %v2404_v8 = vpop.xlane.xlu0 %2403 }
 0xfca   :  { %v2416_v37 = vmul.f32 %v2404_v8, %v3847_v62  ;;  %v2520_v11 = vmul.f32 %v5006_v5, %v2509_v22 }
 0xfcb   :  { %v2461_v38 = vsub.f32 1.5, %v2460_v24 }
 0xfcc   :  { %v3524_v41 = vpop.eup %3523  ;;  %v2424_v15 = vadd.f32 1e-12, %v2416_v37  ;;  %v5034_v9 = vadd.f32 %v5012_v56, %v2520_v11 }
 0xfcd   :  { %v2462_v29 = vmul.f32 %v3522_v47, %v2461_v38  ;;  %v2468_v14 = vmul.f32 %v3524_v41, %v2423_v0  ;;  %vm2474_vm9 = vweird.f32 %v3524_v41 }
 0xfce   :  { %3525 = vrsqrt.f32 %v2424_v15  ;;  %vm2475_vm11 = vmor %vm2473_vm10, %vm2474_vm9  ;;  %vm2483_vm14 = vweird.f32 %v2424_v15 }
 0xfcf   :  { %v2466_v45 = vsel %vm2465_vm8, %v3522_v47, %v2462_v29  ;;  %v2469_v55 = vmul.f32 %v3524_v41, %v2468_v14 }
 0xfd0   :  { %v2510_v19 = vmul.f32 %v2466_v45, %v4965_v10 }
 0xfd1   :  { %v2470_v48 = vmul.f32 0.5, %v2469_v55  ;;  %v3287_v55 = vld [vmem:[%s5318_s14 + $0x38] sm:$0xff] }
 0xfd2   :  { %v2521_v53 = vmul.f32 %v5006_v5, %v2510_v19  ;;  %2734 = vmatpush.bf16.msra.mxu1 %v3287_v55 }
 0xfd3   :  { %v2471_v27 = vsub.f32 1.5, %v2470_v48  ;;  %v3284_v48 = vld [vmem:[%s5318_s14 + $0x20] sm:$0xff] }
 0xfd4   :  { %v3526_v25 = vpop.eup %3525  ;;  %v5037_v59 = vadd.f32 %v5012_v56, %v2521_v53 }
 0xfd5   :  { %v2472_v42 = vmul.f32 %v3524_v41, %v2471_v27  ;;  %v2478_v50 = vmul.f32 %v3526_v25, %v2424_v15  ;;  %vm2484_vm13 = vweird.f32 %v3526_v25 }
 0xfd6   :  { %v2538_v51 = vpack.c.bf16 %v5037_v59, %v5034_v9  ;;  %vm2485_vm15 = vmor %vm2483_vm14, %vm2484_vm13 }
 0xfd7   :  { %v2479_v10 = vmul.f32 %v3526_v25, %v2478_v50  ;;  %v2476_v3 = vsel %vm2475_vm11, %v3524_v41, %v2472_v42 }
 0xfd8   :  { %3222 = vmatmul.msk.bf16.gmra.mxu2 %vm170_vm0, %v2538_v51  ;;  %v2511_v32 = vmul.f32 %v2476_v3, %v4971_v31 }
 0xfd9   :  { %v2480_v28 = vmul.f32 0.5, %v2479_v10 }
 0xfda   :  { %v2522_v39 = vmul.f32 %v5006_v5, %v2511_v32 }
 0xfdb   :  { %v2481_v63 = vsub.f32 1.5, %v2480_v28 }
 0xfdc   :  { %v5047_v6 = vadd.f32 %v5012_v56, %v2522_v39 }
 0xfdd   :  { %v2482_v36 = vmul.f32 %v3526_v25, %v2481_v63 }
 0xfdf   :  { %v2486_v35 = vsel %vm2485_vm15, %v3526_v25, %v2482_v36 }
 0xfe0   :  { %v2512_v1 = vmul.f32 %v2486_v35, %v4977_v52 }
 0xfe2   :  { %v2523_v16 = vmul.f32 %v5006_v5, %v2512_v1 }
 0xfe4   :  { %v5050_v34 = vadd.f32 %v5012_v56, %v2523_v16 }
 0xfe6   :  { %v2539_v33 = vpack.c.bf16 %v5050_v34, %v5047_v6 }
 0xfe8   :  { %3223 = vmatmul.msk.bf16.gmra.mxu2 %vm170_vm0, %v2539_v33 }
 0xff7   :  { %v2407_v31 = vpop.xlane.xlu1 %2406 }
 0xff8   :  { %v2417_v49 = vmul.f32 %v2407_v31, %v3847_v62 }
 0xffa   :  { %v2425_v40 = vadd.f32 1e-12, %v2417_v49 }
 0xffc   :  { %3527 = vrsqrt.f32 %v2425_v40  ;;  %vm2493_vm2 = vweird.f32 %v2425_v40 }
0x1002   :  { %v3528_v52 = vpop.eup %3527 }
0x1003   :  { %v2488_v21 = vmul.f32 %v3528_v52, %v2425_v40  ;;  %vm2494_vm1 = vweird.f32 %v3528_v52 }
0x1004   :  { %vm2495_vm3 = vmor %vm2493_vm2, %vm2494_vm1 }
0x1005   :  { %v2489_v4 = vmul.f32 %v3528_v52, %v2488_v21 }
0x1007   :  { %v2490_v0 = vmul.f32 0.5, %v2489_v4 }
0x1009   :  { %v2491_v60 = vsub.f32 1.5, %v2490_v0 }
0x100b   :  { %v2492_v58 = vmul.f32 %v3528_v52, %v2491_v60 }
0x100d   :  { %v2496_v8 = vsel %vm2495_vm3, %v3528_v52, %v2492_v58 }
0x100e   :  { %v2513_v41 = vmul.f32 %v2496_v8, %v4983_v30 }
0x1010   :  { %v2524_v14 = vmul.f32 %v5006_v5, %v2513_v41 }
0x1012   :  { %v5065_v19 = vadd.f32 %v5012_v56, %v2524_v14 }
0x101c   :  { %v2410_v61 = vpop.xlane.xlu2 %2409 }
0x101d   :  { %v2418_v43 = vmul.f32 %v2410_v61, %v3847_v62 }
0x101f   :  { %v2426_v47 = vadd.f32 1e-12, %v2418_v43 }
0x1021   :  { %3529 = vrsqrt.f32 %v2426_v47  ;;  %vm2503_vm5 = vweird.f32 %v2426_v47 }
0x1027   :  { %v3530_v2 = vpop.eup %3529 }
0x1028   :  { %v2498_v26 = vmul.f32 %v3530_v2, %v2426_v47  ;;  %vm2504_vm4 = vweird.f32 %v3530_v2 }
0x1029   :  { %vm2505_vm6 = vmor %vm2503_vm5, %vm2504_vm4 }
0x102a   :  { %v2499_v24 = vmul.f32 %v3530_v2, %v2498_v26 }
0x102c   :  { %v2500_v37 = vmul.f32 0.5, %v2499_v24 }
0x102e   :  { %v2501_v38 = vsub.f32 1.5, %v2500_v37 }
0x1030   :  { %v2502_v22 = vmul.f32 %v3530_v2, %v2501_v38 }
0x1032   :  { %v2506_v15 = vsel %vm2505_vm6, %v3530_v2, %v2502_v22 }
0x1033   :  { %v2514_v29 = vmul.f32 %v2506_v15, %v4997_v18  ;;  %v3286_v18 = vld [vmem:[%s5318_s14 + $0x30] sm:$0xff] }
0x1034   :  { %2735 = vmatpush.bf16.msra.mxu1 %v3286_v18 }
0x1035   :  { %v2525_v45 = vmul.f32 %v5006_v5, %v2514_v29  ;;  %v3285_v5 = vld [vmem:[%s5318_s14 + $0x28] sm:$0xff] }
0x1037   :  { %v5068_v11 = vadd.f32 %v5012_v56, %v2525_v45  ;;  %v5082_v56 = vld [vmem:[%s5317_s13 + $0x1] ss:$0 sm:$0xff] }
0x1038   :  { %2736 = vmatpush.bf16.msra.mxu1 %v3285_v5 }
0x1039   :  { %v2540_v30 = vpack.c.bf16 %v5068_v11, %v5065_v19 }
0x103b   :  { %3224 = vmatmul.msk.bf16.gmra.mxu2 %vm170_vm0, %v2540_v30 }
0x103c   :  { %2737 = vmatpush.bf16.msra.mxu1 %v3284_v48 }
0x1043   :  { %v2584_v53 = vpop.f32.mrf.mxu2 }
0x1044   :  { %v2585_v27 = vadd.f32 %v5082_v56, %v2584_v53 }
0x1046   :  { %v2612_v25 = vmul.f32 0.044715, %v2585_v27  ;;  %v2604_v52 = vmul.f32 0.5, %v2585_v27 }
0x1048   :  { %v2620_v42 = vmul.f32 %v2612_v25, %v2585_v27 }
0x104a   :  { %v2628_v50 = vmul.f32 %v2620_v42, %v2585_v27 }
0x104b   :  { %v2586_v51 = vpop.f32.mrf.mxu2 }
0x104c   :  { %v2636_v10 = vadd.f32 %v2628_v50, %v2585_v27  ;;  %v2587_v3 = vadd.f32 %v5082_v56, %v2586_v51 }
0x104e   :  { %v2613_v28 = vmul.f32 0.044715, %v2587_v3  ;;  %v2644_v63 = vmul.f32 0.7978846, %v2636_v10  ;;  %v2605_v21 = vmul.f32 0.5, %v2587_v3 }
0x1050   :  { %v2621_v32 = vmul.f32 %v2613_v28, %v2587_v3  ;;  %3531 = vtanh.f32 %v2644_v63 }
0x1052   :  { %v2629_v36 = vmul.f32 %v2621_v32, %v2587_v3 }
0x1054   :  { %v2637_v35 = vadd.f32 %v2629_v36, %v2587_v3 }
0x1056   :  { %v2645_v1 = vmul.f32 0.7978846, %v2637_v35  ;;  %v3532_v39 = vpop.eup %3531 }
0x1057   :  { %v2660_v31 = vadd.f32 1.0, %v3532_v39 }
0x1058   :  { %3533 = vtanh.f32 %v2645_v1 }
0x1059   :  { %v2668_v43 = vmul.f32 %v2660_v31, %v2604_v52 }
0x105b   :  { %v2589_v16 = vpop.f32.mrf.mxu2 }
0x105c   :  { %v2590_v33 = vadd.f32 %v5082_v56, %v2589_v16 }
0x105e   :  { %v3534_v49 = vpop.eup %3533  ;;  %v2614_v40 = vmul.f32 0.044715, %v2590_v33  ;;  %v2606_v42 = vmul.f32 0.5, %v2590_v33 }
0x105f   :  { %v2661_v4 = vadd.f32 1.0, %v3534_v49 }
0x1060   :  { %v2622_v61 = vmul.f32 %v2614_v40, %v2590_v33 }
0x1061   :  { %v2669_v47 = vmul.f32 %v2661_v4, %v2605_v21 }
0x1062   :  { %v2630_v0 = vmul.f32 %v2622_v61, %v2590_v33 }
0x1063   :  { %v2676_v60 = vpack.c.bf16 %v2669_v47, %v2668_v43  ;;  %v2591_v2 = vpop.f32.mrf.mxu2 }
0x1064   :  { %v2638_v58 = vadd.f32 %v2630_v0, %v2590_v33  ;;  %v2592_v26 = vadd.f32 %v5082_v56, %v2591_v2 }
0x1065   :  { %3250 = vmatmul.msk.bf16.vlgmr.msra.gmra.mxu1 %vm527_vm12, %v2676_v60 }
0x1066   :  { %v2615_v24 = vmul.f32 0.044715, %v2592_v26  ;;  %v2646_v8 = vmul.f32 0.7978846, %v2638_v58  ;;  %v2607_v50 = vmul.f32 0.5, %v2592_v26 }
0x1068   :  { %v2623_v37 = vmul.f32 %v2615_v24, %v2592_v26  ;;  %3535 = vtanh.f32 %v2646_v8 }
0x106a   :  { %v2631_v38 = vmul.f32 %v2623_v37, %v2592_v26 }
0x106b   :  { %v2594_v41 = vpop.f32.mrf.mxu2 }
0x106c   :  { %v2639_v22 = vadd.f32 %v2631_v38, %v2592_v26  ;;  %v2595_v15 = vadd.f32 %v5082_v56, %v2594_v41 }
0x106e   :  { %v2647_v29 = vmul.f32 0.7978846, %v2639_v22  ;;  %v2616_v14 = vmul.f32 0.044715, %v2595_v15  ;;  %v3536_v55 = vpop.eup %3535  ;;  %v2608_v49 = vmul.f32 0.5, %v2595_v15 }
0x106f   :  { %v2662_v53 = vadd.f32 1.0, %v3536_v55 }
0x1070   :  { %v2624_v45 = vmul.f32 %v2616_v14, %v2595_v15  ;;  %3537 = vtanh.f32 %v2647_v29 }
0x1071   :  { %v2670_v28 = vmul.f32 %v2662_v53, %v2606_v42 }
0x1072   :  { %v2632_v30 = vmul.f32 %v2624_v45, %v2595_v15 }
0x1073   :  { %v2596_v18 = vpop.f32.mrf.mxu2 }
0x1074   :  { %v2640_v5 = vadd.f32 %v2632_v30, %v2595_v15  ;;  %v2597_v48 = vadd.f32 %v5082_v56, %v2596_v18 }
0x1076   :  { %v3538_v27 = vpop.eup %3537  ;;  %v2617_v25 = vmul.f32 0.044715, %v2597_v48  ;;  %v2648_v10 = vmul.f32 0.7978846, %v2640_v5  ;;  %v2609_v40 = vmul.f32 0.5, %v2597_v48 }
0x1077   :  { %v2663_v51 = vadd.f32 1.0, %v3538_v27 }
0x1078   :  { %v2625_v3 = vmul.f32 %v2617_v25, %v2597_v48  ;;  %3539 = vtanh.f32 %v2648_v10 }
0x1079   :  { %v2671_v63 = vmul.f32 %v2663_v51, %v2607_v50  ;;  %v3318_v50 = vld [vmem:[%s5319_s15 + $0x1] ss:$0 sm:$0xff] }
0x107a   :  { %v2633_v32 = vmul.f32 %v2625_v3, %v2597_v48 }
0x107b   :  { %v2677_v36 = vpack.c.bf16 %v2671_v63, %v2670_v28 }
0x107c   :  { %v2641_v35 = vadd.f32 %v2633_v32, %v2597_v48 }
0x107d   :  { %3251 = vmatmul.msk.bf16.gmra.mxu1 %vm527_vm12, %v2677_v36 }
0x107e   :  { %v2649_v1 = vmul.f32 0.7978846, %v2641_v35  ;;  %v3540_v39 = vpop.eup %3539 }
0x107f   :  { %v2664_v16 = vadd.f32 1.0, %v3540_v39 }
0x1080   :  { %3541 = vtanh.f32 %v2649_v1 }
0x1081   :  { %v2672_v52 = vmul.f32 %v2664_v16, %v2608_v49 }
0x1086   :  { %v3542_v31 = vpop.eup %3541 }
0x1087   :  { %v2665_v33 = vadd.f32 1.0, %v3542_v31 }
0x1089   :  { %v2673_v21 = vmul.f32 %v2665_v33, %v2609_v40 }
0x108b   :  { %v2678_v4 = vpack.c.bf16 %v2673_v21, %v2672_v52 }
0x108d   :  { %3252 = vmatmul.msk.bf16.gmra.mxu1 %vm527_vm12, %v2678_v4 }
0x10be   :  { %v2599_v61 = vpop.f32.mrf.mxu2 }
0x10bf   :  { %v2600_v43 = vadd.f32 %v5082_v56, %v2599_v61 }
0x10c1   :  { %v2618_v47 = vmul.f32 0.044715, %v2600_v43  ;;  %v2610_v45 = vmul.f32 0.5, %v2600_v43 }
0x10c3   :  { %v2626_v0 = vmul.f32 %v2618_v47, %v2600_v43 }
0x10c5   :  { %v2634_v60 = vmul.f32 %v2626_v0, %v2600_v43 }
0x10c6   :  { %v2601_v2 = vpop.f32.mrf.mxu2 }
0x10c7   :  { %v2642_v58 = vadd.f32 %v2634_v60, %v2600_v43  ;;  %v2602_v26 = vadd.f32 %v5082_v56, %v2601_v2 }
0x10c9   :  { %v2619_v24 = vmul.f32 0.044715, %v2602_v26  ;;  %v2650_v8 = vmul.f32 0.7978846, %v2642_v58  ;;  %v2611_v55 = vmul.f32 0.5, %v2602_v26 }
0x10cb   :  { %v2627_v37 = vmul.f32 %v2619_v24, %v2602_v26  ;;  %3543 = vtanh.f32 %v2650_v8 }
0x10cd   :  { %v2635_v38 = vmul.f32 %v2627_v37, %v2602_v26 }
0x10cf   :  { %v2643_v41 = vadd.f32 %v2635_v38, %v2602_v26 }
0x10d1   :  { %v2651_v22 = vmul.f32 0.7978846, %v2643_v41  ;;  %v3544_v15 = vpop.eup %3543 }
0x10d2   :  { %v2666_v29 = vadd.f32 1.0, %v3544_v15 }
0x10d3   :  { %3545 = vtanh.f32 %v2651_v22 }
0x10d4   :  { %v2674_v18 = vmul.f32 %v2666_v29, %v2610_v45 }
0x10d9   :  { %v3546_v14 = vpop.eup %3545 }
0x10da   :  { %v2667_v30 = vadd.f32 1.0, %v3546_v14 }
0x10dc   :  { %v2675_v5 = vmul.f32 %v2667_v30, %v2611_v55 }
0x10de   :  { %v2679_v48 = vpack.c.bf16 %v2675_v5, %v2674_v18 }
0x10e0   :  { %3253 = vmatmul.msk.bf16.gmra.mxu1 %vm527_vm12, %v2679_v48 }
0x10e2   :  { %v2739_v56 = vpop.f32.mrf.mxu1 }
0x10e3   :  { %v2740_v52 = vadd.f32 %v3318_v50, %v2739_v56 }
0x10ea   :  { %v2741_v53 = vpop.f32.mrf.mxu1 }
0x10eb   :  { %v2742_v43 = vadd.f32 %v3318_v50, %v2741_v53 }
0x10fa   :  { %v2744_v27 = vpop.f32.mrf.mxu1 }
0x10fb   :  { %v2745_v28 = vadd.f32 %v3318_v50, %v2744_v27 }
0x10fd   :  { %v2761_v32 = vadd.f32 %v2745_v28, %v5034_v9 }
0x10ff   :  { %v2777_v36 = vsel %vm170_vm0, %v2761_v32, 0.0 }
0x1102   :  { %v2746_v25 = vpop.f32.mrf.mxu1 }
0x1103   :  { %v2747_v16 = vadd.f32 %v3318_v50, %v2746_v25 }
0x110a   :  { %v2749_v42 = vpop.f32.mrf.mxu1 }
0x110b   :  { %v2750_v21 = vadd.f32 %v3318_v50, %v2749_v42 }
0x110d   :  { %v2763_v61 = vadd.f32 %v2750_v21, %v5047_v6 }
0x110f   :  { %v2783_v47 = vsel %vm170_vm0, %v2763_v61, 0.0 }
0x1112   :  { %v2751_v51 = vpop.f32.mrf.mxu1 }
0x1113   :  { %v2752_v10 = vadd.f32 %v3318_v50, %v2751_v51 }
0x1115   :  { %v2764_v3 = vadd.f32 %v2752_v10, %v5050_v34  ;;  %v2762_v34 = vadd.f32 %v2747_v16, %v5037_v59 }
0x1117   :  { %v2786_v63 = vsel %vm170_vm0, %v2764_v3, 0.0  ;;  %v2780_v4 = vsel %vm170_vm0, %v2762_v34, 0.0 }
0x1118   :  { %2787 = vadd.xlane.f32.xlu2 %v2786_v63 }
0x1120   :  { %2778 = vadd.xlane.f32.xlu2 %v2777_v36 }
0x115d   :  { %v2754_v35 = vpop.f32.mrf.mxu1 }
0x115e   :  { %v2755_v1 = vadd.f32 %v3318_v50, %v2754_v35 }
0x1160   :  { %v2765_v39 = vadd.f32 %v2755_v1, %v5065_v19  ;;  %v2759_v19 = vadd.f32 %v2740_v52, %v5019_v7 }
0x1162   :  { %v2789_v31 = vsel %vm170_vm0, %v2765_v39, 0.0  ;;  %v2771_v59 = vsel %vm170_vm0, %v2759_v19, 0.0 }
0x1163   :  { %2790 = vadd.xlane.f32.xlu1 %v2789_v31 }
0x1165   :  { %v2756_v49 = vpop.f32.mrf.mxu1 }
0x1166   :  { %v2757_v40 = vadd.f32 %v3318_v50, %v2756_v49 }
0x1168   :  { %v2766_v33 = vadd.f32 %v2757_v40, %v5068_v11  ;;  %v2760_v11 = vadd.f32 %v2742_v43, %v5022_v13 }
0x116a   :  { %v2792_v9 = vsel %vm170_vm0, %v2766_v33, 0.0  ;;  %v2774_v0 = vsel %vm170_vm0, %v2760_v11, 0.0 }
0x116b   :  { %2793 = vadd.xlane.f32.xlu0 %v2792_v9  ;;  %2781 = vadd.xlane.f32.xlu1 %v2780_v4 }
0x1173   :  { %2784 = vadd.xlane.f32.xlu0 %v2783_v47  ;;  %2772 = vadd.xlane.f32.xlu1 %v2771_v59 }
0x117b   :  { %2775 = vadd.xlane.f32.xlu0 %v2774_v0 }
0x118b   :  { %v2788_v60 = vpop.xlane.xlu2 %2787 }
0x118c   :  { %v2800_v2 = vmul.f32 %v2788_v60, %v3847_v62 }
0x118e   :  { %v5119_v58 = vsub.f32 %v2764_v3, %v2800_v2 }
0x1190   :  { %v2816_v7 = vmul.f32 %v5119_v58, %v5119_v58 }
0x1192   :  { %v2834_v6 = vsel %vm170_vm0, %v2816_v7, 0.0 }
0x1193   :  { %2835 = vadd.xlane.f32.xlu1 %v2834_v6  ;;  %v2779_v26 = vpop.xlane.xlu2 %2778 }
0x1194   :  { %v2797_v24 = vmul.f32 %v2779_v26, %v3847_v62 }
0x1196   :  { %v5125_v8 = vsub.f32 %v2761_v32, %v2797_v24 }
0x1198   :  { %v2813_v13 = vmul.f32 %v5125_v8, %v5125_v8 }
0x119a   :  { %v2825_v37 = vsel %vm170_vm0, %v2813_v13, 0.0 }
0x119b   :  { %2826 = vadd.xlane.f32.xlu1 %v2825_v37 }
0x11d6   :  { %v2791_v38 = vpop.xlane.xlu1 %2790 }
0x11d7   :  { %v2801_v41 = vmul.f32 %v2791_v38, %v3847_v62 }
0x11d9   :  { %v5131_v22 = vsub.f32 %v2765_v39, %v2801_v41 }
0x11db   :  { %v2817_v15 = vmul.f32 %v5131_v22, %v5131_v22 }
0x11dd   :  { %v2837_v29 = vsel %vm170_vm0, %v2817_v15, 0.0 }
0x11de   :  { %v2794_v14 = vpop.xlane.xlu0 %2793  ;;  %2838 = vadd.xlane.f32.xlu0 %v2837_v29  ;;  %v2782_v45 = vpop.xlane.xlu1 %2781 }
0x11df   :  { %v2802_v55 = vmul.f32 %v2794_v14, %v3847_v62  ;;  %v2798_v30 = vmul.f32 %v2782_v45, %v3847_v62 }
0x11e1   :  { %v5138_v18 = vsub.f32 %v2766_v33, %v2802_v55  ;;  %v5140_v5 = vsub.f32 %v2762_v34, %v2798_v30 }
0x11e3   :  { %v2818_v48 = vmul.f32 %v5138_v18, %v5138_v18  ;;  %v2814_v56 = vmul.f32 %v5140_v5, %v5140_v5 }
0x11e5   :  { %v2840_v53 = vsel %vm170_vm0, %v2818_v48, 0.0  ;;  %v2828_v27 = vsel %vm170_vm0, %v2814_v56, 0.0 }
0x11e6   :  { %2841 = vadd.xlane.f32.xlu2 %v2840_v53  ;;  %v2785_v25 = vpop.xlane.xlu0 %2784  ;;  %2829 = vadd.xlane.f32.xlu0 %v2828_v27  ;;  %v2773_v42 = vpop.xlane.xlu1 %2772 }
0x11e7   :  { %v2799_v50 = vmul.f32 %v2785_v25, %v3847_v62  ;;  %v2795_v51 = vmul.f32 %v2773_v42, %v3847_v62 }
0x11e9   :  { %v5150_v10 = vsub.f32 %v2763_v61, %v2799_v50  ;;  %v5152_v3 = vsub.f32 %v2759_v19, %v2795_v51 }
0x11eb   :  { %v2815_v28 = vmul.f32 %v5150_v10, %v5150_v10  ;;  %v2811_v63 = vmul.f32 %v5152_v3, %v5152_v3 }
0x11ed   :  { %v2831_v32 = vsel %vm170_vm0, %v2815_v28, 0.0  ;;  %v2819_v36 = vsel %vm170_vm0, %v2811_v63, 0.0 }
0x11ee   :  { %2832 = vadd.xlane.f32.xlu2 %v2831_v32  ;;  %v2776_v35 = vpop.xlane.xlu0 %2775  ;;  %2820 = vadd.xlane.f32.xlu0 %v2819_v36 }
0x11ef   :  { %v2796_v1 = vmul.f32 %v2776_v35, %v3847_v62 }
0x11f1   :  { %v5161_v39 = vsub.f32 %v2760_v11, %v2796_v1 }
0x11f3   :  { %v2812_v16 = vmul.f32 %v5161_v39, %v5161_v39 }
0x11f5   :  { %v2822_v31 = vsel %vm170_vm0, %v2812_v16, 0.0 }
0x11f6   :  { %2823 = vadd.xlane.f32.xlu2 %v2822_v31 }
0x1206   :  { %v2836_v49 = vpop.xlane.xlu1 %2835 }
0x1207   :  { %v2848_v34 = vmul.f32 %v2836_v49, %v3847_v62  ;;  %v5195_v49 = vld [vmem:[%s5320_s16 + $0x1] ss:$0 sm:$0xff] }
0x1209   :  { %v2856_v40 = vadd.f32 1e-12, %v2848_v34 }
0x120b   :  { %3547 = vrsqrt.f32 %v2856_v40  ;;  %vm2915_vm9 = vweird.f32 %v2856_v40 }
0x120e   :  { %v2827_v33 = vpop.xlane.xlu1 %2826 }
0x120f   :  { %v2845_v52 = vmul.f32 %v2827_v33, %v3847_v62 }
0x1211   :  { %v5168_v21 = vadd.f32 1e-12, %v2845_v52  ;;  %v3548_v9 = vpop.eup %3547 }
0x1212   :  { %v2910_v19 = vmul.f32 %v3548_v9, %v2856_v40  ;;  %vm2916_vm7 = vweird.f32 %v3548_v9 }
0x1213   :  { %3549 = vrsqrt.f32 %v5168_v21  ;;  %vm2917_vm10 = vmor %vm2915_vm9, %vm2916_vm7  ;;  %vm2885_vm15 = vweird.f32 %v5168_v21 }
0x1214   :  { %v2911_v47 = vmul.f32 %v3548_v9, %v2910_v19 }
0x1216   :  { %v2912_v60 = vmul.f32 0.5, %v2911_v47 }
0x1218   :  { %v2913_v38 = vsub.f32 1.5, %v2912_v60 }
0x1219   :  { %v5172_v59 = vpop.eup %3549 }
0x121a   :  { %v2880_v6 = vmul.f32 %v5172_v59, %v5168_v21  ;;  %v2914_v55 = vmul.f32 %v3548_v9, %v2913_v38  ;;  %vm2886_vm14 = vweird.f32 %v5172_v59 }
0x121b   :  { %vm5212_vm3 = vmor %vm2885_vm15, %vm2886_vm14 }
0x121c   :  { %v2881_v41 = vmul.f32 %v5172_v59, %v2880_v6  ;;  %v2918_v63 = vsel %vm2917_vm10, %v3548_v9, %v2914_v55 }
0x121d   :  { %v2944_v34 = vmul.f32 %v2918_v63, %v5119_v58 }
0x121e   :  { %v2882_v56 = vmul.f32 0.5, %v2881_v41 }
0x1220   :  { %v2883_v36 = vsub.f32 1.5, %v2882_v56 }
0x1251   :  { %v2839_v4 = vpop.xlane.xlu0 %2838 }
0x1252   :  { %v2849_v61 = vmul.f32 %v2839_v4, %v3847_v62  ;;  %v2884_v4 = vmul.f32 %v5172_v59, %v2883_v36 }
0x1254   :  { %v2857_v43 = vadd.f32 1e-12, %v2849_v61  ;;  %v2888_v6 = vsel %vm5212_vm3, %v5172_v59, %v2884_v4  ;;  %vm3062_vm3 = vcmask 195584  }
0x1256   :  { %3551 = vrsqrt.f32 %v2857_v43  ;;  %vm2925_vm11 = vweird.f32 %v2857_v43 }
0x1259   :  { %v2830_v11 = vpop.xlane.xlu0 %2829  ;;  %v2842_v0 = vpop.xlane.xlu2 %2841 }
0x125a   :  { %v2846_v2 = vmul.f32 %v2830_v11, %v3847_v62  ;;  %v2850_v7 = vmul.f32 %v2842_v0, %v3847_v62  ;;  %v2955_v11 = vmul.f32 %v5195_v49, %v2944_v34 }
0x125c   :  { %v3552_v26 = vpop.eup %3551  ;;  %v2854_v24 = vadd.f32 1e-12, %v2846_v2  ;;  %v5178_v13 = vadd.f32 1e-12, %v2850_v7  ;;  %v5223_v7 = vld [vmem:[%s5321_s17 + $0x1] ss:$0 sm:$0xff] }
0x125d   :  { %v2920_v37 = vmul.f32 %v3552_v26, %v2857_v43  ;;  %vm2926_vm8 = vweird.f32 %v3552_v26 }
0x125e   :  { %3553 = vrsqrt.f32 %v2854_v24  ;;  %vm2927_vm13 = vmor %vm2925_vm11, %vm2926_vm8  ;;  %vm2895_vm4 = vweird.f32 %v2854_v24  ;;  %vm2935_vm6 = vweird.f32 %v5178_v13 }
0x125f   :  { %v2921_v15 = vmul.f32 %v3552_v26, %v2920_v37  ;;  %3555 = vrsqrt.f32 %v5178_v13 }
0x1261   :  { %v2922_v29 = vmul.f32 0.5, %v2921_v15  ;;  %v2821_v14 = vpop.xlane.xlu0 %2820  ;;  %v2833_v45 = vpop.xlane.xlu2 %2832 }
0x1262   :  { %v2843_v30 = vmul.f32 %v2821_v14, %v3847_v62  ;;  %v2847_v48 = vmul.f32 %v2833_v45, %v3847_v62  ;;  %v5233_v14 = vstv %s5198_s5  ;;  %v2941_v45 = vmul.f32 %v2888_v6, %v5125_v8 }
0x1263   :  { %v2923_v53 = vsub.f32 1.5, %v2922_v29  ;;  %v1667_v59 = vmul.f32 %v5233_v14, %v4630_v23 }
0x1264   :  { %v3554_v27 = vpop.eup %3553  ;;  %v5184_v25 = vadd.f32 1e-12, %v2843_v30  ;;  %v5186_v42 = vadd.f32 1e-12, %v2847_v48  ;;  %v2966_v30 = vadd.f32 %v5223_v7, %v2955_v11 }
0x1265   :  { %v3556_v50 = vpop.eup %3555  ;;  %v2924_v51 = vmul.f32 %v3552_v26, %v2923_v53  ;;  %v2890_v28 = vmul.f32 %v3554_v27, %v2854_v24  ;;  %vm2896_vm1 = vweird.f32 %v3554_v27  ;;  %v5241_v53 = vstv %s5204_s8 }
0x1266   :  { %v2930_v32 = vmul.f32 %v3556_v50, %v5178_v13  ;;  %3557 = vrsqrt.f32 %v5184_v25  ;;  %vm2936_vm2 = vweird.f32 %v3556_v50  ;;  %vm2897_vm5 = vmor %vm2895_vm4, %vm2896_vm1  ;;  %vm2865_vm9 = vweird.f32 %v5184_v25 }
0x1267   :  { %v2928_v35 = vsel %vm2927_vm13, %v3552_v26, %v2924_v51  ;;  %v2891_v1 = vmul.f32 %v3554_v27, %v2890_v28  ;;  %3559 = vrsqrt.f32 %v5186_v42  ;;  %vm2937_vm7 = vmor %vm2935_vm6, %vm2936_vm2  ;;  %v2952_v28 = vmul.f32 %v5195_v49, %v2941_v45 }
0x1268   :  { %v2945_v16 = vmul.f32 %v2928_v35, %v5131_v22  ;;  %v2931_v31 = vmul.f32 %v3556_v50, %v2930_v32  ;;  %vm2905_vm13 = vweird.f32 %v5186_v42  ;;  %v2976_v32 = vmul.f32 %v5241_v53, %v2966_v30 }
0x1269   :  { %v2892_v40 = vmul.f32 0.5, %v2891_v1  ;;  %v2824_v33 = vpop.xlane.xlu2 %2823  ;;  %v1668_v35 = vmul.f32 %v5233_v14, %v4633_v46  ;;  %v3288_v46 = vld [vmem:[%s5323_s19] sm:$0xff]  ;;  %v1661_v30 = vmul.f32 %v5233_v14, %v4585_v57 }
0x126a   :  { %v2932_v52 = vmul.f32 0.5, %v2931_v31  ;;  %v2844_v9 = vmul.f32 %v2824_v33, %v3847_v62  ;;  %v2956_v58 = vmul.f32 %v5195_v49, %v2945_v16  ;;  %v3289_v16 = vld [vmem:[%s5323_s19 + $0x8] sm:$0xff] }
0x126b   :  { %v2893_v22 = vsub.f32 1.5, %v2892_v40  ;;  %3054 = vmatpush.bf16.msra.mxu0 %v3289_v16 }
0x126c   :  { %v3558_v19 = vpop.eup %3557  ;;  %v2933_v61 = vsub.f32 1.5, %v2932_v52  ;;  %v5207_v43 = vadd.f32 1e-12, %v2844_v9  ;;  %v2967_v38 = vadd.f32 %v5223_v7, %v2956_v58 }
0x126d   :  { %v3560_v47 = vpop.eup %3559  ;;  %v2894_v21 = vmul.f32 %v3554_v27, %v2893_v22  ;;  %v2860_v0 = vmul.f32 %v3558_v19, %v5184_v25  ;;  %vm2866_vm8 = vweird.f32 %v3558_v19 }
0x126e   :  { %v2934_v60 = vmul.f32 %v3556_v50, %v2933_v61  ;;  %v2900_v2 = vmul.f32 %v3560_v47, %v5186_v42  ;;  %3561 = vrsqrt.f32 %v5207_v43  ;;  %vm2906_vm10 = vweird.f32 %v3560_v47  ;;  %vm2867_vm11 = vmor %vm2865_vm9, %vm2866_vm8 }
0x126f   :  { %v2898_v26 = vsel %vm2897_vm5, %v3554_v27, %v2894_v21  ;;  %v2861_v24 = vmul.f32 %v3558_v19, %v2860_v0  ;;  %v2977_v27 = vmul.f32 %v5241_v53, %v2967_v38  ;;  %vm2907_vm14 = vmor %vm2905_vm13, %vm2906_vm10  ;;  %v1666_v42 = vmul.f32 %v5233_v14, %v4618_v44  ;;  %3055 = vmatpush.bf16.msra.mxu0 %v3288_v46 }
0x1270   :  { %v2938_v37 = vsel %vm2937_vm7, %v3556_v50, %v2934_v60  ;;  %v2901_v13 = vmul.f32 %v3560_v47, %v2900_v2  ;;  %v2942_v41 = vmul.f32 %v2898_v26, %v5140_v5  ;;  %vm2875_vm1 = vweird.f32 %v5207_v43 }
0x1271   :  { %v2946_v15 = vmul.f32 %v2938_v37, %v5138_v18  ;;  %v2862_v29 = vmul.f32 0.5, %v2861_v24  ;;  %v2985_v40 = vadd.f32 %v2977_v27, %v1667_v59  ;;  %v2984_v22 = vadd.f32 %v2976_v32, %v1666_v42 }
0x1272   :  { %v2902_v55 = vmul.f32 0.5, %v2901_v13  ;;  %v2953_v8 = vmul.f32 %v5195_v49, %v2942_v41  ;;  %v1665_v0 = vmul.f32 %v5233_v14, %v4615_v12  ;;  %v1664_v60 = vmul.f32 %v5233_v14, %v4605_v54 }
0x1273   :  { %v2957_v48 = vmul.f32 %v5195_v49, %v2946_v15  ;;  %v2863_v56 = vsub.f32 1.5, %v2862_v29  ;;  %v1663_v12 = vmul.f32 %v5233_v14, %v4602_v20 }
0x1274   :  { %v3562_v5 = vpop.eup %3561  ;;  %v2903_v18 = vsub.f32 1.5, %v2902_v55  ;;  %v2964_v4 = vadd.f32 %v5223_v7, %v2953_v8 }
0x1275   :  { %v2864_v50 = vmul.f32 %v3558_v19, %v2863_v56  ;;  %v2870_v23 = vmul.f32 %v3562_v5, %v5207_v43  ;;  %v2968_v51 = vadd.f32 %v5223_v7, %v2957_v48  ;;  %vm2876_vm15 = vweird.f32 %v3562_v5 }
0x1276   :  { %v2904_v63 = vmul.f32 %v3560_v47, %v2903_v18  ;;  %v2974_v21 = vmul.f32 %v5241_v53, %v2964_v4  ;;  %vm2877_vm2 = vmor %vm2875_vm1, %vm2876_vm15 }
0x1277   :  { %v2868_v25 = vsel %vm2867_vm11, %v3558_v19, %v2864_v50  ;;  %v2871_v36 = vmul.f32 %v3562_v5, %v2870_v23  ;;  %v2978_v1 = vmul.f32 %v5241_v53, %v2968_v51  ;;  %v2963_v19 = vadd.f32 %v5223_v7, %v2952_v28 }
0x1278   :  { %v2939_v31 = vmul.f32 %v2868_v25, %v5152_v3  ;;  %v2908_v34 = vsel %vm2907_vm14, %v3560_v47, %v2904_v63  ;;  %v2988_v3 = vstv %s5325_s21  ;;  %v2982_v38 = vadd.f32 %v2974_v21, %v1664_v60 }
0x1279   :  { %v2943_v33 = vmul.f32 %v2908_v34, %v5150_v10  ;;  %v2872_v52 = vmul.f32 0.5, %v2871_v36  ;;  %v2986_v9 = vadd.f32 %v2978_v1, %v1668_v35  ;;  %v2995_v47 = vmul.f32 %v2988_v3, %v2985_v40 }
0x127a   :  { %v2950_v61 = vmul.f32 %v5195_v49, %v2939_v31  ;;  %v2994_v6 = vmul.f32 %v2988_v3, %v2984_v22  ;;  %v2973_v43 = vmul.f32 %v5241_v53, %v2963_v19  ;;  %v2992_v55 = vmul.f32 %v2988_v3, %v2982_v38 }
0x127b   :  { %v2954_v44 = vmul.f32 %v5195_v49, %v2943_v33  ;;  %v2873_v58 = vsub.f32 1.5, %v2872_v52  ;;  %v2996_v10 = vmul.f32 %v2988_v3, %v2986_v9 }
0x127c   :  { %v2961_v37 = vadd.f32 %v5223_v7, %v2950_v61  ;;  %v2981_v15 = vadd.f32 %v2973_v43, %v1663_v12 }
0x127d   :  { %v2874_v11 = vmul.f32 %v3562_v5, %v2873_v58  ;;  %3013 = vmatpush.msra.mxu3 %v2996_v10  ;;  %v2965_v62 = vadd.f32 %v5223_v7, %v2954_v44 }
0x127e   :  { %v2971_v45 = vmul.f32 %v5241_v53, %v2961_v37  ;;  %v2991_v20 = vmul.f32 %v2988_v3, %v2981_v15 }
0x127f   :  { %v2878_v2 = vsel %vm2877_vm2, %v3562_v5, %v2874_v11  ;;  %3014 = vmatpush.msra.mxu3 %v2995_v47  ;;  %v2975_v26 = vmul.f32 %v5241_v53, %v2965_v62  ;;  %v2997_v5 = vld [vmem:[%s5322_s18] sm:$0xff] }
0x1280   :  { %v2940_v24 = vmul.f32 %v2878_v2, %v5161_v39  ;;  %v1662_v39 = vmul.f32 %v5233_v14, %v4588_v17  ;;  %v2998_v17 = vld [vmem:[%s5322_s18 + $0x8] sm:$0xff]  ;;  %s3620_s18 = smov 128  }
0x1281   :  { %3015 = vmatpush.msra.mxu3 %v2994_v6  ;;  %v2983_v13 = vadd.f32 %v2975_v26, %v1665_v0 }
0x1282   :  { %v2951_v41 = vmul.f32 %v5195_v49, %v2940_v24  ;;  %v2979_v49 = vadd.f32 %v2971_v45, %v1661_v30 }
0x1283   :  { %v2993_v54 = vmul.f32 %v2988_v3, %v2983_v13 }
0x1284   :  { %v2962_v29 = vadd.f32 %v5223_v7, %v2951_v41  ;;  %v2989_v7 = vmul.f32 %v2988_v3, %v2979_v49 }
0x1285   :  { %3016 = vmatpush.msra.mxu3 %v2993_v54 }
0x1286   :  { %v2972_v59 = vmul.f32 %v5241_v53, %v2962_v29 }
0x1287   :  { %3017 = vmatpush.msra.mxu3 %v2992_v55 }
0x1288   :  { %v2980_v48 = vadd.f32 %v2972_v59, %v1662_v39 }
0x1289   :  { %3018 = vmatpush.msra.mxu3 %v2991_v20 }
0x128a   :  { %v2990_v56 = vmul.f32 %v2988_v3, %v2980_v48 }
0x128c   :  { %3019 = vmatpush.msra.mxu3 %v2990_v56 }
0x128e   :  { %3020 = vmatpush.msra.mxu3 %v2989_v7 }
0x128f   :  { %3257 = vmatmul.msk.f32.vlgmr.msra.gmra.mxu3 %vm527_vm12, %v2997_v5 }
0x1297   :  { %3258 = vmatmul.msk.f32.gmra.mxu3 %vm527_vm12, %v2998_v17 }
0x1312   :  { %v3022_v57 = vpop.f32.mrf.mxu3 }
0x131a   :  { %v3025_v14 = vpop.f32.mrf.mxu3 }
0x131b   :  { %v3028_v53 = vpack.c.bf16 %v3025_v14, %v3022_v57 }
0x131d   :  { %3267 = vmatmul.msk.bf16.vlgmr.msra.gmra.mxu0 %vm170_vm0, %v3028_v53 }
0x139a   :  { %v3057_v18 = vpop.f32.mrf.mxu0 }
0x139b   :  { %3063 = vst.msk [vmem:[#allocation7] sm:$0xff] %vm3062_vm3, %v3057_v18 }
0x13a2   :  { %v3059_v27 = vpop.f32.mrf.mxu0 }
0x13a3   :  { %3064 = vst.msk [vmem:[#allocation7 + $0x8] sm:$0xff] %vm3062_vm3, %v3059_v27 }
0x13a4   :  { %3077 = dma.vmem_to_hbm [thread:$0]  %s3070_s10, 256, %s3072_s30, [#allocation5], %s3620_s18, %s3620_s18, %s3621_s4  }
0x13a5   :  { %3609 = dma.done.wait [#allocation5], 256  }
0x13a6   :  { %3610 = vsyncadd [#allocation5], 4294967040 }
0x13a7   :  { %3082 = vsyncpa [#allocation5], 1 }
0x13a8   :  { %3083 = vsyncpa [#allocation6], 1 }

</bundles_post_ra>
